<compile_context>
chip_gen: v5e
topology: v5e:2x2
jax: 0.10.0
libtpu: 0.0.40
codegen_flags: <defaults>
</compile_context>

<pallas_src>
import math

import jax
import jax.numpy as jnp
from jax import lax
from jax.experimental import pallas as pl
from jax.experimental.pallas import tpu as pltpu

LN_EPS = 1e-5


def _layernorm(x, gamma, beta, axis):
    # PyTorch LayerNorm semantics: biased variance, eps inside rsqrt.
    mu = jnp.mean(x, axis=axis, keepdims=True)
    var = jnp.mean(jnp.square(x - mu), axis=axis, keepdims=True)
    return (x - mu) * lax.rsqrt(var + LN_EPS) * gamma + beta


def _gelu_exact(x):
    # nn.GELU() default is the exact erf formulation.
    return 0.5 * x * (1.0 + lax.erf(x * (1.0 / math.sqrt(2.0))))


def mixer_block_kernel(
    x_ref,                                    # (bt, S, H)
    g1_ref, b1_ref,                           # token LN gamma/beta      (S, 1)
    w1t_ref, c1_ref,                          # token Linear1            (T, S), (T, 1)
    w2t_ref, c2_ref,                          # token Linear2            (S, T), (S, 1)
    g2_ref, b2_ref,                           # channel LN gamma/beta    (1, H)
    w3_ref, c3_ref,                           # channel Linear1          (H, C), (1, C)
    w4_ref, c4_ref,                           # channel Linear2          (C, H), (1, H)
    o_ref,                                    # (bt, S, H)
    xres_ref,                                 # VMEM scratch (bt, S, H) f32
):
    bt, s, hdim = x_ref.shape
    cd = w3_ref.dtype                         # matmul operand dtype (bf16 by default)

    # ---- token mixing ------------------------------------------------------
    # Weight-stationary orientation: tok = W2 @ gelu(W1 @ LN_S(x_b)).  Weights are
    # stored PyTorch-style (out, in), so mixing along S needs no transposes at all,
    # and the residual stays in (S, H) layout throughout.
    w1t = w1t_ref[...]
    w2t = w2t_ref[...]
    g1 = g1_ref[...]
    b1 = b1_ref[...]
    c1 = c1_ref[...]
    c2 = c2_ref[...]
    for b in range(bt):                       # static unroll over the batch block
        xb = x_ref[b].astype(jnp.float32)                               # (S, H)
        xn = _layernorm(xb, g1, b1, axis=0)                             # LN over patches
        h = jnp.dot(w1t, xn.astype(cd),
                    preferred_element_type=jnp.float32) + c1            # (T, H)
        h = _gelu_exact(h)
        tok = jnp.dot(w2t, h.astype(cd),
                      preferred_element_type=jnp.float32) + c2          # (S, H)
        xres_ref[b] = xb + tok                                          # residual, f32

    # ---- channel mixing ------------------------------------------------------
    # Fold the whole batch block into the M dimension: (bt*S, H) @ (H, C) etc.
    xr = xres_ref[...].reshape(bt * s, hdim)
    xn = _layernorm(xr, g2_ref[...], b2_ref[...], axis=-1)
    h = jnp.dot(xn.astype(cd), w3_ref[...],
                preferred_element_type=jnp.float32) + c3_ref[...]       # (bt*S, C)
    h = _gelu_exact(h)
    ch = jnp.dot(h.astype(cd), w4_ref[...],
                 preferred_element_type=jnp.float32) + c4_ref[...]      # (bt*S, H)

    o_ref[...] = (xr + ch).reshape(bt, s, hdim).astype(o_ref.dtype)


def mlp_mixer_block(x, params, *, block_b=8, compute_dtype=jnp.bfloat16):
    """x: (B, S, H).  params: dict from init_params (weights stored f32)."""
    B, S, H = x.shape
    T = params["w1t"].shape[0]
    C = params["w3"].shape[1]

    # Batch block: largest divisor of B not exceeding block_b (exact grid, no masking).
    bt = max(d for d in range(1, min(block_b, B) + 1) if B % d == 0)
    nb = B // bt

    # Matmul operands in compute_dtype; LN params / biases stay f32 (applied after
    # the f32 MXU accumulation).
    wkeys = ("w1t", "w2t", "w3", "w4")
    cast = {k: (v.astype(compute_dtype) if k in wkeys else v) for k, v in params.items()}
    order = ("g1", "b1", "w1t", "c1", "w2t", "c2", "g2", "b2", "w3", "c3", "w4", "c4")
    param_args = [cast[k] for k in order]

    io_spec = pl.BlockSpec((bt, S, H), lambda i: (i, 0, 0))

    def param_specs(single_buffer):
        specs = []
        for k in order:
            shp = cast[k].shape
            idx = lambda i, n=len(shp): (0,) * n
            if single_buffer:
                # Constant across the grid: double-buffering only doubles VMEM.
                specs.append(pl.BlockSpec(shp, idx, pipeline_mode=pl.Buffered(1)))
            else:
                specs.append(pl.BlockSpec(shp, idx))
        return specs

    # Advisory cost estimate for XLA scheduling around the custom call.
    flops = 4 * B * S * H * (T + C)
    transcendentals = B * (H * T + S * C)                 # one erf per GELU element
    bytes_accessed = (2 * x.size * x.dtype.itemsize
                      + sum(int(v.size) * v.dtype.itemsize for v in param_args))
    cost = pl.CostEstimate(flops=flops, transcendentals=transcendentals,
                           bytes_accessed=bytes_accessed)

    # Explicit VMEM budget (raised above the 16/32 MiB scoped defaults, capped for v7x).
    wsize = jnp.dtype(compute_dtype).itemsize
    block_bytes = bt * S * H * x.dtype.itemsize
    weight_bytes = (2 * T * S + 2 * H * C) * wsize + (4 * S + 2 * T + 4 * H + C) * 4
    act_bytes = (3 * bt * S * max(H, C) + 2 * max(T, S) * H) * 4
    est = 4 * block_bytes + weight_bytes + bt * S * H * 4 + act_bytes
    vmem_limit = int(min(max(2 * est, 32 * 1024 * 1024), 96 * 1024 * 1024))

    def call(single_buffer):
        return pl.pallas_call(
            mixer_block_kernel,
            out_shape=jax.ShapeDtypeStruct((B, S, H), x.dtype),
            grid_spec=pltpu.PrefetchScalarGridSpec(
                num_scalar_prefetch=0,
                grid=(nb,),
                in_specs=[io_spec] + param_specs(single_buffer),
                out_specs=io_spec,
                scratch_shapes=[pltpu.VMEM((bt, S, H), jnp.float32)],
            ),
            compiler_params=pltpu.CompilerParams(
                dimension_semantics=("parallel",),
                vmem_limit_bytes=vmem_limit,
            ),
            cost_estimate=cost,
        )(x, *param_args)

    try:
        return call(single_buffer=True)
    except Exception:
        # Fallback if this Pallas version rejects pl.Buffered(1) on constant operands.
        return call(single_buffer=False)


def init_params(key, num_patches, hidden_dim, tokens_mlp_dim, channels_mlp_dim):
    """Deterministic synthetic init.  Token weights kept in PyTorch (out, in) layout
    (used as LHS in the kernel); channel weights stored (in, out) (activations as LHS)."""
    S, H, T, C = num_patches, hidden_dim, tokens_mlp_dim, channels_mlp_dim
    ks = jax.random.split(key, 8)
    n = lambda k, shape, scale: (scale * jax.random.normal(k, shape)).astype(jnp.float32)
    return {
        # token mixing
        "g1": jnp.ones((S, 1), jnp.float32),
        "b1": jnp.zeros((S, 1), jnp.float32),
        "w1t": n(ks[0], (T, S), 1.0 / math.sqrt(S)),
        "c1": n(ks[1], (T, 1), 0.02),
        "w2t": n(ks[2], (S, T), 1.0 / math.sqrt(T)),
        "c2": n(ks[3], (S, 1), 0.02),
        # channel mixing
        "g2": jnp.ones((1, H), jnp.float32),
        "b2": jnp.zeros((1, H), jnp.float32),
        "w3": n(ks[4], (H, C), 1.0 / math.sqrt(H)),
        "c3": n(ks[5], (1, C), 0.02),
        "w4": n(ks[6], (C, H), 1.0 / math.sqrt(C)),
        "c4": n(ks[7], (1, H), 0.02),
    }


def reference_mixer_block(x, p):
    """Pure-JAX f32 reference mirroring the PyTorch forward pass exactly."""
    xt = jnp.transpose(x, (0, 2, 1))                               # (B, H, S)
    xn = _layernorm(xt, p["g1"][:, 0], p["b1"][:, 0], axis=-1)
    h = _gelu_exact(xn @ p["w1t"].T + p["c1"][:, 0])
    tok = h @ p["w2t"].T + p["c2"][:, 0]
    x = x + jnp.transpose(tok, (0, 2, 1))
    xn = _layernorm(x, p["g2"][0], p["b2"][0], axis=-1)
    h = _gelu_exact(xn @ p["w3"] + p["c3"][0])
    return x + (h @ p["w4"] + p["c4"][0])


if __name__ == "__main__":
    # Small shapes consistent with the module: (B, num_patches, hidden_dim)
    B, num_patches, hidden_dim = 4, 16, 32
    tokens_mlp_dim, channels_mlp_dim = 48, 64

    key = jax.random.PRNGKey(0)
    kx, kp = jax.random.split(key)
    x = jax.random.normal(kx, (B, num_patches, hidden_dim), dtype=jnp.float32)
    params = init_params(kp, num_patches, hidden_dim, tokens_mlp_dim, channels_mlp_dim)

    ref = reference_mixer_block(x, params)

    # Default path: bf16 MXU operands, f32 accumulation (relaxed tolerance).
    out = jax.block_until_ready(mlp_mixer_block(x, params, block_b=2))
    assert out.shape == (B, num_patches, hidden_dim)
    err = float(jnp.max(jnp.abs(out - ref)))
    assert jnp.allclose(out, ref, atol=1e-1, rtol=5e-2), err

    # Exact-precision path (f32 operands) matches the reference tightly.
    out32 = jax.block_until_ready(
        mlp_mixer_block(x, params, block_b=2, compute_dtype=jnp.float32))
    err32 = float(jnp.max(jnp.abs(out32 - ref)))
    assert jnp.allclose(out32, ref, atol=2e-5, rtol=2e-5), err32

    print("KERNEL_OK")
</pallas_src>

<mosaic_0001>
module attributes {stable_mosaic.version = 11 : i64} {
  func.func @mixer_block_kernel(%arg0: i32, %arg1: memref<2x16x32xf32, #tpu.memory_space<vmem>>, %arg2: memref<16x1xf32, #tpu.memory_space<vmem>>, %arg3: memref<16x1xf32, #tpu.memory_space<vmem>>, %arg4: memref<48x16xbf16, #tpu.memory_space<vmem>>, %arg5: memref<48x1xf32, #tpu.memory_space<vmem>>, %arg6: memref<16x48xbf16, #tpu.memory_space<vmem>>, %arg7: memref<16x1xf32, #tpu.memory_space<vmem>>, %arg8: memref<1x32xf32, #tpu.memory_space<vmem>>, %arg9: memref<1x32xf32, #tpu.memory_space<vmem>>, %arg10: memref<32x64xbf16, #tpu.memory_space<vmem>>, %arg11: memref<1x64xf32, #tpu.memory_space<vmem>>, %arg12: memref<64x32xbf16, #tpu.memory_space<vmem>>, %arg13: memref<1x32xf32, #tpu.memory_space<vmem>>, %arg14: memref<2x16x32xf32, #tpu.memory_space<vmem>>, %arg15: memref<2x16x32xf32, #tpu.memory_space<vmem>>) attributes {dimension_semantics = [#tpu.dimension_semantics<parallel>], iteration_bounds = array<i64: 2>, scalar_prefetch = 0 : i64, scratch_operands = 1 : i64, tpu.core_type = #tpu.core_type<tc>, window_params = [{transform_indices = @transform_0, window_bounds = array<i64: 2, 16, 32>}, {pipeline_mode = #tpu.pipeline_mode<synchronous>, transform_indices = @transform_1, window_bounds = array<i64: 16, 1>}, {pipeline_mode = #tpu.pipeline_mode<synchronous>, transform_indices = @transform_2, window_bounds = array<i64: 16, 1>}, {pipeline_mode = #tpu.pipeline_mode<synchronous>, transform_indices = @transform_3, window_bounds = array<i64: 48, 16>}, {pipeline_mode = #tpu.pipeline_mode<synchronous>, transform_indices = @transform_4, window_bounds = array<i64: 48, 1>}, {pipeline_mode = #tpu.pipeline_mode<synchronous>, transform_indices = @transform_5, window_bounds = array<i64: 16, 48>}, {pipeline_mode = #tpu.pipeline_mode<synchronous>, transform_indices = @transform_6, window_bounds = array<i64: 16, 1>}, {pipeline_mode = #tpu.pipeline_mode<synchronous>, transform_indices = @transform_7, window_bounds = array<i64: 1, 32>}, {pipeline_mode = #tpu.pipeline_mode<synchronous>, transform_indices = @transform_8, window_bounds = array<i64: 1, 32>}, {pipeline_mode = #tpu.pipeline_mode<synchronous>, transform_indices = @transform_9, window_bounds = array<i64: 32, 64>}, {pipeline_mode = #tpu.pipeline_mode<synchronous>, transform_indices = @transform_10, window_bounds = array<i64: 1, 64>}, {pipeline_mode = #tpu.pipeline_mode<synchronous>, transform_indices = @transform_11, window_bounds = array<i64: 64, 32>}, {pipeline_mode = #tpu.pipeline_mode<synchronous>, transform_indices = @transform_12, window_bounds = array<i64: 1, 32>}, {transform_indices = @transform_13, window_bounds = array<i64: 2, 16, 32>}]} {
    %c0 = arith.constant 0 : index
    %c0_0 = arith.constant 0 : index
    %0 = vector.load %arg4[%c0, %c0_0] : memref<48x16xbf16, #tpu.memory_space<vmem>>, vector<48x16xbf16>
    %c0_1 = arith.constant 0 : index
    %c0_2 = arith.constant 0 : index
    %1 = vector.load %arg6[%c0_1, %c0_2] : memref<16x48xbf16, #tpu.memory_space<vmem>>, vector<16x48xbf16>
    %c0_3 = arith.constant 0 : index
    %c0_4 = arith.constant 0 : index
    %2 = vector.load %arg2[%c0_3, %c0_4] : memref<16x1xf32, #tpu.memory_space<vmem>>, vector<16x1xf32>
    %c0_5 = arith.constant 0 : index
    %c0_6 = arith.constant 0 : index
    %3 = vector.load %arg3[%c0_5, %c0_6] : memref<16x1xf32, #tpu.memory_space<vmem>>, vector<16x1xf32>
    %c0_7 = arith.constant 0 : index
    %c0_8 = arith.constant 0 : index
    %4 = vector.load %arg5[%c0_7, %c0_8] : memref<48x1xf32, #tpu.memory_space<vmem>>, vector<48x1xf32>
    %c0_9 = arith.constant 0 : index
    %c0_10 = arith.constant 0 : index
    %5 = vector.load %arg7[%c0_9, %c0_10] : memref<16x1xf32, #tpu.memory_space<vmem>>, vector<16x1xf32>
    %c0_11 = arith.constant 0 : index
    %c0_12 = arith.constant 0 : index
    %c0_13 = arith.constant 0 : index
    %6 = vector.load %arg1[%c0_11, %c0_12, %c0_13] : memref<2x16x32xf32, #tpu.memory_space<vmem>>, vector<1x16x32xf32>
    %7 = vector.shape_cast %6 : vector<1x16x32xf32> to vector<16x32xf32>
    %cst = arith.constant dense<0.000000e+00> : vector<32xf32>
    %8 = vector.multi_reduction <add>, %7, %cst [0] : vector<16x32xf32> to vector<32xf32>
    %9 = vector.shape_cast %8 : vector<32xf32> to vector<1x32xf32>
    %cst_14 = arith.constant 1.600000e+01 : f32
    %10 = vector.broadcast %cst_14 : f32 to vector<1x32xf32>
    %11 = arith.divf %9, %10 : vector<1x32xf32>
    %12 = vector.broadcast %11 : vector<1x32xf32> to vector<16x32xf32>
    %13 = arith.subf %7, %12 : vector<16x32xf32>
    %14 = arith.mulf %13, %13 : vector<16x32xf32>
    %cst_15 = arith.constant dense<0.000000e+00> : vector<32xf32>
    %15 = vector.multi_reduction <add>, %14, %cst_15 [0] : vector<16x32xf32> to vector<32xf32>
    %16 = vector.shape_cast %15 : vector<32xf32> to vector<1x32xf32>
    %cst_16 = arith.constant 1.600000e+01 : f32
    %17 = vector.broadcast %cst_16 : f32 to vector<1x32xf32>
    %18 = arith.divf %16, %17 : vector<1x32xf32>
    %19 = vector.broadcast %11 : vector<1x32xf32> to vector<16x32xf32>
    %20 = arith.subf %7, %19 : vector<16x32xf32>
    %cst_17 = arith.constant 9.99999974E-6 : f32
    %21 = vector.broadcast %cst_17 : f32 to vector<1x32xf32>
    %22 = arith.addf %18, %21 : vector<1x32xf32>
    %23 = math.rsqrt %22 : vector<1x32xf32>
    %24 = vector.broadcast %23 : vector<1x32xf32> to vector<16x32xf32>
    %25 = arith.mulf %20, %24 : vector<16x32xf32>
    %26 = vector.broadcast %2 : vector<16x1xf32> to vector<16x32xf32>
    %27 = arith.mulf %25, %26 : vector<16x32xf32>
    %28 = vector.broadcast %3 : vector<16x1xf32> to vector<16x32xf32>
    %29 = arith.addf %27, %28 : vector<16x32xf32>
    %30 = arith.truncf %29 : vector<16x32xf32> to vector<16x32xbf16>
    %cst_18 = arith.constant dense<0.000000e+00> : vector<48x32xf32>
    %31 = tpu.matmul %0, %30, %cst_18 {dimension_numbers = #tpu.dot_dimension_numbers<[1], [0], [0], [1], [0, 0, 1, 1], [], []>} : vector<48x16xbf16>, vector<16x32xbf16>, vector<48x32xf32> -> vector<48x32xf32>
    %32 = vector.broadcast %4 : vector<48x1xf32> to vector<48x32xf32>
    %33 = arith.addf %31, %32 : vector<48x32xf32>
    %cst_19 = arith.constant 5.000000e-01 : f32
    %34 = vector.broadcast %cst_19 : f32 to vector<48x32xf32>
    %35 = arith.mulf %34, %33 : vector<48x32xf32>
    %cst_20 = arith.constant 0.707106769 : f32
    %36 = vector.broadcast %cst_20 : f32 to vector<48x32xf32>
    %37 = arith.mulf %33, %36 : vector<48x32xf32>
    %38 = math.erf %37 : vector<48x32xf32>
    %cst_21 = arith.constant 1.000000e+00 : f32
    %39 = vector.broadcast %cst_21 : f32 to vector<48x32xf32>
    %40 = arith.addf %39, %38 : vector<48x32xf32>
    %41 = arith.mulf %35, %40 : vector<48x32xf32>
    %42 = arith.truncf %41 : vector<48x32xf32> to vector<48x32xbf16>
    %cst_22 = arith.constant dense<0.000000e+00> : vector<16x32xf32>
    %43 = tpu.matmul %1, %42, %cst_22 {dimension_numbers = #tpu.dot_dimension_numbers<[1], [0], [0], [1], [0, 0, 1, 1], [], []>} : vector<16x48xbf16>, vector<48x32xbf16>, vector<16x32xf32> -> vector<16x32xf32>
    %44 = vector.broadcast %5 : vector<16x1xf32> to vector<16x32xf32>
    %45 = arith.addf %43, %44 : vector<16x32xf32>
    %46 = arith.addf %7, %45 : vector<16x32xf32>
    %c0_23 = arith.constant 0 : index
    %c0_24 = arith.constant 0 : index
    %c0_25 = arith.constant 0 : index
    %47 = vector.load %arg15[%c0_23, %c0_24, %c0_25] : memref<2x16x32xf32, #tpu.memory_space<vmem>>, vector<1x16x32xf32>
    %48 = vector.shape_cast %47 : vector<1x16x32xf32> to vector<16x32xf32>
    %49 = vector.shape_cast %46 : vector<16x32xf32> to vector<1x16x32xf32>
    tpu.vector_store %arg15[%c0_23, %c0_24, %c0_25], %49 {strides = array<i32>} : memref<2x16x32xf32, #tpu.memory_space<vmem>>, vector<1x16x32xf32>,
    %c1 = arith.constant 1 : index
    %c0_26 = arith.constant 0 : index
    %c0_27 = arith.constant 0 : index
    %50 = vector.load %arg1[%c1, %c0_26, %c0_27] : memref<2x16x32xf32, #tpu.memory_space<vmem>>, vector<1x16x32xf32>
    %51 = vector.shape_cast %50 : vector<1x16x32xf32> to vector<16x32xf32>
    %cst_28 = arith.constant dense<0.000000e+00> : vector<32xf32>
    %52 = vector.multi_reduction <add>, %51, %cst_28 [0] : vector<16x32xf32> to vector<32xf32>
    %53 = vector.shape_cast %52 : vector<32xf32> to vector<1x32xf32>
    %cst_29 = arith.constant 1.600000e+01 : f32
    %54 = vector.broadcast %cst_29 : f32 to vector<1x32xf32>
    %55 = arith.divf %53, %54 : vector<1x32xf32>
    %56 = vector.broadcast %55 : vector<1x32xf32> to vector<16x32xf32>
    %57 = arith.subf %51, %56 : vector<16x32xf32>
    %58 = arith.mulf %57, %57 : vector<16x32xf32>
    %cst_30 = arith.constant dense<0.000000e+00> : vector<32xf32>
    %59 = vector.multi_reduction <add>, %58, %cst_30 [0] : vector<16x32xf32> to vector<32xf32>
    %60 = vector.shape_cast %59 : vector<32xf32> to vector<1x32xf32>
    %cst_31 = arith.constant 1.600000e+01 : f32
    %61 = vector.broadcast %cst_31 : f32 to vector<1x32xf32>
    %62 = arith.divf %60, %61 : vector<1x32xf32>
    %63 = vector.broadcast %55 : vector<1x32xf32> to vector<16x32xf32>
    %64 = arith.subf %51, %63 : vector<16x32xf32>
    %cst_32 = arith.constant 9.99999974E-6 : f32
    %65 = vector.broadcast %cst_32 : f32 to vector<1x32xf32>
    %66 = arith.addf %62, %65 : vector<1x32xf32>
    %67 = math.rsqrt %66 : vector<1x32xf32>
    %68 = vector.broadcast %67 : vector<1x32xf32> to vector<16x32xf32>
    %69 = arith.mulf %64, %68 : vector<16x32xf32>
    %70 = vector.broadcast %2 : vector<16x1xf32> to vector<16x32xf32>
    %71 = arith.mulf %69, %70 : vector<16x32xf32>
    %72 = vector.broadcast %3 : vector<16x1xf32> to vector<16x32xf32>
    %73 = arith.addf %71, %72 : vector<16x32xf32>
    %74 = arith.truncf %73 : vector<16x32xf32> to vector<16x32xbf16>
    %cst_33 = arith.constant dense<0.000000e+00> : vector<48x32xf32>
    %75 = tpu.matmul %0, %74, %cst_33 {dimension_numbers = #tpu.dot_dimension_numbers<[1], [0], [0], [1], [0, 0, 1, 1], [], []>} : vector<48x16xbf16>, vector<16x32xbf16>, vector<48x32xf32> -> vector<48x32xf32>
    %76 = vector.broadcast %4 : vector<48x1xf32> to vector<48x32xf32>
    %77 = arith.addf %75, %76 : vector<48x32xf32>
    %cst_34 = arith.constant 5.000000e-01 : f32
    %78 = vector.broadcast %cst_34 : f32 to vector<48x32xf32>
    %79 = arith.mulf %78, %77 : vector<48x32xf32>
    %cst_35 = arith.constant 0.707106769 : f32
    %80 = vector.broadcast %cst_35 : f32 to vector<48x32xf32>
    %81 = arith.mulf %77, %80 : vector<48x32xf32>
    %82 = math.erf %81 : vector<48x32xf32>
    %cst_36 = arith.constant 1.000000e+00 : f32
    %83 = vector.broadcast %cst_36 : f32 to vector<48x32xf32>
    %84 = arith.addf %83, %82 : vector<48x32xf32>
    %85 = arith.mulf %79, %84 : vector<48x32xf32>
    %86 = arith.truncf %85 : vector<48x32xf32> to vector<48x32xbf16>
    %cst_37 = arith.constant dense<0.000000e+00> : vector<16x32xf32>
    %87 = tpu.matmul %1, %86, %cst_37 {dimension_numbers = #tpu.dot_dimension_numbers<[1], [0], [0], [1], [0, 0, 1, 1], [], []>} : vector<16x48xbf16>, vector<48x32xbf16>, vector<16x32xf32> -> vector<16x32xf32>
    %88 = vector.broadcast %5 : vector<16x1xf32> to vector<16x32xf32>
    %89 = arith.addf %87, %88 : vector<16x32xf32>
    %90 = arith.addf %51, %89 : vector<16x32xf32>
    %c1_38 = arith.constant 1 : index
    %c0_39 = arith.constant 0 : index
    %c0_40 = arith.constant 0 : index
    %91 = vector.load %arg15[%c1_38, %c0_39, %c0_40] : memref<2x16x32xf32, #tpu.memory_space<vmem>>, vector<1x16x32xf32>
    %92 = vector.shape_cast %91 : vector<1x16x32xf32> to vector<16x32xf32>
    %93 = vector.shape_cast %90 : vector<16x32xf32> to vector<1x16x32xf32>
    tpu.vector_store %arg15[%c1_38, %c0_39, %c0_40], %93 {strides = array<i32>} : memref<2x16x32xf32, #tpu.memory_space<vmem>>, vector<1x16x32xf32>,
    %c0_41 = arith.constant 0 : index
    %c0_42 = arith.constant 0 : index
    %c0_43 = arith.constant 0 : index
    %94 = vector.load %arg15[%c0_41, %c0_42, %c0_43] : memref<2x16x32xf32, #tpu.memory_space<vmem>>, vector<2x16x32xf32>
    %95 = vector.shape_cast %94 : vector<2x16x32xf32> to vector<32x32xf32>
    %c0_44 = arith.constant 0 : index
    %c0_45 = arith.constant 0 : index
    %96 = vector.load %arg8[%c0_44, %c0_45] : memref<1x32xf32, #tpu.memory_space<vmem>>, vector<1x32xf32>
    %c0_46 = arith.constant 0 : index
    %c0_47 = arith.constant 0 : index
    %97 = vector.load %arg9[%c0_46, %c0_47] : memref<1x32xf32, #tpu.memory_space<vmem>>, vector<1x32xf32>
    %cst_48 = arith.constant dense<0.000000e+00> : vector<32xf32>
    %98 = vector.multi_reduction <add>, %95, %cst_48 [1] : vector<32x32xf32> to vector<32xf32>
    %99 = vector.shape_cast %98 : vector<32xf32> to vector<32x1xf32>
    %cst_49 = arith.constant 3.200000e+01 : f32
    %100 = vector.broadcast %cst_49 : f32 to vector<32x1xf32>
    %101 = arith.divf %99, %100 : vector<32x1xf32>
    %102 = vector.broadcast %101 : vector<32x1xf32> to vector<32x32xf32>
    %103 = arith.subf %95, %102 : vector<32x32xf32>
    %104 = arith.mulf %103, %103 : vector<32x32xf32>
    %cst_50 = arith.constant dense<0.000000e+00> : vector<32xf32>
    %105 = vector.multi_reduction <add>, %104, %cst_50 [1] : vector<32x32xf32> to vector<32xf32>
    %106 = vector.shape_cast %105 : vector<32xf32> to vector<32x1xf32>
    %cst_51 = arith.constant 3.200000e+01 : f32
    %107 = vector.broadcast %cst_51 : f32 to vector<32x1xf32>
    %108 = arith.divf %106, %107 : vector<32x1xf32>
    %109 = vector.broadcast %101 : vector<32x1xf32> to vector<32x32xf32>
    %110 = arith.subf %95, %109 : vector<32x32xf32>
    %cst_52 = arith.constant 9.99999974E-6 : f32
    %111 = vector.broadcast %cst_52 : f32 to vector<32x1xf32>
    %112 = arith.addf %108, %111 : vector<32x1xf32>
    %113 = math.rsqrt %112 : vector<32x1xf32>
    %114 = vector.broadcast %113 : vector<32x1xf32> to vector<32x32xf32>
    %115 = arith.mulf %110, %114 : vector<32x32xf32>
    %116 = vector.broadcast %96 : vector<1x32xf32> to vector<32x32xf32>
    %117 = arith.mulf %115, %116 : vector<32x32xf32>
    %118 = vector.broadcast %97 : vector<1x32xf32> to vector<32x32xf32>
    %119 = arith.addf %117, %118 : vector<32x32xf32>
    %120 = arith.truncf %119 : vector<32x32xf32> to vector<32x32xbf16>
    %c0_53 = arith.constant 0 : index
    %c0_54 = arith.constant 0 : index
    %121 = vector.load %arg10[%c0_53, %c0_54] : memref<32x64xbf16, #tpu.memory_space<vmem>>, vector<32x64xbf16>
    %cst_55 = arith.constant dense<0.000000e+00> : vector<32x64xf32>
    %122 = tpu.matmul %120, %121, %cst_55 {dimension_numbers = #tpu.dot_dimension_numbers<[1], [0], [0], [1], [0, 0, 1, 1], [], []>} : vector<32x32xbf16>, vector<32x64xbf16>, vector<32x64xf32> -> vector<32x64xf32>
    %c0_56 = arith.constant 0 : index
    %c0_57 = arith.constant 0 : index
    %123 = vector.load %arg11[%c0_56, %c0_57] : memref<1x64xf32, #tpu.memory_space<vmem>>, vector<1x64xf32>
    %124 = vector.broadcast %123 : vector<1x64xf32> to vector<32x64xf32>
    %125 = arith.addf %122, %124 : vector<32x64xf32>
    %cst_58 = arith.constant 5.000000e-01 : f32
    %126 = vector.broadcast %cst_58 : f32 to vector<32x64xf32>
    %127 = arith.mulf %126, %125 : vector<32x64xf32>
    %cst_59 = arith.constant 0.707106769 : f32
    %128 = vector.broadcast %cst_59 : f32 to vector<32x64xf32>
    %129 = arith.mulf %125, %128 : vector<32x64xf32>
    %130 = math.erf %129 : vector<32x64xf32>
    %cst_60 = arith.constant 1.000000e+00 : f32
    %131 = vector.broadcast %cst_60 : f32 to vector<32x64xf32>
    %132 = arith.addf %131, %130 : vector<32x64xf32>
    %133 = arith.mulf %127, %132 : vector<32x64xf32>
    %134 = arith.truncf %133 : vector<32x64xf32> to vector<32x64xbf16>
    %c0_61 = arith.constant 0 : index
    %c0_62 = arith.constant 0 : index
    %135 = vector.load %arg12[%c0_61, %c0_62] : memref<64x32xbf16, #tpu.memory_space<vmem>>, vector<64x32xbf16>
    %cst_63 = arith.constant dense<0.000000e+00> : vector<32x32xf32>
    %136 = tpu.matmul %134, %135, %cst_63 {dimension_numbers = #tpu.dot_dimension_numbers<[1], [0], [0], [1], [0, 0, 1, 1], [], []>} : vector<32x64xbf16>, vector<64x32xbf16>, vector<32x32xf32> -> vector<32x32xf32>
    %c0_64 = arith.constant 0 : index
    %c0_65 = arith.constant 0 : index
    %137 = vector.load %arg13[%c0_64, %c0_65] : memref<1x32xf32, #tpu.memory_space<vmem>>, vector<1x32xf32>
    %138 = vector.broadcast %137 : vector<1x32xf32> to vector<32x32xf32>
    %139 = arith.addf %136, %138 : vector<32x32xf32>
    %140 = arith.addf %95, %139 : vector<32x32xf32>
    %141 = vector.shape_cast %140 : vector<32x32xf32> to vector<2x16x32xf32>
    %c0_66 = arith.constant 0 : index
    %c0_67 = arith.constant 0 : index
    %c0_68 = arith.constant 0 : index
    %142 = vector.load %arg14[%c0_66, %c0_67, %c0_68] : memref<2x16x32xf32, #tpu.memory_space<vmem>>, vector<2x16x32xf32>
    tpu.vector_store %arg14[%c0_66, %c0_67, %c0_68], %141 {strides = array<i32>} : memref<2x16x32xf32, #tpu.memory_space<vmem>>, vector<2x16x32xf32>,
    return
  }
  func.func @transform_0(%arg0: i32) -> (i32, i32, i32) {
    %c0_i32 = arith.constant 0 : i32
    %c0_i32_0 = arith.constant 0 : i32
    %c0_i32_1 = arith.constant 0 : i32
    return %arg0, %c0_i32, %c0_i32_0 : i32, i32, i32
  }
  func.func @transform_1(%arg0: i32) -> (i32, i32) {
    %c0_i32 = arith.constant 0 : i32
    %c0_i32_0 = arith.constant 0 : i32
    %c0_i32_1 = arith.constant 0 : i32
    return %c0_i32, %c0_i32_0 : i32, i32
  }
  func.func @transform_2(%arg0: i32) -> (i32, i32) {
    %c0_i32 = arith.constant 0 : i32
    %c0_i32_0 = arith.constant 0 : i32
    %c0_i32_1 = arith.constant 0 : i32
    return %c0_i32, %c0_i32_0 : i32, i32
  }
  func.func @transform_3(%arg0: i32) -> (i32, i32) {
    %c0_i32 = arith.constant 0 : i32
    %c0_i32_0 = arith.constant 0 : i32
    %c0_i32_1 = arith.constant 0 : i32
    return %c0_i32, %c0_i32_0 : i32, i32
  }
  func.func @transform_4(%arg0: i32) -> (i32, i32) {
    %c0_i32 = arith.constant 0 : i32
    %c0_i32_0 = arith.constant 0 : i32
    %c0_i32_1 = arith.constant 0 : i32
    return %c0_i32, %c0_i32_0 : i32, i32
  }
  func.func @transform_5(%arg0: i32) -> (i32, i32) {
    %c0_i32 = arith.constant 0 : i32
    %c0_i32_0 = arith.constant 0 : i32
    %c0_i32_1 = arith.constant 0 : i32
    return %c0_i32, %c0_i32_0 : i32, i32
  }
  func.func @transform_6(%arg0: i32) -> (i32, i32) {
    %c0_i32 = arith.constant 0 : i32
    %c0_i32_0 = arith.constant 0 : i32
    %c0_i32_1 = arith.constant 0 : i32
    return %c0_i32, %c0_i32_0 : i32, i32
  }
  func.func @transform_7(%arg0: i32) -> (i32, i32) {
    %c0_i32 = arith.constant 0 : i32
    %c0_i32_0 = arith.constant 0 : i32
    %c0_i32_1 = arith.constant 0 : i32
    return %c0_i32, %c0_i32_0 : i32, i32
  }
  func.func @transform_8(%arg0: i32) -> (i32, i32) {
    %c0_i32 = arith.constant 0 : i32
    %c0_i32_0 = arith.constant 0 : i32
    %c0_i32_1 = arith.constant 0 : i32
    return %c0_i32, %c0_i32_0 : i32, i32
  }
  func.func @transform_9(%arg0: i32) -> (i32, i32) {
    %c0_i32 = arith.constant 0 : i32
    %c0_i32_0 = arith.constant 0 : i32
    %c0_i32_1 = arith.constant 0 : i32
    return %c0_i32, %c0_i32_0 : i32, i32
  }
  func.func @transform_10(%arg0: i32) -> (i32, i32) {
    %c0_i32 = arith.constant 0 : i32
    %c0_i32_0 = arith.constant 0 : i32
    %c0_i32_1 = arith.constant 0 : i32
    return %c0_i32, %c0_i32_0 : i32, i32
  }
  func.func @transform_11(%arg0: i32) -> (i32, i32) {
    %c0_i32 = arith.constant 0 : i32
    %c0_i32_0 = arith.constant 0 : i32
    %c0_i32_1 = arith.constant 0 : i32
    return %c0_i32, %c0_i32_0 : i32, i32
  }
  func.func @transform_12(%arg0: i32) -> (i32, i32) {
    %c0_i32 = arith.constant 0 : i32
    %c0_i32_0 = arith.constant 0 : i32
    %c0_i32_1 = arith.constant 0 : i32
    return %c0_i32, %c0_i32_0 : i32, i32
  }
  func.func @transform_13(%arg0: i32) -> (i32, i32, i32) {
    %c0_i32 = arith.constant 0 : i32
    %c0_i32_0 = arith.constant 0 : i32
    %c0_i32_1 = arith.constant 0 : i32
    return %arg0, %c0_i32, %c0_i32_0 : i32, i32, i32
  }
}

module attributes {stable_mosaic.version = 11 : i64} {
  func.func @mixer_block_kernel(%arg0: i32, %arg1: memref<2x16x32xf32, #tpu.memory_space<vmem>>, %arg2: memref<16x1xf32, #tpu.memory_space<vmem>>, %arg3: memref<16x1xf32, #tpu.memory_space<vmem>>, %arg4: memref<48x16xbf16, #tpu.memory_space<vmem>>, %arg5: memref<48x1xf32, #tpu.memory_space<vmem>>, %arg6: memref<16x48xbf16, #tpu.memory_space<vmem>>, %arg7: memref<16x1xf32, #tpu.memory_space<vmem>>, %arg8: memref<1x32xf32, #tpu.memory_space<vmem>>, %arg9: memref<1x32xf32, #tpu.memory_space<vmem>>, %arg10: memref<32x64xbf16, #tpu.memory_space<vmem>>, %arg11: memref<1x64xf32, #tpu.memory_space<vmem>>, %arg12: memref<64x32xbf16, #tpu.memory_space<vmem>>, %arg13: memref<1x32xf32, #tpu.memory_space<vmem>>, %arg14: memref<2x16x32xf32, #tpu.memory_space<vmem>>, %arg15: memref<2x16x32xf32, #tpu.memory_space<vmem>>) attributes {dimension_semantics = [#tpu.dimension_semantics<parallel>], iteration_bounds = array<i64: 2>, scalar_prefetch = 0 : i64, scratch_operands = 1 : i64, tpu.core_type = #tpu.core_type<tc>, window_params = [{transform_indices = @transform_0, window_bounds = array<i64: 2, 16, 32>}, {pipeline_mode = #tpu.pipeline_mode<synchronous>, transform_indices = @transform_1, window_bounds = array<i64: 16, 1>}, {pipeline_mode = #tpu.pipeline_mode<synchronous>, transform_indices = @transform_2, window_bounds = array<i64: 16, 1>}, {pipeline_mode = #tpu.pipeline_mode<synchronous>, transform_indices = @transform_3, window_bounds = array<i64: 48, 16>}, {pipeline_mode = #tpu.pipeline_mode<synchronous>, transform_indices = @transform_4, window_bounds = array<i64: 48, 1>}, {pipeline_mode = #tpu.pipeline_mode<synchronous>, transform_indices = @transform_5, window_bounds = array<i64: 16, 48>}, {pipeline_mode = #tpu.pipeline_mode<synchronous>, transform_indices = @transform_6, window_bounds = array<i64: 16, 1>}, {pipeline_mode = #tpu.pipeline_mode<synchronous>, transform_indices = @transform_7, window_bounds = array<i64: 1, 32>}, {pipeline_mode = #tpu.pipeline_mode<synchronous>, transform_indices = @transform_8, window_bounds = array<i64: 1, 32>}, {pipeline_mode = #tpu.pipeline_mode<synchronous>, transform_indices = @transform_9, window_bounds = array<i64: 32, 64>}, {pipeline_mode = #tpu.pipeline_mode<synchronous>, transform_indices = @transform_10, window_bounds = array<i64: 1, 64>}, {pipeline_mode = #tpu.pipeline_mode<synchronous>, transform_indices = @transform_11, window_bounds = array<i64: 64, 32>}, {pipeline_mode = #tpu.pipeline_mode<synchronous>, transform_indices = @transform_12, window_bounds = array<i64: 1, 32>}, {transform_indices = @transform_13, window_bounds = array<i64: 2, 16, 32>}]} {
    %c0 = arith.constant 0 : index
    %c0_0 = arith.constant 0 : index
    %0 = vector.load %arg4[%c0, %c0_0] : memref<48x16xbf16, #tpu.memory_space<vmem>>, vector<48x16xbf16>
    %c0_1 = arith.constant 0 : index
    %c0_2 = arith.constant 0 : index
    %1 = vector.load %arg6[%c0_1, %c0_2] : memref<16x48xbf16, #tpu.memory_space<vmem>>, vector<16x48xbf16>
    %c0_3 = arith.constant 0 : index
    %c0_4 = arith.constant 0 : index
    %2 = vector.load %arg2[%c0_3, %c0_4] : memref<16x1xf32, #tpu.memory_space<vmem>>, vector<16x1xf32>
    %c0_5 = arith.constant 0 : index
    %c0_6 = arith.constant 0 : index
    %3 = vector.load %arg3[%c0_5, %c0_6] : memref<16x1xf32, #tpu.memory_space<vmem>>, vector<16x1xf32>
    %c0_7 = arith.constant 0 : index
    %c0_8 = arith.constant 0 : index
    %4 = vector.load %arg5[%c0_7, %c0_8] : memref<48x1xf32, #tpu.memory_space<vmem>>, vector<48x1xf32>
    %c0_9 = arith.constant 0 : index
    %c0_10 = arith.constant 0 : index
    %5 = vector.load %arg7[%c0_9, %c0_10] : memref<16x1xf32, #tpu.memory_space<vmem>>, vector<16x1xf32>
    %c0_11 = arith.constant 0 : index
    %c0_12 = arith.constant 0 : index
    %c0_13 = arith.constant 0 : index
    %6 = vector.load %arg1[%c0_11, %c0_12, %c0_13] : memref<2x16x32xf32, #tpu.memory_space<vmem>>, vector<1x16x32xf32>
    %7 = vector.shape_cast %6 : vector<1x16x32xf32> to vector<16x32xf32>
    %cst = arith.constant dense<0.000000e+00> : vector<32xf32>
    %8 = vector.multi_reduction <add>, %7, %cst [0] : vector<16x32xf32> to vector<32xf32>
    %9 = vector.shape_cast %8 : vector<32xf32> to vector<1x32xf32>
    %cst_14 = arith.constant 1.600000e+01 : f32
    %10 = vector.broadcast %cst_14 : f32 to vector<1x32xf32>
    %11 = arith.divf %9, %10 : vector<1x32xf32>
    %12 = vector.broadcast %11 : vector<1x32xf32> to vector<16x32xf32>
    %13 = arith.subf %7, %12 : vector<16x32xf32>
    %14 = arith.mulf %13, %13 : vector<16x32xf32>
    %cst_15 = arith.constant dense<0.000000e+00> : vector<32xf32>
    %15 = vector.multi_reduction <add>, %14, %cst_15 [0] : vector<16x32xf32> to vector<32xf32>
    %16 = vector.shape_cast %15 : vector<32xf32> to vector<1x32xf32>
    %cst_16 = arith.constant 1.600000e+01 : f32
    %17 = vector.broadcast %cst_16 : f32 to vector<1x32xf32>
    %18 = arith.divf %16, %17 : vector<1x32xf32>
    %19 = vector.broadcast %11 : vector<1x32xf32> to vector<16x32xf32>
    %20 = arith.subf %7, %19 : vector<16x32xf32>
    %cst_17 = arith.constant 9.99999974E-6 : f32
    %21 = vector.broadcast %cst_17 : f32 to vector<1x32xf32>
    %22 = arith.addf %18, %21 : vector<1x32xf32>
    %23 = math.rsqrt %22 : vector<1x32xf32>
    %24 = vector.broadcast %23 : vector<1x32xf32> to vector<16x32xf32>
    %25 = arith.mulf %20, %24 : vector<16x32xf32>
    %26 = vector.broadcast %2 : vector<16x1xf32> to vector<16x32xf32>
    %27 = arith.mulf %25, %26 : vector<16x32xf32>
    %28 = vector.broadcast %3 : vector<16x1xf32> to vector<16x32xf32>
    %29 = arith.addf %27, %28 : vector<16x32xf32>
    %30 = arith.truncf %29 : vector<16x32xf32> to vector<16x32xbf16>
    %cst_18 = arith.constant dense<0.000000e+00> : vector<48x32xf32>
    %31 = tpu.matmul %0, %30, %cst_18 {dimension_numbers = #tpu.dot_dimension_numbers<[1], [0], [0], [1], [0, 0, 1, 1], [], []>} : vector<48x16xbf16>, vector<16x32xbf16>, vector<48x32xf32> -> vector<48x32xf32>
    %32 = vector.broadcast %4 : vector<48x1xf32> to vector<48x32xf32>
    %33 = arith.addf %31, %32 : vector<48x32xf32>
    %cst_19 = arith.constant 5.000000e-01 : f32
    %34 = vector.broadcast %cst_19 : f32 to vector<48x32xf32>
    %35 = arith.mulf %34, %33 : vector<48x32xf32>
    %cst_20 = arith.constant 0.707106769 : f32
    %36 = vector.broadcast %cst_20 : f32 to vector<48x32xf32>
    %37 = arith.mulf %33, %36 : vector<48x32xf32>
    %38 = math.erf %37 : vector<48x32xf32>
    %cst_21 = arith.constant 1.000000e+00 : f32
    %39 = vector.broadcast %cst_21 : f32 to vector<48x32xf32>
    %40 = arith.addf %39, %38 : vector<48x32xf32>
    %41 = arith.mulf %35, %40 : vector<48x32xf32>
    %42 = arith.truncf %41 : vector<48x32xf32> to vector<48x32xbf16>
    %cst_22 = arith.constant dense<0.000000e+00> : vector<16x32xf32>
    %43 = tpu.matmul %1, %42, %cst_22 {dimension_numbers = #tpu.dot_dimension_numbers<[1], [0], [0], [1], [0, 0, 1, 1], [], []>} : vector<16x48xbf16>, vector<48x32xbf16>, vector<16x32xf32> -> vector<16x32xf32>
    %44 = vector.broadcast %5 : vector<16x1xf32> to vector<16x32xf32>
    %45 = arith.addf %43, %44 : vector<16x32xf32>
    %46 = arith.addf %7, %45 : vector<16x32xf32>
    %c0_23 = arith.constant 0 : index
    %c0_24 = arith.constant 0 : index
    %c0_25 = arith.constant 0 : index
    %47 = vector.load %arg15[%c0_23, %c0_24, %c0_25] : memref<2x16x32xf32, #tpu.memory_space<vmem>>, vector<1x16x32xf32>
    %48 = vector.shape_cast %47 : vector<1x16x32xf32> to vector<16x32xf32>
    %49 = vector.shape_cast %46 : vector<16x32xf32> to vector<1x16x32xf32>
    tpu.vector_store %arg15[%c0_23, %c0_24, %c0_25], %49 {strides = array<i32>} : memref<2x16x32xf32, #tpu.memory_space<vmem>>, vector<1x16x32xf32>,
    %c1 = arith.constant 1 : index
    %c0_26 = arith.constant 0 : index
    %c0_27 = arith.constant 0 : index
    %50 = vector.load %arg1[%c1, %c0_26, %c0_27] : memref<2x16x32xf32, #tpu.memory_space<vmem>>, vector<1x16x32xf32>
    %51 = vector.shape_cast %50 : vector<1x16x32xf32> to vector<16x32xf32>
    %cst_28 = arith.constant dense<0.000000e+00> : vector<32xf32>
    %52 = vector.multi_reduction <add>, %51, %cst_28 [0] : vector<16x32xf32> to vector<32xf32>
    %53 = vector.shape_cast %52 : vector<32xf32> to vector<1x32xf32>
    %cst_29 = arith.constant 1.600000e+01 : f32
    %54 = vector.broadcast %cst_29 : f32 to vector<1x32xf32>
    %55 = arith.divf %53, %54 : vector<1x32xf32>
    %56 = vector.broadcast %55 : vector<1x32xf32> to vector<16x32xf32>
    %57 = arith.subf %51, %56 : vector<16x32xf32>
    %58 = arith.mulf %57, %57 : vector<16x32xf32>
    %cst_30 = arith.constant dense<0.000000e+00> : vector<32xf32>
    %59 = vector.multi_reduction <add>, %58, %cst_30 [0] : vector<16x32xf32> to vector<32xf32>
    %60 = vector.shape_cast %59 : vector<32xf32> to vector<1x32xf32>
    %cst_31 = arith.constant 1.600000e+01 : f32
    %61 = vector.broadcast %cst_31 : f32 to vector<1x32xf32>
    %62 = arith.divf %60, %61 : vector<1x32xf32>
    %63 = vector.broadcast %55 : vector<1x32xf32> to vector<16x32xf32>
    %64 = arith.subf %51, %63 : vector<16x32xf32>
    %cst_32 = arith.constant 9.99999974E-6 : f32
    %65 = vector.broadcast %cst_32 : f32 to vector<1x32xf32>
    %66 = arith.addf %62, %65 : vector<1x32xf32>
    %67 = math.rsqrt %66 : vector<1x32xf32>
    %68 = vector.broadcast %67 : vector<1x32xf32> to vector<16x32xf32>
    %69 = arith.mulf %64, %68 : vector<16x32xf32>
    %70 = vector.broadcast %2 : vector<16x1xf32> to vector<16x32xf32>
    %71 = arith.mulf %69, %70 : vector<16x32xf32>
    %72 = vector.broadcast %3 : vector<16x1xf32> to vector<16x32xf32>
    %73 = arith.addf %71, %72 : vector<16x32xf32>
    %74 = arith.truncf %73 : vector<16x32xf32> to vector<16x32xbf16>
    %cst_33 = arith.constant dense<0.000000e+00> : vector<48x32xf32>
    %75 = tpu.matmul %0, %74, %cst_33 {dimension_numbers = #tpu.dot_dimension_numbers<[1], [0], [0], [1], [0, 0, 1, 1], [], []>} : vector<48x16xbf16>, vector<16x32xbf16>, vector<48x32xf32> -> vector<48x32xf32>
    %76 = vector.broadcast %4 : vector<48x1xf32> to vector<48x32xf32>
    %77 = arith.addf %75, %76 : vector<48x32xf32>
    %cst_34 = arith.constant 5.000000e-01 : f32
    %78 = vector.broadcast %cst_34 : f32 to vector<48x32xf32>
    %79 = arith.mulf %78, %77 : vector<48x32xf32>
    %cst_35 = arith.constant 0.707106769 : f32
    %80 = vector.broadcast %cst_35 : f32 to vector<48x32xf32>
    %81 = arith.mulf %77, %80 : vector<48x32xf32>
    %82 = math.erf %81 : vector<48x32xf32>
    %cst_36 = arith.constant 1.000000e+00 : f32
    %83 = vector.broadcast %cst_36 : f32 to vector<48x32xf32>
    %84 = arith.addf %83, %82 : vector<48x32xf32>
    %85 = arith.mulf %79, %84 : vector<48x32xf32>
    %86 = arith.truncf %85 : vector<48x32xf32> to vector<48x32xbf16>
    %cst_37 = arith.constant dense<0.000000e+00> : vector<16x32xf32>
    %87 = tpu.matmul %1, %86, %cst_37 {dimension_numbers = #tpu.dot_dimension_numbers<[1], [0], [0], [1], [0, 0, 1, 1], [], []>} : vector<16x48xbf16>, vector<48x32xbf16>, vector<16x32xf32> -> vector<16x32xf32>
    %88 = vector.broadcast %5 : vector<16x1xf32> to vector<16x32xf32>
    %89 = arith.addf %87, %88 : vector<16x32xf32>
    %90 = arith.addf %51, %89 : vector<16x32xf32>
    %c1_38 = arith.constant 1 : index
    %c0_39 = arith.constant 0 : index
    %c0_40 = arith.constant 0 : index
    %91 = vector.load %arg15[%c1_38, %c0_39, %c0_40] : memref<2x16x32xf32, #tpu.memory_space<vmem>>, vector<1x16x32xf32>
    %92 = vector.shape_cast %91 : vector<1x16x32xf32> to vector<16x32xf32>
    %93 = vector.shape_cast %90 : vector<16x32xf32> to vector<1x16x32xf32>
    tpu.vector_store %arg15[%c1_38, %c0_39, %c0_40], %93 {strides = array<i32>} : memref<2x16x32xf32, #tpu.memory_space<vmem>>, vector<1x16x32xf32>,
    %c0_41 = arith.constant 0 : index
    %c0_42 = arith.constant 0 : index
    %c0_43 = arith.constant 0 : index
    %94 = vector.load %arg15[%c0_41, %c0_42, %c0_43] : memref<2x16x32xf32, #tpu.memory_space<vmem>>, vector<2x16x32xf32>
    %95 = vector.shape_cast %94 : vector<2x16x32xf32> to vector<32x32xf32>
    %c0_44 = arith.constant 0 : index
    %c0_45 = arith.constant 0 : index
    %96 = vector.load %arg8[%c0_44, %c0_45] : memref<1x32xf32, #tpu.memory_space<vmem>>, vector<1x32xf32>
    %c0_46 = arith.constant 0 : index
    %c0_47 = arith.constant 0 : index
    %97 = vector.load %arg9[%c0_46, %c0_47] : memref<1x32xf32, #tpu.memory_space<vmem>>, vector<1x32xf32>
    %cst_48 = arith.constant dense<0.000000e+00> : vector<32xf32>
    %98 = vector.multi_reduction <add>, %95, %cst_48 [1] : vector<32x32xf32> to vector<32xf32>
    %99 = vector.shape_cast %98 : vector<32xf32> to vector<32x1xf32>
    %cst_49 = arith.constant 3.200000e+01 : f32
    %100 = vector.broadcast %cst_49 : f32 to vector<32x1xf32>
    %101 = arith.divf %99, %100 : vector<32x1xf32>
    %102 = vector.broadcast %101 : vector<32x1xf32> to vector<32x32xf32>
    %103 = arith.subf %95, %102 : vector<32x32xf32>
    %104 = arith.mulf %103, %103 : vector<32x32xf32>
    %cst_50 = arith.constant dense<0.000000e+00> : vector<32xf32>
    %105 = vector.multi_reduction <add>, %104, %cst_50 [1] : vector<32x32xf32> to vector<32xf32>
    %106 = vector.shape_cast %105 : vector<32xf32> to vector<32x1xf32>
    %cst_51 = arith.constant 3.200000e+01 : f32
    %107 = vector.broadcast %cst_51 : f32 to vector<32x1xf32>
    %108 = arith.divf %106, %107 : vector<32x1xf32>
    %109 = vector.broadcast %101 : vector<32x1xf32> to vector<32x32xf32>
    %110 = arith.subf %95, %109 : vector<32x32xf32>
    %cst_52 = arith.constant 9.99999974E-6 : f32
    %111 = vector.broadcast %cst_52 : f32 to vector<32x1xf32>
    %112 = arith.addf %108, %111 : vector<32x1xf32>
    %113 = math.rsqrt %112 : vector<32x1xf32>
    %114 = vector.broadcast %113 : vector<32x1xf32> to vector<32x32xf32>
    %115 = arith.mulf %110, %114 : vector<32x32xf32>
    %116 = vector.broadcast %96 : vector<1x32xf32> to vector<32x32xf32>
    %117 = arith.mulf %115, %116 : vector<32x32xf32>
    %118 = vector.broadcast %97 : vector<1x32xf32> to vector<32x32xf32>
    %119 = arith.addf %117, %118 : vector<32x32xf32>
    %120 = arith.truncf %119 : vector<32x32xf32> to vector<32x32xbf16>
    %c0_53 = arith.constant 0 : index
    %c0_54 = arith.constant 0 : index
    %121 = vector.load %arg10[%c0_53, %c0_54] : memref<32x64xbf16, #tpu.memory_space<vmem>>, vector<32x64xbf16>
    %cst_55 = arith.constant dense<0.000000e+00> : vector<32x64xf32>
    %122 = tpu.matmul %120, %121, %cst_55 {dimension_numbers = #tpu.dot_dimension_numbers<[1], [0], [0], [1], [0, 0, 1, 1], [], []>} : vector<32x32xbf16>, vector<32x64xbf16>, vector<32x64xf32> -> vector<32x64xf32>
    %c0_56 = arith.constant 0 : index
    %c0_57 = arith.constant 0 : index
    %123 = vector.load %arg11[%c0_56, %c0_57] : memref<1x64xf32, #tpu.memory_space<vmem>>, vector<1x64xf32>
    %124 = vector.broadcast %123 : vector<1x64xf32> to vector<32x64xf32>
    %125 = arith.addf %122, %124 : vector<32x64xf32>
    %cst_58 = arith.constant 5.000000e-01 : f32
    %126 = vector.broadcast %cst_58 : f32 to vector<32x64xf32>
    %127 = arith.mulf %126, %125 : vector<32x64xf32>
    %cst_59 = arith.constant 0.707106769 : f32
    %128 = vector.broadcast %cst_59 : f32 to vector<32x64xf32>
    %129 = arith.mulf %125, %128 : vector<32x64xf32>
    %130 = math.erf %129 : vector<32x64xf32>
    %cst_60 = arith.constant 1.000000e+00 : f32
    %131 = vector.broadcast %cst_60 : f32 to vector<32x64xf32>
    %132 = arith.addf %131, %130 : vector<32x64xf32>
    %133 = arith.mulf %127, %132 : vector<32x64xf32>
    %134 = arith.truncf %133 : vector<32x64xf32> to vector<32x64xbf16>
    %c0_61 = arith.constant 0 : index
    %c0_62 = arith.constant 0 : index
    %135 = vector.load %arg12[%c0_61, %c0_62] : memref<64x32xbf16, #tpu.memory_space<vmem>>, vector<64x32xbf16>
    %cst_63 = arith.constant dense<0.000000e+00> : vector<32x32xf32>
    %136 = tpu.matmul %134, %135, %cst_63 {dimension_numbers = #tpu.dot_dimension_numbers<[1], [0], [0], [1], [0, 0, 1, 1], [], []>} : vector<32x64xbf16>, vector<64x32xbf16>, vector<32x32xf32> -> vector<32x32xf32>
    %c0_64 = arith.constant 0 : index
    %c0_65 = arith.constant 0 : index
    %137 = vector.load %arg13[%c0_64, %c0_65] : memref<1x32xf32, #tpu.memory_space<vmem>>, vector<1x32xf32>
    %138 = vector.broadcast %137 : vector<1x32xf32> to vector<32x32xf32>
    %139 = arith.addf %136, %138 : vector<32x32xf32>
    %140 = arith.addf %95, %139 : vector<32x32xf32>
    %141 = vector.shape_cast %140 : vector<32x32xf32> to vector<2x16x32xf32>
    %c0_66 = arith.constant 0 : index
    %c0_67 = arith.constant 0 : index
    %c0_68 = arith.constant 0 : index
    %142 = vector.load %arg14[%c0_66, %c0_67, %c0_68] : memref<2x16x32xf32, #tpu.memory_space<vmem>>, vector<2x16x32xf32>
    tpu.vector_store %arg14[%c0_66, %c0_67, %c0_68], %141 {strides = array<i32>} : memref<2x16x32xf32, #tpu.memory_space<vmem>>, vector<2x16x32xf32>,
    return
  }
  func.func @transform_0(%arg0: i32) -> (i32, i32, i32) {
    %c0_i32 = arith.constant 0 : i32
    %c0_i32_0 = arith.constant 0 : i32
    %c0_i32_1 = arith.constant 0 : i32
    return %arg0, %c0_i32, %c0_i32_0 : i32, i32, i32
  }
  func.func @transform_1(%arg0: i32) -> (i32, i32) {
    %c0_i32 = arith.constant 0 : i32
    %c0_i32_0 = arith.constant 0 : i32
    %c0_i32_1 = arith.constant 0 : i32
    return %c0_i32, %c0_i32_0 : i32, i32
  }
  func.func @transform_2(%arg0: i32) -> (i32, i32) {
    %c0_i32 = arith.constant 0 : i32
    %c0_i32_0 = arith.constant 0 : i32
    %c0_i32_1 = arith.constant 0 : i32
    return %c0_i32, %c0_i32_0 : i32, i32
  }
  func.func @transform_3(%arg0: i32) -> (i32, i32) {
    %c0_i32 = arith.constant 0 : i32
    %c0_i32_0 = arith.constant 0 : i32
    %c0_i32_1 = arith.constant 0 : i32
    return %c0_i32, %c0_i32_0 : i32, i32
  }
  func.func @transform_4(%arg0: i32) -> (i32, i32) {
    %c0_i32 = arith.constant 0 : i32
    %c0_i32_0 = arith.constant 0 : i32
    %c0_i32_1 = arith.constant 0 : i32
    return %c0_i32, %c0_i32_0 : i32, i32
  }
  func.func @transform_5(%arg0: i32) -> (i32, i32) {
    %c0_i32 = arith.constant 0 : i32
    %c0_i32_0 = arith.constant 0 : i32
    %c0_i32_1 = arith.constant 0 : i32
    return %c0_i32, %c0_i32_0 : i32, i32
  }
  func.func @transform_6(%arg0: i32) -> (i32, i32) {
    %c0_i32 = arith.constant 0 : i32
    %c0_i32_0 = arith.constant 0 : i32
    %c0_i32_1 = arith.constant 0 : i32
    return %c0_i32, %c0_i32_0 : i32, i32
  }
  func.func @transform_7(%arg0: i32) -> (i32, i32) {
    %c0_i32 = arith.constant 0 : i32
    %c0_i32_0 = arith.constant 0 : i32
    %c0_i32_1 = arith.constant 0 : i32
    return %c0_i32, %c0_i32_0 : i32, i32
  }
  func.func @transform_8(%arg0: i32) -> (i32, i32) {
    %c0_i32 = arith.constant 0 : i32
    %c0_i32_0 = arith.constant 0 : i32
    %c0_i32_1 = arith.constant 0 : i32
    return %c0_i32, %c0_i32_0 : i32, i32
  }
  func.func @transform_9(%arg0: i32) -> (i32, i32) {
    %c0_i32 = arith.constant 0 : i32
    %c0_i32_0 = arith.constant 0 : i32
    %c0_i32_1 = arith.constant 0 : i32
    return %c0_i32, %c0_i32_0 : i32, i32
  }
  func.func @transform_10(%arg0: i32) -> (i32, i32) {
    %c0_i32 = arith.constant 0 : i32
    %c0_i32_0 = arith.constant 0 : i32
    %c0_i32_1 = arith.constant 0 : i32
    return %c0_i32, %c0_i32_0 : i32, i32
  }
  func.func @transform_11(%arg0: i32) -> (i32, i32) {
    %c0_i32 = arith.constant 0 : i32
    %c0_i32_0 = arith.constant 0 : i32
    %c0_i32_1 = arith.constant 0 : i32
    return %c0_i32, %c0_i32_0 : i32, i32
  }
  func.func @transform_12(%arg0: i32) -> (i32, i32) {
    %c0_i32 = arith.constant 0 : i32
    %c0_i32_0 = arith.constant 0 : i32
    %c0_i32_1 = arith.constant 0 : i32
    return %c0_i32, %c0_i32_0 : i32, i32
  }
  func.func @transform_13(%arg0: i32) -> (i32, i32, i32) {
    %c0_i32 = arith.constant 0 : i32
    %c0_i32_0 = arith.constant 0 : i32
    %c0_i32_1 = arith.constant 0 : i32
    return %arg0, %c0_i32, %c0_i32_0 : i32, i32, i32
  }
}

</mosaic_0001>

<bundles_post_ra>
// kernel: tpu_custom_call.1
= control target key start
LH: loop header
LB: loop body
LE: loop exit
PB: predicated region body
PF: predicated region fallthrough
CT: control target
= control target key end

     0   :  { %s2871_s0 = inlined_call_operand.vmem [shape: f32[4,16,32], index: 0, kind: input, shape index: {}]   ;;  %s2872_s1 = inlined_call_operand.vmem [shape: f32[16,1], index: 1, kind: input, shape index: {}]   ;;  %s2873_s2 = inlined_call_operand.vmem [shape: f32[16,1], index: 2, kind: input, shape index: {}]   ;;  %s2874_s3 = inlined_call_operand.vmem [shape: bf16[48,16], index: 3, kind: input, shape index: {}]   ;;  %s2875_s4 = inlined_call_operand.vmem [shape: f32[48,1], index: 4, kind: input, shape index: {}]   ;;  %s2876_s5 = inlined_call_operand.vmem [shape: bf16[16,48], index: 5, kind: input, shape index: {}]   ;;  %s2877_s6 = inlined_call_operand.vmem [shape: f32[16,1], index: 6, kind: input, shape index: {}]   ;;  %s2878_s7 = inlined_call_operand.vmem [shape: f32[1,32], index: 7, kind: input, shape index: {}]   ;;  %s2879_s8 = inlined_call_operand.vmem [shape: f32[1,32], index: 8, kind: input, shape index: {}]   ;;  %s2880_s9 = inlined_call_operand.vmem [shape: bf16[32,64], index: 9, kind: input, shape index: {}]   ;;  %s2881_s10 = inlined_call_operand.vmem [shape: f32[1,64], index: 10, kind: input, shape index: {}]   ;;  %s2882_s11 = inlined_call_operand.vmem [shape: bf16[64,32], index: 11, kind: input, shape index: {}]   ;;  %s2883_s12 = inlined_call_operand.vmem [shape: f32[1,32], index: 12, kind: input, shape index: {}]   ;;  %s2884_s13 = inlined_call_operand.hbm [shape: f32[4,16,32], index: 13, kind: output, shape index: {}]  }
   0x1   :  { %2887 = sst [smem:[#allocation9_spill]] %s2872_s1 }
   0x2   :  { %2888 = sst [smem:[#allocation10_spill]] %s2873_s2 }
   0x3   :  { %18 = vsyncpa [#allocation4], 0 }
   0x4   :  { %20 = vsyncpa [#allocation4 + $0x1], 0  ;;  %s2104_s25 = smov 0   ;;  %s2106_s26 = smov 0  }
   0x5   :  { %s2108_s27 = smov 0   ;;  %s2110_s28 = smov 0  }
   0x6 LB: > { %s2125_s29 = sadd.s32 4294967295, %s2027_s28   ;;  %s1765_s30 = sadd.s32 4294967294, %s2027_s28   ;;  %s2027_s28 = sphi %s2110_s28, %s2912_s28   ;;  %s2023_s27 = sphi %s2108_s27, %s2911_s27   ;;  %s2019_s26 = sphi %s2106_s26, %s2910_s26   ;;  %s2015_s25 = sphi %s2104_s25, %s2909_s25  }
   0x7   : > { %s2129_s14 = sadd.s32 1, %s2027_s28   ;;  %s311_s15 = sadd.s32 1, %s2023_s27 }
   0x8   : > { %s308_s16 = ssub.s32 %s2027_s28, %s2129_s14  ;;  %p321_p0 = scmp.ne.s32.totalorder %s2023_s27, %s2019_s26 }
   0x9   : > { %p309_p1 = scmp.eq.s32.totalorder %s308_s16, 0  ;;  %p322_p2 = scmp.eq.s32.totalorder %s2125_s29, 1 }
   0xa   : > { %p327_p3 = scmp.ne.s32.totalorder %s2019_s26, %s2015_s25  ;;  %p328_p4 = scmp.eq.s32.totalorder %s1765_s30, 1 }
   0xb   : > { %s2140_s17 = scalar_select %p309_p1, %s2023_s27, %s311_s15  }
   0xc   : > { %p2142_p5 = por %p322_p2, %p321_p0  ;;  %p2146_p6 = por %p328_p4, %p327_p3 }
   0xd   : > { %2889 = sst [smem:[#allocation6_spill]] %s2140_s17  ;;  %p1768_p7 = scmp.ge.s32.totalorder %s2027_s28, 1 }
   0xe   : > { %p392_p8 = scmp.lt.s32.totalorder %s2027_s28, 3 }
  0x10   : > { %p393_p9 = pnand %p1768_p7, %p392_p8 }
  0x12   : > { %396 = sbr.rel (%p393_p9) target bundleno = 1208 (0x4b8), region = 72 }
  0x17   : > { %s2892_s2 = sld [smem:[#allocation10_spill]]  ;;  %v2029_v2 = vmov 0   ;;  %s1770_s20 = sshll.u32 %s2125_s29, 1  ;;  %v461_v5 = vld [vmem:[%s2875_s4 + $0x18] sm:$0xff]  ;;  %v460_v6 = vld [vmem:[%s2875_s4 + $0x10] sm:$0xff]  ;;  %v464_v7 = vld [vmem:[%s2877_s6] sm:$0xff] }
  0x18   : > { %s2893_s1 = sld [smem:[#allocation9_spill]]  ;;  %1907 = vset.pattern.permute.xlu1 %v2029_v2  ;;  %1906 = vset.pattern.permute.xlu0 %v2029_v2  ;;  %p438_p10 = scmp.lt.s32.totalorder %s1770_s20, 3  ;;  %v459_v8 = vld [vmem:[%s2875_s4 + $0x8] sm:$0xff]  ;;  %vm468_vm0 = vcmask 261120   ;;  %v2030_v9 = vmov 16.0   ;;  %vm583_vm8 = vcmask 130048  }
  0x19   : > { %1908 = vset.pattern.permute.xlu2 %v2029_v2  ;;  %1913 = vrcp.f32 %v2030_v9  ;;  %s434_s17 = sand.u32 1, %s2019_s26   ;;  %s1861_s30 = sshll.u32 %s2125_s29, 5 }
  0x1a   : > { %s2914_s20 = smov (!%p438_p10, %s1770_s20), 3  ;;  %s1699_s22 = scalar_lea.hbm %s2884_s13, %s1861_s30 }
  0x1b   : > { %s1849_s24 = sshll.u32 %s2914_s20, 4  ;;  %s1687_s29 = scalar_lea.sflag [#allocation4], %s434_s17 }
  0x1c   : > { %s2174_s15 = scalar_lea.vmem %s2871_s0, %s1849_s24  ;;  %s1769_s24 = sshll.u32 %s434_s17, 5 }
  0x1d   : > { %v456_v0 = vld [vmem:[%s2892_s2] sm:$0xff]  ;;  %v457_v3 = vld [vmem:[%s2892_s2 + $0x8] sm:$0xff]  ;;  %v1799_v12 = vld [vmem:[%s2174_s15 + $0x10] sm:$0xff]  ;;  %s1702_s2 = sshll.u32 %s1699_s22, 4  ;;  %s1985_s16 = scalar_lea.hbm %s2884_s13, 64  ;;  %s1703_s2 = int_to_ptr.hbm [resolvable:$true] %s1702_s2 }
  0x1e   : > { %v454_v1 = vld [vmem:[%s2893_s1] sm:$0xff]  ;;  %527 = vperm.xlu1 %1907, %v456_v0   ;;  %v455_v4 = vld [vmem:[%s2893_s1 + $0x8] sm:$0xff]  ;;  %v1800_v15 = vld [vmem:[%s2174_s15 + $0x18] sm:$0xff]  ;;  %v924_v16 = vsel %vm468_vm0, %v1799_v12, 0.0  ;;  %s1979_s20 = sshra.s32 %s1703_s2, 4  ;;  %s1980_s20 = int_to_ptr.hbm [resolvable:$true] %s1979_s20 }
  0x1f   : > { %515 = vperm.xlu0 %1906, %v454_v1   ;;  %v466_v10 = vld [vmem:[%s2174_s15] sm:$0xff]  ;;  %v467_v11 = vld [vmem:[%s2174_s15 + $0x8] sm:$0xff]  ;;  %v925_v18 = vsel %vm468_vm0, %v1800_v15, 0.0  ;;  %v1914_v22 = vpop.eup %1913  ;;  %s1981_s23 = scalar_lea.hbm %s1980_s20, 32  ;;  %p1986_p0 = scmp.lt.s32.totalorder %s1980_s20, %s2884_s13 }
  0x20   : > { %v469_v13 = vsel %vm468_vm0, %v466_v10, 0.0  ;;  %v470_v14 = vsel %vm468_vm0, %v467_v11, 0.0  ;;  %v926_v19 = vadd.f32 %v925_v18, %v924_v16  ;;  %v479_v24 = vmul.f32 16.0, %v1914_v22  ;;  %p1982_p11 = scmp.ne.s32.totalorder %s1980_s20, %s1981_s23  ;;  %p1987_p1 = scmp.lt.s32.totalorder %s1985_s16, %s1981_s23 }
  0x21   : > { %v471_v17 = vadd.f32 %v470_v14, %v469_v13  ;;  %vm483_vm1 = vweird.f32 %v1914_v22 }
  0x22   : > { %v927_v21 = vrot.slane %v926_v19, 4  ;;  %v480_v27 = vsub.f32 1.0, %v479_v24  ;;  %p1983_p12 = pnand %p1982_p11, %p2142_p5  ;;  %p1988_p2 = por %p1987_p1, %p1986_p0 }
  0x23   : > { %v472_v20 = vrot.slane %v471_v17, 4 }
  0x24   : > { %v928_v25 = vadd.f32 %v927_v21, %v926_v19  ;;  %v481_v30 = vmul.f32 %v1914_v22, %v480_v27  ;;  %p1984_p13 = pneg %p1983_p12 }
  0x25   : > { %v473_v23 = vadd.f32 %v472_v20, %v471_v17 }
  0x26   : > { %532 = vperm.xlu1 %1907, %v457_v3   ;;  %v929_v28 = vrot.slane %v928_v25, 2  ;;  %v482_v33 = vadd.f32 %v1914_v22, %v481_v30  ;;  %v463_v30 = vld [vmem:[%s2875_s4 + $0x28] sm:$0xff]  ;;  %p1989_p3 = pnand %p1988_p2, %p1984_p13 }
  0x27   : > { %520 = vperm.xlu0 %1906, %v455_v4   ;;  %v474_v26 = vrot.slane %v473_v23, 2 }
  0x28   : > { %v930_v31 = vadd.f32 %v929_v28, %v928_v25  ;;  %v484_v36 = vsel %vm483_vm1, %v1914_v22, %v482_v33  ;;  %v462_v22 = vld [vmem:[%s2875_s4 + $0x20] sm:$0xff] }
  0x29   : > { %v475_v29 = vadd.f32 %v474_v26, %v473_v23  ;;  %560 = vperm.xlu2 %1908, %v462_v22  }
  0x2a   : > { %v931_v34 = vrot.slane %v930_v31, 1 }
  0x2b   : > { %v476_v32 = vrot.slane %v475_v29, 1 }
  0x2c   : > { %v932_v37 = vadd.f32 %v931_v34, %v930_v31 }
  0x2d   : > { %v477_v35 = vadd.f32 %v476_v32, %v475_v29 }
  0x2e   : > { %555 = vperm.xlu1 %1907, %v461_v5   ;;  %v933_v39 = vmul.f32 %v932_v37, %v484_v36 }
  0x2f   : > { %550 = vperm.xlu0 %1906, %v460_v6   ;;  %v485_v38 = vmul.f32 %v484_v36, %v477_v35 }
  0x30   : > { %v934_v42 = vsub.f32 %v1799_v12, %v933_v39  ;;  %v935_v43 = vsub.f32 %v1800_v15, %v933_v39 }
  0x31   : > { %v486_v40 = vsub.f32 %v466_v10, %v485_v38  ;;  %v487_v41 = vsub.f32 %v467_v11, %v485_v38  ;;  %565 = vperm.xlu2 %1908, %v463_v30  }
  0x32   : > { %v936_v46 = vmul.f32 %v934_v42, %v934_v42  ;;  %v937_v47 = vmul.f32 %v935_v43, %v935_v43 }
  0x33   : > { %v488_v44 = vmul.f32 %v486_v40, %v486_v40  ;;  %v489_v45 = vmul.f32 %v487_v41, %v487_v41 }
  0x34   : > { %v938_v50 = vsel %vm468_vm0, %v936_v46, 0.0  ;;  %v939_v51 = vsel %vm468_vm0, %v937_v47, 0.0 }
  0x35   : > { %v490_v48 = vsel %vm468_vm0, %v488_v44, 0.0  ;;  %v491_v49 = vsel %vm468_vm0, %v489_v45, 0.0  ;;  %v940_v53 = vadd.f32 %v939_v51, %v938_v50  ;;  %v1852_v44 = vld [vmem:[%s2874_s3 + $0x10] sm:$0xff] }
  0x36   : > { %886 = vperm.xlu1 %1907, %v464_v7   ;;  %v492_v52 = vadd.f32 %v491_v49, %v490_v48 }
  0x37   : > { %545 = vperm.xlu0 %1906, %v459_v8   ;;  %v941_v55 = vrot.slane %v940_v53, 4 }
  0x38   : > { %v493_v54 = vrot.slane %v492_v52, 4 }
  0x39   : > { %v942_v57 = vadd.f32 %v941_v55, %v940_v53 }
  0x3a   : > { %v494_v56 = vadd.f32 %v493_v54, %v492_v52 }
  0x3b   : > { %v943_v59 = vrot.slane %v942_v57, 2 }
  0x3c   : > { %v495_v58 = vrot.slane %v494_v56, 2 }
  0x3d   : > { %v944_v61 = vadd.f32 %v943_v59, %v942_v57 }
  0x3e   : > { %v496_v60 = vadd.f32 %v495_v58, %v494_v56 }
  0x3f   : > { %v945_v63 = vrot.slane %v944_v61, 1 }
  0x40   : > { %v497_v62 = vrot.slane %v496_v60, 1 }
  0x41   : > { %v946_v1 = vadd.f32 %v945_v63, %v944_v61 }
  0x42   : > { %v498_v0 = vadd.f32 %v497_v62, %v496_v60 }
  0x43   : > { %v947_v3 = vmul.f32 %v946_v1, %v484_v36 }
  0x44   : > { %v499_v2 = vmul.f32 %v498_v0, %v484_v36 }
  0x45   : > { %v948_v5 = vadd.f32 1e-05, %v947_v3 }
  0x46   : > { %v500_v4 = vadd.f32 1e-05, %v499_v2 }
  0x47   : > { %vm955_vm4 = vweird.f32 %v948_v5 }
  0x48   : > { %1915 = vrsqrt.f32 %v500_v4  ;;  %vm507_vm2 = vweird.f32 %v500_v4 }
  0x49   : > { %1917 = vrsqrt.f32 %v948_v5 }
  0x4e   : > { %v1916_v6 = vpop.eup %1915 }
  0x4f   : > { %v1918_v7 = vpop.eup %1917  ;;  %v502_v8 = vmul.f32 %v1916_v6, %v500_v4  ;;  %vm508_vm3 = vweird.f32 %v1916_v6 }
  0x50   : > { %v950_v9 = vmul.f32 %v1918_v7, %v948_v5  ;;  %vm956_vm5 = vweird.f32 %v1918_v7  ;;  %vm509_vm6 = vmor %vm507_vm2, %vm508_vm3 }
  0x51   : > { %v503_v10 = vmul.f32 %v1916_v6, %v502_v8  ;;  %vm957_vm7 = vmor %vm955_vm4, %vm956_vm5 }
  0x52   : > { %v951_v11 = vmul.f32 %v1918_v7, %v950_v9 }
  0x53   : > { %v504_v12 = vmul.f32 0.5, %v503_v10 }
  0x54   : > { %v952_v13 = vmul.f32 0.5, %v951_v11 }
  0x55   : > { %v505_v14 = vsub.f32 1.5, %v504_v12 }
  0x56   : > { %v953_v15 = vsub.f32 1.5, %v952_v13 }
  0x57   : > { %v506_v16 = vmul.f32 %v1916_v6, %v505_v14 }
  0x58   : > { %v954_v17 = vmul.f32 %v1918_v7, %v953_v15 }
  0x59   : > { %v510_v20 = vsel %vm509_vm6, %v1916_v6, %v506_v16 }
  0x5a   : > { %v958_v21 = vsel %vm957_vm7, %v1918_v7, %v954_v17  ;;  %v511_v23 = vmul.f32 %v510_v20, %v486_v40  ;;  %v512_v25 = vmul.f32 %v510_v20, %v487_v41  ;;  %v1850_v40 = vld [vmem:[%s2874_s3] sm:$0xff] }
  0x5b   : > { %v959_v24 = vmul.f32 %v958_v21, %v934_v42  ;;  %v960_v26 = vmul.f32 %v958_v21, %v935_v43  ;;  %v458_v41 = vld [vmem:[%s2875_s4] sm:$0xff]  ;;  %v465_v42 = vld [vmem:[%s2877_s6 + $0x8] sm:$0xff] }
  0x5c   : > { %540 = vperm.xlu2 %1908, %v458_v41   ;;  %v1851_v43 = vld [vmem:[%s2874_s3 + $0x8] sm:$0xff] }
  0x64   : > { %891 = vperm.xlu2 %1908, %v465_v42  }
  0x83   : > { %v2215_v45 = vpop.permute.xlu2 %560 }
  0x8b   : > { %v2217_v46 = vpop.permute.xlu2 %565 }
  0x90   : > { %v528_v18 = vpop.permute.xlu1 %527 }
  0x91   : > { %v516_v19 = vpop.permute.xlu0 %515 }
  0x92   : > { %v523_v27 = vmul.f32 %v516_v19, %v511_v23  ;;  %v961_v28 = vmul.f32 %v959_v24, %v516_v19 }
  0x94   : > { %v535_v34 = vadd.f32 %v528_v18, %v523_v27  ;;  %v963_v36 = vadd.f32 %v961_v28, %v528_v18 }
  0x98   : > { %v533_v33 = vpop.permute.xlu1 %532 }
  0x99   : > { %v521_v29 = vpop.permute.xlu0 %520 }
  0x9a   : > { %v524_v31 = vmul.f32 %v521_v29, %v512_v25  ;;  %v962_v32 = vmul.f32 %v960_v26, %v521_v29 }
  0x9c   : > { %v536_v35 = vadd.f32 %v533_v33, %v524_v31  ;;  %v964_v37 = vadd.f32 %v962_v32, %v533_v33 }
  0x9e   : > { %v537_v38 = vpack.c.bf16 %v536_v35, %v535_v34  ;;  %v965_v39 = vpack.c.bf16 %v964_v37, %v963_v36 }
  0xa0   : > { %600 = vmatpush.bf16.msra.mxu0 %v537_v38  ;;  %973 = vmatpush.bf16.msra.mxu2 %v965_v39  ;;  %v556_v29 = vpop.permute.xlu1 %555 }
  0xa1   : > { %v551_v47 = vpop.permute.xlu0 %550 }
  0xa3   : > { %1785 = vmatmul.msk.bf16.vlgmr.msra.gmra.mxu0 %vm583_vm8, %v1850_v40  ;;  %1801 = vmatmul.msk.bf16.vlgmr.msra.gmra.mxu2 %vm583_vm8, %v1850_v40 }
  0xa9   : > { %v546_v56 = vpop.permute.xlu0 %545 }
  0xb3   : > { %1786 = vmatmul.msk.bf16.gmra.mxu0 %vm583_vm8, %v1851_v43  ;;  %1802 = vmatmul.msk.bf16.gmra.mxu2 %vm583_vm8, %v1851_v43 }
  0xb6   : > { %v541_v48 = vpop.permute.xlu2 %540 }
  0xc3   : > { %1787 = vmatmul.msk.bf16.gmra.mxu0 %vm583_vm8, %v1852_v44  ;;  %1803 = vmatmul.msk.bf16.gmra.mxu2 %vm583_vm8, %v1852_v44 }
 0x120   : > { %v602_v49 = vpop.f32.mrf.mxu0 }
 0x121   : > { %v2219_v50 = vadd.f32 %v602_v49, %v541_v48 }
 0x123   : > { %v2222_v51 = vmul.f32 0.70710677, %v2219_v50 }
 0x125   : > { %v629_v52 = vmul.f32 %v2222_v51, %v2222_v51 }
 0x126   : > { %v975_v53 = vpop.f32.mrf.mxu2 }
 0x127   : > { %v2226_v54 = vmin.f32 %v629_v52, 16.0  ;;  %v2228_v55 = vadd.f32 %v975_v53, %v541_v48 }
 0x128   : > { %v604_v57 = vpop.f32.mrf.mxu0 }
 0x129   : > { %2894 = vst [vmem:[#allocation7_spill] sm:$0xff] %v2228_v55  ;;  %v631_v58 = vmul.f32 2.1237322e-06, %v2226_v54  ;;  %v2232_v59 = vmul.f32 0.70710677, %v2228_v55  ;;  %v2234_v60 = vadd.f32 %v604_v57, %v546_v56 }
 0x12a   : > { %v642_v2 = vmul.f32 3.8918573e-05, %v2226_v54 }
 0x12b   : > { %v1002_v61 = vmul.f32 %v2232_v59, %v2232_v59  ;;  %v2239_v62 = vmul.f32 0.70710677, %v2234_v60  ;;  %v632_v63 = vadd.f32 0.00028619796, %v631_v58 }
 0x12c   : > { %v643_v10 = vadd.f32 0.001143296, %v642_v2  ;;  %v2302_v2 = vmul.f32 0.5, %v2219_v50 }
 0x12d   : > { %v2241_v0 = vmin.f32 %v1002_v61, 16.0  ;;  %v669_v1 = vmul.f32 %v2239_v62, %v2239_v62  ;;  %v633_v6 = vmul.f32 %v632_v63, %v2226_v54 }
 0x12e   : > { %v977_v3 = vpop.f32.mrf.mxu2  ;;  %v644_v19 = vmul.f32 %v643_v10, %v2226_v54 }
 0x12f   : > { %v2246_v4 = vmin.f32 %v669_v1, 16.0  ;;  %v2248_v5 = vadd.f32 %v977_v3, %v546_v56  ;;  %v1004_v7 = vmul.f32 2.1237322e-06, %v2241_v0  ;;  %v634_v14 = vadd.f32 0.0036580483, %v633_v6 }
 0x130   : > { %v607_v8 = vpop.f32.mrf.mxu0  ;;  %v645_v30 = vadd.f32 0.014752088, %v644_v19 }
 0x131   : > { %2895 = vst [vmem:[#allocation8_spill] sm:$0xff] %v2248_v5  ;;  %v671_v9 = vmul.f32 2.1237322e-06, %v2246_v4  ;;  %v2254_v11 = vmul.f32 0.70710677, %v2248_v5  ;;  %v2256_v12 = vadd.f32 %v607_v8, %v551_v47  ;;  %v635_v24 = vmul.f32 %v634_v14, %v2226_v54 }
 0x132   : > { %v1005_v15 = vadd.f32 0.00028619796, %v1004_v7  ;;  %v646_v43 = vmul.f32 %v645_v30, %v2226_v54 }
 0x133   : > { %v672_v13 = vadd.f32 0.00028619796, %v671_v9  ;;  %v1042_v16 = vmul.f32 %v2254_v11, %v2254_v11  ;;  %v2261_v17 = vmul.f32 0.70710677, %v2256_v12  ;;  %v636_v35 = vadd.f32 0.05243302, %v635_v24 }
 0x134   : > { %v1006_v25 = vmul.f32 %v1005_v15, %v2241_v0  ;;  %v647_v1 = vadd.f32 0.112945676, %v646_v43  ;;  %v2328_v30 = vmul.f32 0.5, %v2256_v12 }
 0x135   : > { %v673_v18 = vmul.f32 %v672_v13, %v2246_v4  ;;  %v2265_v20 = vmin.f32 %v1042_v16, 16.0  ;;  %v709_v21 = vmul.f32 %v2261_v17, %v2261_v17  ;;  %v637_v48 = vmul.f32 %v636_v35, %v2226_v54 }
 0x136   : > { %v980_v22 = vpop.f32.mrf.mxu2  ;;  %v1007_v36 = vadd.f32 0.0036580483, %v1006_v25 }
 0x137   : > { %v2269_v23 = vadd.f32 %v980_v22, %v551_v47  ;;  %v674_v26 = vadd.f32 0.0036580483, %v673_v18  ;;  %v2273_v27 = vmin.f32 %v709_v21, 16.0  ;;  %v1044_v31 = vmul.f32 2.1237322e-06, %v2265_v20 }
 0x138   : > { %v609_v28 = vpop.f32.mrf.mxu0  ;;  %v1008_v49 = vmul.f32 %v1007_v36, %v2241_v0  ;;  %v638_v7 = vadd.f32 0.18741608, %v637_v48  ;;  %v648_v21 = vmul.f32 %v647_v1, %v2226_v54  ;;  %v2318_v22 = vmul.f32 0.5, %v2234_v60 }
 0x139   : > { %v711_v32 = vmul.f32 2.1237322e-06, %v2273_v27  ;;  %v2278_v33 = vmul.f32 0.70710677, %v2269_v23  ;;  %v610_v34 = vadd.f32 %v609_v28, %v556_v29  ;;  %v675_v37 = vmul.f32 %v674_v26, %v2246_v4 }
 0x13a   : > { %v1045_v41 = vadd.f32 0.00028619796, %v1044_v31  ;;  %v1009_v8 = vadd.f32 0.05243302, %v1008_v49  ;;  %v722_v19 = vmul.f32 3.8918573e-05, %v2273_v27  ;;  %v639_v28 = vmul.f32 %v638_v7, %v2226_v54 }
 0x13b   : > { %v712_v38 = vadd.f32 0.00028619796, %v711_v32  ;;  %v1082_v39 = vmul.f32 %v2278_v33, %v2278_v33  ;;  %v2283_v40 = vmul.f32 0.70710677, %v610_v34  ;;  %v676_v52 = vadd.f32 0.05243302, %v675_v37 }
 0x13c   : > { %v1046_v61 = vmul.f32 %v1045_v41, %v2265_v20  ;;  %v1010_v60 = vmul.f32 %v1009_v8, %v2241_v0  ;;  %v2340_v41 = vadd.f32 0.4994258, %v648_v21  ;;  %v640_v48 = vadd.f32 1.1283791, %v639_v28 }
 0x13d   : > { %v749_v44 = vmul.f32 %v2283_v40, %v2283_v40  ;;  %v713_v53 = vmul.f32 %v712_v38, %v2273_v27  ;;  %v2293_v57 = vmin.f32 %v1082_v39, 16.0  ;;  %v677_v9 = vmul.f32 %v676_v52, %v2246_v4 }
 0x13e   : > { %v982_v42 = vpop.f32.mrf.mxu2  ;;  %v1047_v16 = vadd.f32 0.0036580483, %v1046_v61  ;;  %v723_v39 = vadd.f32 0.001143296, %v722_v19 }
 0x13f   : > { %v2288_v47 = vadd.f32 %v982_v42, %v556_v29  ;;  %v2295_v58 = vmin.f32 %v749_v44, 16.0  ;;  %v714_v10 = vadd.f32 0.0036580483, %v713_v53  ;;  %v1084_v13 = vmul.f32 2.1237322e-06, %v2293_v57 }
 0x140   : > { %v612_v56 = vpop.f32.mrf.mxu0  ;;  %v678_v29 = vadd.f32 0.18741608, %v677_v9  ;;  %v2349_v53 = vmul.f32 0.5, %v610_v34 }
 0x141   : > { %v2299_v63 = vmul.f32 0.70710677, %v2288_v47  ;;  %v751_v3 = vmul.f32 2.1237322e-06, %v2295_v58  ;;  %v2306_v6 = vadd.f32 %v612_v56, %v2215_v45  ;;  %v715_v31 = vmul.f32 %v714_v10, %v2273_v27 }
 0x142   : > { %v1085_v35 = vadd.f32 0.00028619796, %v1084_v13  ;;  %v679_v49 = vmul.f32 %v678_v29, %v2246_v4  ;;  %v1011_v56 = vadd.f32 0.18741608, %v1010_v60  ;;  %v724_v13 = vmul.f32 %v723_v39, %v2273_v27 }
 0x143   : > { %v752_v14 = vadd.f32 0.00028619796, %v751_v3  ;;  %v2311_v15 = vmul.f32 0.70710677, %v2306_v6  ;;  %v1122_v50 = vmul.f32 %v2299_v63, %v2299_v63  ;;  %v716_v52 = vadd.f32 0.05243302, %v715_v31 }
 0x144   : > { %v1086_v61 = vmul.f32 %v1085_v35, %v2293_v57  ;;  %v725_v35 = vadd.f32 0.014752088, %v724_v13 }
 0x145   : > { %v753_v24 = vmul.f32 %v752_v14, %v2295_v58  ;;  %v789_v25 = vmul.f32 %v2311_v15, %v2311_v15  ;;  %v2338_v38 = vmin.f32 %v1122_v50, 16.0  ;;  %v717_v19 = vmul.f32 %v716_v52, %v2273_v27 }
 0x146   : > { %v985_v18 = vpop.f32.mrf.mxu2  ;;  %v1087_v28 = vadd.f32 0.0036580483, %v1086_v61 }
 0x147   : > { %v2324_v26 = vadd.f32 %v985_v18, %v2215_v45  ;;  %v2332_v36 = vmin.f32 %v789_v25, 16.0  ;;  %v1048_v45 = vmul.f32 %v1047_v16, %v2265_v20  ;;  %v754_v12 = vadd.f32 0.0036580483, %v753_v24 }
 0x148   : > { %v614_v32 = vpop.f32.mrf.mxu0  ;;  %v1124_v8 = vmul.f32 2.1237322e-06, %v2338_v38  ;;  %v2365_v18 = vadd.f32 1.1283791, %v679_v49  ;;  %v2372_v25 = vmul.f32 %v640_v48, %v2222_v51  ;;  %v1088_v52 = vmul.f32 %v1087_v28, %v2293_v57 }
 0x149   : > { %v2335_v37 = vmul.f32 0.70710677, %v2324_v26  ;;  %v791_v42 = vmul.f32 2.1237322e-06, %v2332_v36  ;;  %v2346_v44 = vadd.f32 %v614_v32, %v2217_v46  ;;  %v1049_v7 = vadd.f32 0.05243302, %v1048_v45 }
 0x14a   : > { %v755_v14 = vmul.f32 %v754_v12, %v2295_v58  ;;  %v802_v24 = vmul.f32 3.8918573e-05, %v2332_v36  ;;  %v2375_v32 = vmul.f32 %v1011_v56, %v2241_v0 }
 0x14b   : > { %v1162_v43 = vmul.f32 %v2335_v37, %v2335_v37  ;;  %v792_v1 = vadd.f32 0.00028619796, %v791_v42  ;;  %v2356_v9 = vmul.f32 0.70710677, %v2346_v44  ;;  %v2385_v51 = vmul.f32 %v1049_v7, %v2265_v20 }
 0x14c   : > { %v756_v45 = vadd.f32 0.05243302, %v755_v14  ;;  %v803_v49 = vadd.f32 0.001143296, %v802_v24 }
 0x14d   : > { %v2352_v3 = vmin.f32 %v1162_v43, 16.0  ;;  %v793_v34 = vmul.f32 %v792_v1, %v2332_v36  ;;  %v829_v21 = vmul.f32 %v2356_v9, %v2356_v9  ;;  %v718_v43 = vadd.f32 0.18741608, %v717_v19 }
 0x14e   : > { %v987_v10 = vpop.f32.mrf.mxu2  ;;  %v804_v13 = vmul.f32 %v803_v49, %v2332_v36  ;;  %v757_v7 = vmul.f32 %v756_v45, %v2295_v58  ;;  %v726_v19 = vmul.f32 %v725_v35, %v2273_v27 }
 0x14f   : > { %v1164_v16 = vmul.f32 2.1237322e-06, %v2352_v3  ;;  %v2363_v50 = vadd.f32 %v987_v10, %v2217_v46  ;;  %v794_v29 = vadd.f32 0.0036580483, %v793_v34  ;;  %v1125_v46 = vadd.f32 0.00028619796, %v1124_v8 }
 0x150   : > { %v2377_v60 = vmin.f32 %v829_v21, 16.0  ;;  %v719_v21 = vmul.f32 %v718_v43, %v2273_v27  ;;  %v805_v28 = vadd.f32 0.014752088, %v804_v13  ;;  %v727_v5 = vadd.f32 0.112945676, %v726_v19 }
 0x151   : > { %v1165_v31 = vadd.f32 0.00028619796, %v1164_v16  ;;  %v795_v39 = vmul.f32 %v794_v29, %v2332_v36  ;;  %v2382_v42 = vmul.f32 0.70710677, %v2363_v50  ;;  %v1126_v8 = vmul.f32 %v1125_v46, %v2338_v38 }
 0x152   : > { %v831_v48 = vmul.f32 2.1237322e-06, %v2377_v60  ;;  %v842_v14 = vmul.f32 3.8918573e-05, %v2377_v60  ;;  %v806_v49 = vmul.f32 %v805_v28, %v2332_v36 }
 0x153   : > { %v1166_v12 = vmul.f32 %v1165_v31, %v2352_v3  ;;  %v796_v56 = vadd.f32 0.05243302, %v795_v39  ;;  %v1202_v1 = vmul.f32 %v2382_v42, %v2382_v42  ;;  %v1089_v31 = vadd.f32 0.05243302, %v1088_v52 }
 0x154   : > { %v832_v10 = vadd.f32 0.00028619796, %v831_v48  ;;  %v843_v29 = vadd.f32 0.001143296, %v842_v14  ;;  %v1127_v48 = vadd.f32 0.0036580483, %v1126_v8  ;;  %v728_v8 = vmul.f32 %v727_v5, %v2273_v27 }
 0x155   : > { %v1167_v61 = vadd.f32 0.0036580483, %v1166_v12  ;;  %v2396_v16 = vmin.f32 %v1202_v1, 16.0  ;;  %v797_v46 = vmul.f32 %v796_v56, %v2332_v36  ;;  %v758_v1 = vadd.f32 0.18741608, %v757_v7 }
 0x156   : > { %v833_v24 = vmul.f32 %v832_v10, %v2377_v60  ;;  %v720_v10 = vadd.f32 1.1283791, %v719_v21  ;;  %v807_v52 = vadd.f32 0.112945676, %v806_v49  ;;  %v1128_v21 = vmul.f32 %v1127_v48, %v2338_v38 }
 0x157   : > { %v1168_v34 = vmul.f32 %v1167_v61, %v2352_v3  ;;  %v1204_v12 = vmul.f32 2.1237322e-06, %v2396_v16  ;;  %v844_v61 = vmul.f32 %v843_v29, %v2377_v60  ;;  %v798_v56 = vadd.f32 0.18741608, %v797_v46 }
 0x158   : > { %v834_v45 = vadd.f32 0.0036580483, %v833_v24  ;;  %v808_v28 = vmul.f32 %v807_v52, %v2332_v36  ;;  %v762_v29 = vmul.f32 3.8918573e-05, %v2295_v58  ;;  %v759_v19 = vmul.f32 %v758_v1, %v2295_v58 }
 0x159   : > { %v1169_v39 = vadd.f32 0.05243302, %v1168_v34  ;;  %v1205_v43 = vadd.f32 0.00028619796, %v1204_v12  ;;  %v845_v14 = vadd.f32 0.014752088, %v844_v61  ;;  %v799_v5 = vmul.f32 %v798_v56, %v2332_v36 }
 0x15a   : > { %v835_v13 = vmul.f32 %v834_v45, %v2377_v60  ;;  %v729_v12 = vadd.f32 0.4994258, %v728_v8  ;;  %v809_v45 = vadd.f32 0.4994258, %v808_v28  ;;  %v763_v61 = vadd.f32 0.001143296, %v762_v29 }
 0x15b   : > { %v1170_v35 = vmul.f32 %v1169_v39, %v2352_v3  ;;  %v1206_v55 = vmul.f32 %v1205_v43, %v2396_v16  ;;  %v846_v7 = vmul.f32 %v845_v14, %v2377_v60  ;;  %v1175_v48 = vmul.f32 3.8918573e-05, %v2352_v3 }
 0x15c   : > { %v836_v24 = vadd.f32 0.05243302, %v835_v13  ;;  %v730_v13 = vmul.f32 %v729_v12, %v2273_v27  ;;  %v810_v52 = vmul.f32 %v809_v45, %v2332_v36  ;;  %v2425_v14 = vmul.f32 %v2365_v18, %v2239_v62 }
 0x15d   : > { %v1171_v34 = vadd.f32 0.18741608, %v1170_v35  ;;  %v1207_v39 = vadd.f32 0.0036580483, %v1206_v55  ;;  %v847_v49 = vadd.f32 0.112945676, %v846_v7  ;;  %v764_v55 = vmul.f32 %v763_v61, %v2295_v58 }
 0x15e   : > { %v837_v46 = vmul.f32 %v836_v24, %v2377_v60  ;;  %v1129_v8 = vadd.f32 0.05243302, %v1128_v21  ;;  %v2427_v24 = vadd.f32 1.0, %v730_v13  ;;  %v2430_v28 = vadd.f32 1.0, %v810_v52 }
 0x15f   : > { %v1172_v35 = vmul.f32 %v1171_v34, %v2352_v3  ;;  %v1208_v43 = vmul.f32 %v1207_v39, %v2396_v16  ;;  %v848_v1 = vmul.f32 %v847_v49, %v2377_v60  ;;  %v1090_v34 = vmul.f32 %v1089_v31, %v2293_v57 }
 0x160   : > { %v838_v56 = vadd.f32 0.18741608, %v837_v46  ;;  %v765_v36 = vadd.f32 0.014752088, %v764_v55  ;;  %v760_v7 = vadd.f32 1.1283791, %v759_v19  ;;  %1919 = vrcp.f32 %v2427_v24 }
 0x161   : > { %v849_v27 = vadd.f32 0.4994258, %v848_v1  ;;  %v800_v29 = vadd.f32 1.1283791, %v799_v5  ;;  %v1209_v39 = vadd.f32 0.05243302, %v1208_v43  ;;  %1921 = vrcp.f32 %v2430_v28 }
 0x162   : > { %v2434_v12 = vmul.f32 0.5, %v2306_v6  ;;  %v1173_v62 = vadd.f32 1.1283791, %v1172_v35  ;;  %v1176_v18 = vadd.f32 0.001143296, %v1175_v48  ;;  %v2438_v21 = vmul.f32 %v720_v10, %v2261_v17 }
 0x163   : > { %v2441_v31 = vmul.f32 0.5, %v2346_v44  ;;  %v839_v46 = vmul.f32 %v838_v56, %v2377_v60  ;;  %v850_v19 = vmul.f32 %v849_v27, %v2377_v60  ;;  %v2445_v45 = vadd.f32 0.18741608, %v1090_v34 }
 0x164   : > { %v2448_v49 = vmul.f32 %v1129_v8, %v2338_v38  ;;  %v766_v6 = vmul.f32 %v765_v36, %v2295_v58  ;;  %v650_v61 = vmul.f32 %v2340_v41, %v2226_v54  ;;  %v2454_v17 = vmul.f32 %v760_v7, %v2283_v40 }
 0x165   : > { %v801_v44 = vmul.f32 %v800_v29, %v2311_v15  ;;  %v1210_v10 = vmul.f32 %v1209_v39, %v2396_v16  ;;  %v2458_v5 = vadd.f32 1.0, %v850_v19  ;;  %v2461_v60 = vmul.f32 %v1173_v62, %v2335_v37 }
 0x166   : > { %v741_v35 = vand.u32 2147483647, %v2427_v24  ;;  %v767_v43 = vadd.f32 0.112945676, %v766_v6  ;;  %v1177_v13 = vmul.f32 %v1176_v18, %v2352_v3  ;;  %v1920_v52 = vpop.eup %1919  ;;  %v840_v1 = vadd.f32 1.1283791, %v839_v46 }
 0x167   : > { %1923 = vrcp.f32 %v2458_v5  ;;  %vm737_vm9 = vweird.f32 %v2427_v24  ;;  %v1215_v54 = vmul.f32 3.8918573e-05, %v2396_v16  ;;  %v1922_v40 = vpop.eup %1921  ;;  %vm817_vm10 = vweird.f32 %v2430_v28 }
 0x168   : > { %v733_v15 = vmul.f32 %v1920_v52, %v2427_v24  ;;  %v768_v37 = vmul.f32 %v767_v43, %v2295_v58  ;;  %v2471_v41 = vadd.f32 1.0, %v650_v61  ;;  %v1211_v55 = vadd.f32 0.18741608, %v1210_v10 }
 0x169   : > { %v813_v48 = vmul.f32 %v1922_v40, %v2430_v28  ;;  %v821_v8 = vand.u32 2147483647, %v2430_v28  ;;  %v823_v56 = vand.u32 2147483648, %v2430_v28  ;;  %vm2476_vm11 = vcmp.eq.f32.partialorder %v741_v35, 8.507059e+37 }
 0x16a   : > { %v734_v34 = vsub.f32 1.0, %v733_v15  ;;  %v769_v36 = vadd.f32 0.4994258, %v768_v37  ;;  %v1178_v7 = vadd.f32 0.014752088, %v1177_v13  ;;  %vm738_vm12 = vweird.f32 %v1920_v52 }
 0x16b   : > { %v814_v29 = vsub.f32 1.0, %v813_v48  ;;  %v743_v39 = vand.u32 2147483648, %v2427_v24  ;;  %v1216_v62 = vadd.f32 0.001143296, %v1215_v54  ;;  %1925 = vrcp.f32 %v2471_v41  ;;  %vm739_vm14 = vmor %vm737_vm9, %vm738_vm12 }
 0x16c   : > { %v735_v18 = vmul.f32 %v1920_v52, %v734_v34  ;;  %v770_v46 = vmul.f32 %v769_v36, %v2295_v58  ;;  %v1179_v19 = vmul.f32 %v1178_v7, %v2352_v3  ;;  %v841_v61 = vmul.f32 %v840_v1, %v2356_v9 }
 0x16d   : > { %v1924_v6 = vpop.eup %1923  ;;  %v815_v10 = vmul.f32 %v1922_v40, %v814_v29  ;;  %vm818_vm13 = vweird.f32 %v1922_v40  ;;  %v1217_v35 = vmul.f32 %v1216_v62, %v2396_v16  ;;  %v824_v43 = vor.u32 1.1754944e-38, %v823_v56 }
 0x16e   : > { %v853_v13 = vmul.f32 %v1924_v6, %v2458_v5  ;;  %v736_v15 = vadd.f32 %v1920_v52, %v735_v18  ;;  %v2487_v37 = vadd.f32 1.0, %v770_v46  ;;  %v744_v58 = vor.u32 1.1754944e-38, %v743_v39  ;;  %vm819_vm15 = vmor %vm817_vm10, %vm818_vm13 }
 0x16f   : > { %v816_v54 = vadd.f32 %v1922_v40, %v815_v10  ;;  %v1180_v48 = vadd.f32 0.112945676, %v1179_v19  ;;  %v1218_v34 = vadd.f32 0.014752088, %v1217_v35  ;;  %v863_v1 = vand.u32 2147483648, %v2458_v5 }
 0x170   : > { %v854_v9 = vsub.f32 1.0, %v853_v13  ;;  %v740_v56 = vsel %vm739_vm14, %v1920_v52, %v736_v15  ;;  %1927 = vrcp.f32 %v2487_v37  ;;  %vm822_vm1 = vcmp.eq.f32.partialorder %v821_v8, 8.507059e+37 }
 0x171   : > { %v820_v36 = vsel %vm819_vm15, %v1922_v40, %v816_v54  ;;  %v861_v7 = vand.u32 2147483647, %v2458_v5  ;;  %v745_v24 = vsel %vm2476_vm11, %v744_v58, %v740_v56  ;;  %v2499_v29 = vpop.eup %1925  ;;  %vm858_vm2 = vweird.f32 %v1924_v6 }
 0x172   : > { %v825_v39 = vsel %vm822_vm1, %v824_v43, %v820_v36  ;;  %v855_v62 = vmul.f32 %v1924_v6, %v854_v9  ;;  %v1181_v28 = vmul.f32 %v1180_v48, %v2352_v3  ;;  %v1212_v18 = vmul.f32 %v1211_v55, %v2396_v16 }
 0x173   : > { %v826_v46 = vmul.f32 %v825_v39, %v801_v44  ;;  %vm857_vm3 = vweird.f32 %v2458_v5  ;;  %v1219_v52 = vmul.f32 %v1218_v34, %v2396_v16  ;;  %v864_v8 = vor.u32 1.1754944e-38, %v863_v1 }
 0x174   : > { %v856_v40 = vadd.f32 %v1924_v6, %v855_v62  ;;  %v746_v19 = vmul.f32 %v745_v24, %v2438_v21  ;;  %v1182_v27 = vadd.f32 0.4994258, %v1181_v28  ;;  %vm859_vm4 = vmor %vm857_vm3, %vm858_vm2  ;;  %v653_v43 = vmul.f32 %v2499_v29, %v2471_v41 }
 0x175   : > { %v1792_v10 = vclamps-f32 %v826_v46, 1.0  ;;  %v1220_v35 = vadd.f32 0.112945676, %v1219_v52  ;;  %v682_v13 = vmul.f32 3.8918573e-05, %v2246_v4  ;;  %vm862_vm5 = vcmp.eq.f32.partialorder %v861_v7, 8.507059e+37 }
 0x176   : > { %v1928_v15 = vpop.eup %1927  ;;  %v860_v55 = vsel %vm859_vm4, %v1924_v6, %v856_v40  ;;  %v781_v44 = vand.u32 2147483647, %v2487_v37  ;;  %v1183_v5 = vmul.f32 %v1182_v27, %v2352_v3  ;;  %v1213_v54 = vadd.f32 1.1283791, %v1212_v18 }
 0x177   : > { %v865_v58 = vsel %vm862_vm5, %v864_v8, %v860_v55  ;;  %v773_v21 = vmul.f32 %v1928_v15, %v2487_v37  ;;  %v783_v48 = vand.u32 2147483648, %v2487_v37  ;;  %v1790_v9 = vclamps-f32 %v746_v19, 1.0 }
 0x178   : > { %v866_v34 = vmul.f32 %v865_v58, %v841_v61  ;;  %v2513_v1 = vadd.f32 1.0, %v1183_v5  ;;  %v1221_v56 = vmul.f32 %v1220_v35, %v2396_v16  ;;  %v873_v36 = vadd.f32 1.0, %v1792_v10 }
 0x179   : > { %v774_v24 = vsub.f32 1.0, %v773_v21  ;;  %v654_v6 = vsub.f32 1.0, %v653_v43  ;;  %v683_v7 = vadd.f32 0.001143296, %v682_v13  ;;  %vm777_vm6 = vweird.f32 %v2487_v37 }
 0x17a   : > { %v1793_v39 = vclamps-f32 %v866_v34, 1.0  ;;  %vm2517_vm7 = vcmp.eq.f32.partialorder %v781_v44, 8.507059e+37  ;;  %1929 = vrcp.f32 %v2513_v1  ;;  %vm778_vm8 = vweird.f32 %v1928_v15 }
 0x17b   : > { %v775_v62 = vmul.f32 %v1928_v15, %v774_v24  ;;  %v784_v61 = vor.u32 1.1754944e-38, %v783_v48  ;;  %v1222_v28 = vadd.f32 0.4994258, %v1221_v56  ;;  %v871_v46 = vadd.f32 1.0, %v1790_v9  ;;  %vm779_vm9 = vmor %vm777_vm6, %vm778_vm8 }
 0x17c   : > { %v874_v18 = vadd.f32 1.0, %v1793_v39  ;;  %v684_v52 = vmul.f32 %v683_v7, %v2246_v4  ;;  %v1095_v40 = vmul.f32 3.8918573e-05, %v2293_v57  ;;  %v879_v8 = vmul.f32 %v873_v36, %v2434_v12 }
 0x17d   : > { %v776_v19 = vadd.f32 %v1928_v15, %v775_v62  ;;  %v1223_v27 = vmul.f32 %v1222_v28, %v2396_v16  ;;  %v655_v10 = vmul.f32 %v2499_v29, %v654_v6  ;;  %v1194_v43 = vand.u32 2147483647, %v2513_v1 }
 0x17e   : > { %v880_v35 = vmul.f32 %v874_v18, %v2441_v31  ;;  %v685_v13 = vadd.f32 0.014752088, %v684_v52  ;;  %v1096_v55 = vadd.f32 0.001143296, %v1095_v40  ;;  %v1196_v5 = vand.u32 2147483648, %v2513_v1 }
 0x17f   : > { %v780_v44 = vsel %vm779_vm9, %v1928_v15, %v776_v19  ;;  %v2532_v58 = vadd.f32 1.0, %v1223_v27  ;;  %v1135_v12 = vmul.f32 3.8918573e-05, %v2338_v38  ;;  %v2540_v34 = vmul.f32 %v1213_v54, %v2382_v42 }
 0x180   : > { %v1930_v21 = vpop.eup %1929  ;;  %v883_v16 = vpack.c.bf16 %v880_v35, %v879_v8  ;;  %v785_v48 = vsel %vm2517_vm7, %v784_v61, %v780_v44  ;;  %v686_v31 = vmul.f32 %v685_v13, %v2246_v4  ;;  %v1097_v37 = vmul.f32 %v1096_v55, %v2293_v57 }
 0x181   : > { %v786_v15 = vmul.f32 %v785_v48, %v2454_v17  ;;  %v1186_v9 = vmul.f32 %v1930_v21, %v2513_v1  ;;  %1931 = vrcp.f32 %v2532_v58  ;;  %v877_v56 = vmul.f32 %v871_v46, %v2328_v30 }
 0x182   : > { %908 = vmatpush.bf16.msra.mxu1 %v883_v16  ;;  %vm1190_vm10 = vweird.f32 %v2513_v1  ;;  %v2548_v36 = vadd.f32 %v2499_v29, %v655_v10  ;;  %vm658_vm11 = vweird.f32 %v2499_v29  ;;  %vm657_vm12 = vweird.f32 %v2471_v41 }
 0x183   : > { %v1791_v24 = vclamps-f32 %v786_v15, 1.0  ;;  %v1187_v6 = vsub.f32 1.0, %v1186_v9  ;;  %v687_v42 = vadd.f32 0.112945676, %v686_v31  ;;  %v1098_v17 = vadd.f32 0.014752088, %v1097_v37  ;;  %vm2581_vm2 = vmor %vm657_vm12, %vm658_vm11 }
 0x184   : > { %vm1191_vm13 = vweird.f32 %v1930_v21  ;;  %vm2552_vm14 = vcmp.eq.f32.partialorder %v1194_v43, 8.507059e+37  ;;  %v1197_v7 = vor.u32 1.1754944e-38, %v1196_v5  ;;  %v1136_v30 = vadd.f32 0.001143296, %v1135_v12 }
 0x185   : > { %v872_v39 = vadd.f32 1.0, %v1791_v24  ;;  %v1188_v3 = vmul.f32 %v1930_v21, %v1187_v6  ;;  %v688_v62 = vmul.f32 %v687_v42, %v2246_v4  ;;  %v1099_v61 = vmul.f32 %v1098_v17, %v2293_v57  ;;  %vm1192_vm15 = vmor %vm1190_vm10, %vm1191_vm13 }
 0x186   : > { %v1234_v28 = vand.u32 2147483647, %v2532_v58  ;;  %v1137_v18 = vmul.f32 %v1136_v30, %v2338_v38  ;;  %v1015_v46 = vmul.f32 3.8918573e-05, %v2241_v0  ;;  %v1055_v52 = vmul.f32 3.8918573e-05, %v2265_v20 }
 0x187   : > { %v1932_v40 = vpop.eup %1931  ;;  %v878_v8 = vmul.f32 %v872_v39, %v2349_v53  ;;  %v1189_v19 = vadd.f32 %v1930_v21, %v1188_v3  ;;  %v689_v27 = vadd.f32 0.4994258, %v688_v62  ;;  %v1100_v10 = vadd.f32 0.112945676, %v1099_v61 }
 0x188   : > { %v1226_v35 = vmul.f32 %v1932_v40, %v2532_v58  ;;  %v1236_v43 = vand.u32 2147483648, %v2532_v58  ;;  %v1138_v13 = vadd.f32 0.014752088, %v1137_v18  ;;  %v1016_v55 = vadd.f32 0.001143296, %v1015_v46 }
 0x189   : > { %v882_v44 = vpack.c.bf16 %v878_v8, %v877_v56  ;;  %v1193_v5 = vsel %vm1192_vm15, %v1930_v21, %v1189_v19  ;;  %v690_v12 = vmul.f32 %v689_v27, %v2246_v4  ;;  %v1101_v16 = vmul.f32 %v1100_v10, %v2293_v57 }
 0x18a   : > { %v1198_v53 = vsel %vm2552_vm14, %v1197_v7, %v1193_v5  ;;  %v1227_v48 = vsub.f32 1.0, %v1226_v35  ;;  %v1139_v31 = vmul.f32 %v1138_v13, %v2338_v38  ;;  %v1017_v1 = vmul.f32 %v1016_v55, %v2241_v0 }
 0x18b   : > { %909 = vmatpush.bf16.msra.mxu1 %v882_v44  ;;  %v1199_v37 = vmul.f32 %v1198_v53, %v2461_v60  ;;  %v2575_v15 = vadd.f32 1.0, %v690_v12  ;;  %v1102_v9 = vadd.f32 0.4994258, %v1101_v16  ;;  %v1056_v56 = vadd.f32 0.001143296, %v1055_v52 }
 0x18c   : > { %v1228_v21 = vmul.f32 %v1932_v40, %v1227_v48  ;;  %vm1231_vm1 = vweird.f32 %v1932_v40  ;;  %v1140_v24 = vadd.f32 0.112945676, %v1139_v31  ;;  %v1018_v6 = vadd.f32 0.014752088, %v1017_v1 }
 0x18d   : > { %v660_v60 = vsel %vm2581_vm2, %v2499_v29, %v2548_v36  ;;  %v661_v42 = vand.u32 2147483647, %v2471_v41  ;;  %v663_v17 = vand.u32 2147483648, %v2471_v41  ;;  %1933 = vrcp.f32 %v2575_v15 }
 0x18e   : > { %v1229_v54 = vadd.f32 %v1932_v40, %v1228_v21  ;;  %vm1230_vm3 = vweird.f32 %v2532_v58  ;;  %v1103_v7 = vmul.f32 %v1102_v9, %v2293_v57  ;;  %v1141_v30 = vmul.f32 %v1140_v24, %v2338_v38 }
 0x18f   : > { %v1808_v39 = vclamps-f32 %v1199_v37, 1.0  ;;  %vm1232_vm4 = vmor %vm1230_vm3, %vm1231_vm1  ;;  %v1237_v3 = vor.u32 1.1754944e-38, %v1236_v43  ;;  %v1019_v62 = vmul.f32 %v1018_v6, %v2241_v0  ;;  %v1057_v29 = vmul.f32 %v1056_v56, %v2265_v20 }
 0x190   : > { %v1233_v36 = vsel %vm1232_vm4, %v1932_v40, %v1229_v54  ;;  %vm1235_vm5 = vcmp.eq.f32.partialorder %v1234_v28, 8.507059e+37  ;;  %v2597_v61 = vadd.f32 1.0, %v1103_v7  ;;  %v1142_v41 = vadd.f32 0.4994258, %v1141_v30 }
 0x191   : > { %v1238_v18 = vsel %vm1235_vm5, %v1237_v3, %v1233_v36  ;;  %v664_v46 = vor.u32 1.1754944e-38, %v663_v17  ;;  %v1020_v52 = vadd.f32 0.112945676, %v1019_v62  ;;  %v1058_v58 = vadd.f32 0.014752088, %v1057_v29 }
 0x192   : > { %v994_v8 = vmul.f32 0.5, %v2324_v26  ;;  %v1239_v19 = vmul.f32 %v1238_v18, %v2540_v34  ;;  %vm662_vm6 = vcmp.eq.f32.partialorder %v661_v42, 8.507059e+37  ;;  %1935 = vrcp.f32 %v2597_v61 }
 0x193   : > { %v1934_v27 = vpop.eup %1933  ;;  %v1246_v10 = vadd.f32 1.0, %v1808_v39  ;;  %v665_v35 = vsel %vm662_vm6, %v664_v46, %v660_v60  ;;  %v1143_v40 = vmul.f32 %v1142_v41, %v2338_v38  ;;  %v1021_v28 = vmul.f32 %v1020_v52, %v2241_v0 }
 0x194   : > { %v1092_v43 = vmul.f32 %v2445_v45, %v2293_v57  ;;  %v995_v13 = vmul.f32 0.5, %v2363_v50  ;;  %v1809_v55 = vclamps-f32 %v1239_v19, 1.0  ;;  %v693_v26 = vmul.f32 %v1934_v27, %v2575_v15 }
 0x195   : > { %v1131_v34 = vadd.f32 0.18741608, %v2448_v49  ;;  %v2609_v44 = vadd.f32 1.0, %v1143_v40  ;;  %v1022_v5 = vadd.f32 0.4994258, %v1021_v28  ;;  %v1059_v12 = vmul.f32 %v1058_v58, %v2265_v20 }
 0x196   : > { %v1247_v16 = vadd.f32 1.0, %v1809_v55  ;;  %v666_v53 = vmul.f32 %v665_v35, %v2372_v25  ;;  %v694_v48 = vsub.f32 1.0, %v693_v26  ;;  %v701_v31 = vand.u32 2147483647, %v2575_v15 }
 0x197   : > { %v1252_v1 = vmul.f32 %v1246_v10, %v994_v8  ;;  %vm698_vm7 = vweird.f32 %v1934_v27  ;;  %v703_v57 = vand.u32 2147483648, %v2575_v15  ;;  %1937 = vrcp.f32 %v2609_v44 }
 0x198   : > { %v1936_v50 = vpop.eup %1935  ;;  %v1253_v45 = vmul.f32 %v1247_v16, %v995_v13  ;;  %v695_v49 = vmul.f32 %v1934_v27, %v694_v48  ;;  %v1023_v37 = vmul.f32 %v1022_v5, %v2241_v0  ;;  %v1060_v9 = vadd.f32 0.112945676, %v1059_v12 }
 0x199   : > { %v1093_v56 = vadd.f32 1.1283791, %v1092_v43  ;;  %v1132_v21 = vmul.f32 %v1131_v34, %v2338_v38  ;;  %vm697_vm8 = vweird.f32 %v2575_v15  ;;  %v1106_v25 = vmul.f32 %v1936_v50, %v2597_v61 }
 0x19a   : > { %v1256_v4 = vpack.c.bf16 %v1253_v45, %v1252_v1  ;;  %v696_v24 = vadd.f32 %v1934_v27, %v695_v49  ;;  %v2620_v6 = vadd.f32 1.0, %v1023_v37  ;;  %v1061_v60 = vmul.f32 %v1060_v9, %v2265_v20  ;;  %vm699_vm9 = vmor %vm697_vm8, %vm698_vm7 }
 0x19b   : > { %v1788_v42 = vclamps-f32 %v666_v53, 1.0  ;;  %vm702_vm10 = vcmp.eq.f32.partialorder %v701_v31, 8.507059e+37  ;;  %v704_v17 = vor.u32 1.1754944e-38, %v703_v57  ;;  %v1107_v0 = vsub.f32 1.0, %v1106_v25 }
 0x19c   : > { %1262 = vmatpush.bf16.msra.mxu3 %v1256_v4  ;;  %v700_v54 = vsel %vm699_vm9, %v1934_v27, %v696_v24  ;;  %v1114_v38 = vand.u32 2147483647, %v2597_v61  ;;  %v1116_v15 = vand.u32 2147483648, %v2597_v61  ;;  %1939 = vrcp.f32 %v2620_v6 }
 0x19d   : > { %v1938_v7 = vpop.eup %1937  ;;  %v705_v30 = vsel %vm702_vm10, %v704_v17, %v700_v54  ;;  %v1108_v39 = vmul.f32 %v1936_v50, %v1107_v0  ;;  %vm1111_vm11 = vweird.f32 %v1936_v50  ;;  %v1062_v3 = vadd.f32 0.4994258, %v1061_v60 }
 0x19e   : > { %v1094_v62 = vmul.f32 %v1093_v56, %v2278_v33  ;;  %v1133_v29 = vadd.f32 1.1283791, %v1132_v21  ;;  %v706_v36 = vmul.f32 %v705_v30, %v2425_v14  ;;  %v1146_v41 = vmul.f32 %v1938_v7, %v2609_v44 }
 0x19f   : > { %v869_v18 = vadd.f32 1.0, %v1788_v42  ;;  %v1109_v46 = vadd.f32 %v1936_v50, %v1108_v39  ;;  %vm1110_vm12 = vweird.f32 %v2597_v61  ;;  %v1063_v52 = vmul.f32 %v1062_v3, %v2265_v20 }
 0x1a0   : > { %v1789_v58 = vclamps-f32 %v706_v36, 1.0  ;;  %vm1112_vm13 = vmor %vm1110_vm12, %vm1111_vm11  ;;  %vm1115_vm14 = vcmp.eq.f32.partialorder %v1114_v38, 8.507059e+37  ;;  %v1117_v8 = vor.u32 1.1754944e-38, %v1116_v15  ;;  %v1147_v19 = vsub.f32 1.0, %v1146_v41 }
 0x1a1   : > { %v1113_v27 = vsel %vm1112_vm13, %v1936_v50, %v1109_v46  ;;  %v1154_v10 = vand.u32 2147483647, %v2609_v44  ;;  %v1156_v33 = vand.u32 2147483648, %v2609_v44  ;;  %v2634_v35 = vadd.f32 1.0, %v1063_v52  ;;  %v2904_v46 = vld [vmem:[#allocation7_spill] sm:$0xff] }
 0x1a2   : > { %v1940_v14 = vpop.eup %1939  ;;  %v870_v40 = vadd.f32 1.0, %v1789_v58  ;;  %v1118_v28 = vsel %vm1115_vm14, %v1117_v8, %v1113_v27  ;;  %v1148_v43 = vmul.f32 %v1938_v7, %v1147_v19  ;;  %vm1151_vm15 = vweird.f32 %v1938_v7  ;;  %v2905_v58 = vld [vmem:[#allocation8_spill] sm:$0xff] }
 0x1a3   : > { %v1051_v61 = vadd.f32 0.18741608, %v2385_v51  ;;  %v1119_v13 = vmul.f32 %v1118_v28, %v1094_v62  ;;  %v1026_v55 = vmul.f32 %v1940_v14, %v2620_v6  ;;  %1941 = vrcp.f32 %v2634_v35 }
 0x1a4   : > { %v875_v26 = vmul.f32 %v869_v18, %v2302_v2  ;;  %v876_v34 = vmul.f32 %v870_v40, %v2318_v22  ;;  %v1149_v5 = vadd.f32 %v1938_v7, %v1148_v43  ;;  %vm1150_vm1 = vweird.f32 %v2609_v44  ;;  %v1853_v2 = vld [vmem:[%s2876_s5] sm:$0xff]  ;;  %v892_v43 = vpop.permute.xlu2 %891 }
 0x1a5   : > { %v1134_v12 = vmul.f32 %v1133_v29, %v2299_v63  ;;  %v1806_v16 = vclamps-f32 %v1119_v13, 1.0  ;;  %vm1152_vm2 = vmor %vm1150_vm1, %vm1151_vm15  ;;  %v1157_v53 = vor.u32 1.1754944e-38, %v1156_v33  ;;  %v1027_v48 = vsub.f32 1.0, %v1026_v55  ;;  %v1961_v40 = vld [vmem:[%s2174_s15] sm:$0xff]  ;;  %v1962_v55 = vld [vmem:[%s2174_s15 + $0x8] sm:$0xff] }
 0x1a6   : > { %v881_v31 = vpack.c.bf16 %v876_v34, %v875_v26  ;;  %v1153_v51 = vsel %vm1152_vm2, %v1938_v7, %v1149_v5  ;;  %vm1155_vm3 = vcmp.eq.f32.partialorder %v1154_v10, 8.507059e+37  ;;  %v1036_v1 = vand.u32 2147483648, %v2620_v6 }
 0x1a7   : > { %v1158_v57 = vsel %vm1155_vm3, %v1157_v53, %v1153_v51  ;;  %v1028_v22 = vmul.f32 %v1940_v14, %v1027_v48  ;;  %vm1031_vm4 = vweird.f32 %v1940_v14  ;;  %v1034_v44 = vand.u32 2147483647, %v2620_v6 }
 0x1a8   : > { %v1013_v63 = vadd.f32 1.1283791, %v2375_v32  ;;  %910 = vmatpush.bf16.msra.mxu1 %v881_v31  ;;  %v1159_v50 = vmul.f32 %v1158_v57, %v1134_v12  ;;  %vm899_vm5 = vcmask 392192   ;;  %v1052_v49 = vmul.f32 %v1051_v61, %v2265_v20  ;;  %v1963_v31 = vld [vmem:[%s2174_s15 + $0x10] sm:$0xff] }
 0x1a9   : > { %v1942_v45 = vpop.eup %1941  ;;  %v1244_v37 = vadd.f32 1.0, %v1806_v16  ;;  %v1029_v9 = vadd.f32 %v1940_v14, %v1028_v22  ;;  %vm1030_vm6 = vweird.f32 %v2620_v6  ;;  %v1037_v21 = vor.u32 1.1754944e-38, %v1036_v1 }
 0x1aa   : > { %v1807_v56 = vclamps-f32 %v1159_v50, 1.0  ;;  %vm1032_vm7 = vmor %vm1030_vm6, %vm1031_vm4  ;;  %v1066_v25 = vmul.f32 %v1942_v45, %v2634_v35  ;;  %v992_v4 = vmul.f32 0.5, %v2269_v23  ;;  %v993_v24 = vmul.f32 0.5, %v2288_v47 }
 0x1ab   : > { %1798 = vmatmul.msk.bf16.vlgmr.msra.gmra.mxu1 %vm899_vm5, %v1853_v2  ;;  %v1033_v32 = vsel %vm1032_vm7, %v1940_v14, %v1029_v9  ;;  %vm1035_vm8 = vcmp.eq.f32.partialorder %v1034_v44, 8.507059e+37  ;;  %v1014_v60 = vmul.f32 %v1013_v63, %v2232_v59  ;;  %v1053_v0 = vadd.f32 1.1283791, %v1052_v49 }
 0x1ac   : > { %v1245_v20 = vadd.f32 1.0, %v1807_v56  ;;  %v1038_v42 = vsel %vm1035_vm8, %v1037_v21, %v1033_v32  ;;  %v1067_v17 = vsub.f32 1.0, %v1066_v25  ;;  %v1250_v6 = vmul.f32 %v1244_v37, %v992_v4 }
 0x1ad   : > { %v1074_v54 = vand.u32 2147483647, %v2634_v35  ;;  %v1076_v38 = vand.u32 2147483648, %v2634_v35  ;;  %v1039_v7 = vmul.f32 %v1038_v42, %v1014_v60  ;;  %vm1071_vm9 = vweird.f32 %v1942_v45 }
 0x1ae   : > { %v1251_v15 = vmul.f32 %v1245_v20, %v993_v24  ;;  %v1068_v23 = vmul.f32 %v1942_v45, %v1067_v17  ;;  %vm1070_vm10 = vweird.f32 %v2634_v35  ;;  %v1054_v59 = vmul.f32 %v1053_v0, %v2254_v11  ;;  %v887_v11 = vpop.permute.xlu1 %886 }
 0x1af   : > { %vm1072_vm11 = vmor %vm1070_vm10, %vm1071_vm9  ;;  %v1077_v39 = vor.u32 1.1754944e-38, %v1076_v38  ;;  %v1804_v3 = vclamps-f32 %v1039_v7, 1.0  ;;  %vm1075_vm12 = vcmp.eq.f32.partialorder %v1074_v54, 8.507059e+37  ;;  %v990_v52 = vmul.f32 0.5, %v2904_v46 }
 0x1b0   : > { %v1255_v47 = vpack.c.bf16 %v1251_v15, %v1250_v6  ;;  %v1069_v30 = vadd.f32 %v1942_v45, %v1068_v23  ;;  %v991_v8 = vmul.f32 0.5, %v2905_v58  ;;  %v2031_v49 = vmov 32.0  }
 0x1b1   : > { %v1242_v18 = vadd.f32 1.0, %v1804_v3  ;;  %1943 = vrcp.f32 %v2031_v49 }
 0x1b2   : > { %1263 = vmatpush.bf16.msra.mxu3 %v1255_v47  ;;  %v1073_v62 = vsel %vm1072_vm11, %v1942_v45, %v1069_v30 }
 0x1b3   : > { %v1078_v29 = vsel %vm1075_vm12, %v1077_v39, %v1073_v62  ;;  %v1248_v27 = vmul.f32 %v1242_v18, %v990_v52 }
 0x1b4   : > { %v1079_v36 = vmul.f32 %v1078_v29, %v1054_v59 }
 0x1b6   : > { %v1805_v41 = vclamps-f32 %v1079_v36, 1.0 }
 0x1b7   : > { %v1944_v37 = vpop.eup %1943 }
 0x1b8   : > { %v1243_v19 = vadd.f32 1.0, %v1805_v41  ;;  %v1295_v9 = vmul.f32 32.0, %v1944_v37  ;;  %vm1299_vm13 = vweird.f32 %v1944_v37 }
 0x1ba   : > { %v1249_v10 = vmul.f32 %v1243_v19, %v991_v8  ;;  %v1296_v56 = vsub.f32 1.0, %v1295_v9 }
 0x1bc   : > { %v1254_v33 = vpack.c.bf16 %v1249_v10, %v1248_v27  ;;  %v1297_v21 = vmul.f32 %v1944_v37, %v1296_v56 }
 0x1be   : > { %1264 = vmatpush.bf16.msra.mxu3 %v1254_v33  ;;  %v1298_v25 = vadd.f32 %v1944_v37, %v1297_v21 }
 0x1c0   : > { %v2687_v4 = vsel %vm1299_vm13, %v1944_v37, %v1298_v25 }
 0x1c1   : > { %1810 = vmatmul.msk.bf16.vlgmr.msra.gmra.mxu3 %vm899_vm5, %v1853_v2  ;;  %v1964_v2 = vld [vmem:[%s2174_s15 + $0x18] sm:$0xff]  ;;  %s436_s15 = scalar_lea.vmem [#allocation3], %s1769_s24 }
 0x1c2   : > { %s1700_s1 = sshll.u32 %s436_s15, 4  ;;  %s1701_s1 = int_to_ptr.vmem [resolvable:$true] %s1700_s1 }
 0x228   : > { %v912_v35 = vpop.f32.mrf.mxu1 }
 0x229   : > { %v913_v14 = vadd.f32 %v912_v35, %v887_v11 }
 0x22b   : > { %v917_v28 = vadd.f32 %v1961_v40, %v913_v14 }
 0x22d   : > { %919 = vst.msk [vmem:[#allocation2] sm:$0xff] %vm468_vm0, %v917_v28 }
 0x230   : > { %v914_v61 = vpop.f32.mrf.mxu1 }
 0x231   : > { %v915_v13 = vadd.f32 %v914_v61, %v892_v43 }
 0x233   : > { %v918_v26 = vadd.f32 %v1962_v55, %v915_v13  ;;  %v1855_v55 = vld [vmem:[%s2880_s9 + $0x8] sm:$0xff] }
 0x234   : > { %v2666_v34 = vld [vmem:[#allocation2] sm:$0xff]  ;;  %1425 = vmatpush.bf16.msrb.mxu1 %v1855_v55 }
 0x235   : > { %920 = vst.msk [vmem:[#allocation2 + $0x8] sm:$0xff] %vm468_vm0, %v918_v26  ;;  %v1282_v5 = vsel %vm468_vm0, %v2666_v34, 0.0  ;;  %v1909_v26 = vld [vmem:[%s2878_s7] ss:$0 sm:$0xff] }
 0x236   : > { %1283 = vadd.xlane.f32.xlu0 %v1282_v5 }
 0x23c   : > { %v2671_v12 = vld [vmem:[#allocation2 + $0x8] sm:$0xff] }
 0x23d   : > { %v1285_v16 = vsel %vm468_vm0, %v2671_v12, 0.0 }
 0x23e   : > { %1286 = vadd.xlane.f32.xlu1 %v1285_v16 }
 0x244   : > { %v1266_v53 = vpop.f32.mrf.mxu3 }
 0x245   : > { %v1267_v48 = vadd.f32 %v1266_v53, %v887_v11 }
 0x247   : > { %v1271_v51 = vadd.f32 %v1963_v31, %v1267_v48  ;;  %v1854_v48 = vld [vmem:[%s2880_s9] sm:$0xff] }
 0x248   : > { %1426 = vmatpush.bf16.msrb.mxu1 %v1854_v48 }
 0x249   : > { %1274 = vst.msk [vmem:[#allocation2 + $0x10] sm:$0xff] %vm468_vm0, %v1271_v51 }
 0x24c   : > { %v1268_v1 = vpop.f32.mrf.mxu3 }
 0x24d   : > { %v1269_v57 = vadd.f32 %v1268_v1, %v892_v43 }
 0x24f   : > { %v1272_v22 = vadd.f32 %v1964_v2, %v1269_v57  ;;  %v1910_v2 = vld [vmem:[%s2879_s8] ss:$0 sm:$0xff] }
 0x250   : > { %v2678_v44 = vld [vmem:[#allocation2 + $0x10] sm:$0xff] }
 0x251   : > { %1275 = vst.msk [vmem:[#allocation2 + $0x18] sm:$0xff] %vm468_vm0, %v1272_v22  ;;  %v1288_v63 = vsel %vm468_vm0, %v2678_v44, 0.0 }
 0x252   : > { %1289 = vadd.xlane.f32.xlu2 %v1288_v63 }
 0x258   : > { %v2683_v50 = vld [vmem:[#allocation2 + $0x18] sm:$0xff] }
 0x259   : > { %v1291_v45 = vsel %vm468_vm0, %v2683_v50, 0.0 }
 0x25a   : > { %1292 = vadd.xlane.f32.xlu2 %v1291_v45 }
 0x2a9   : > { %v1284_v24 = vpop.xlane.xlu0 %1283 }
 0x2aa   : > { %v1301_v32 = vmul.f32 %v2687_v4, %v1284_v24 }
 0x2ac   : > { %v1305_v60 = vsub.f32 %v2666_v34, %v1301_v32 }
 0x2ae   : > { %v1309_v20 = vmul.f32 %v1305_v60, %v1305_v60 }
 0x2b0   : > { %v1313_v42 = vsel %vm468_vm0, %v1309_v20, 0.0 }
 0x2b1   : > { %v1287_v17 = vpop.xlane.xlu1 %1286  ;;  %1314 = vadd.xlane.f32.xlu0 %v1313_v42 }
 0x2b2   : > { %v1302_v0 = vmul.f32 %v2687_v4, %v1287_v17 }
 0x2b4   : > { %v1306_v6 = vsub.f32 %v2671_v12, %v1302_v0 }
 0x2b6   : > { %v1310_v54 = vmul.f32 %v1306_v6, %v1306_v6 }
 0x2b8   : > { %v1316_v38 = vsel %vm468_vm0, %v1310_v54, 0.0 }
 0x2b9   : > { %1317 = vadd.xlane.f32.xlu1 %v1316_v38 }
 0x2c5   : > { %v1290_v15 = vpop.xlane.xlu2 %1289 }
 0x2c6   : > { %v1303_v7 = vmul.f32 %v2687_v4, %v1290_v15 }
 0x2c8   : > { %v2697_v23 = vsub.f32 %v2678_v44, %v1303_v7 }
 0x2ca   : > { %v1311_v47 = vmul.f32 %v2697_v23, %v2697_v23 }
 0x2cc   : > { %v1319_v30 = vsel %vm468_vm0, %v1311_v47, 0.0 }
 0x2cd   : > { %1320 = vadd.xlane.f32.xlu2 %v1319_v30  ;;  %v1293_v39 = vpop.xlane.xlu2 %1292 }
 0x2ce   : > { %v1304_v59 = vmul.f32 %v2687_v4, %v1293_v39 }
 0x2d0   : > { %v2704_v3 = vsub.f32 %v2683_v50, %v1304_v59 }
 0x2d2   : > { %v1312_v62 = vmul.f32 %v2704_v3, %v2704_v3 }
 0x2d4   : > { %v1322_v29 = vsel %vm468_vm0, %v1312_v62, 0.0 }
 0x2d5   : > { %1323 = vadd.xlane.f32.xlu0 %v1322_v29 }
 0x324   : > { %v1315_v36 = vpop.xlane.xlu0 %1314 }
 0x325   : > { %v1325_v41 = vmul.f32 %v1315_v36, %v2687_v4  ;;  %v1911_v36 = vld [vmem:[%s2881_s10] ss:$0 sm:$0xff] }
 0x327   : > { %v1329_v18 = vadd.f32 1e-05, %v1325_v41 }
 0x329   : > { %1945 = vrsqrt.f32 %v1329_v18  ;;  %vm1339_vm15 = vweird.f32 %v1329_v18 }
 0x32c   : > { %v1318_v46 = vpop.xlane.xlu1 %1317 }
 0x32d   : > { %v1326_v52 = vmul.f32 %v1318_v46, %v2687_v4 }
 0x32f   : > { %v1946_v58 = vpop.eup %1945  ;;  %v1330_v8 = vadd.f32 1e-05, %v1326_v52 }
 0x330   : > { %v1334_v19 = vmul.f32 %v1946_v58, %v1329_v18  ;;  %vm1340_vm14 = vweird.f32 %v1946_v58 }
 0x331   : > { %1947 = vrsqrt.f32 %v1330_v8  ;;  %vm1341_vm1 = vmor %vm1339_vm15, %vm1340_vm14  ;;  %vm1349_vm3 = vweird.f32 %v1330_v8 }
 0x332   : > { %v1335_v27 = vmul.f32 %v1946_v58, %v1334_v19 }
 0x334   : > { %v1336_v10 = vmul.f32 0.5, %v1335_v27 }
 0x336   : > { %v1337_v33 = vsub.f32 1.5, %v1336_v10 }
 0x337   : > { %v1948_v11 = vpop.eup %1947 }
 0x338   : > { %v1338_v35 = vmul.f32 %v1946_v58, %v1337_v33  ;;  %v1344_v14 = vmul.f32 %v1948_v11, %v1330_v8  ;;  %vm1350_vm2 = vweird.f32 %v1948_v11 }
 0x339   : > { %vm1351_vm4 = vmor %vm1349_vm3, %vm1350_vm2 }
 0x33a   : > { %v1345_v40 = vmul.f32 %v1948_v11, %v1344_v14  ;;  %v1342_v28 = vsel %vm1341_vm1, %v1946_v58, %v1338_v35 }
 0x33b   : > { %v1373_v13 = vmul.f32 %v1342_v28, %v1305_v60 }
 0x33c   : > { %v1346_v43 = vmul.f32 0.5, %v1345_v40 }
 0x33d   : > { %v1380_v57 = vmul.f32 %v1909_v26, %v1373_v13 }
 0x33e   : > { %v1347_v61 = vsub.f32 1.5, %v1346_v43 }
 0x33f   : > { %v1387_v63 = vadd.f32 %v1910_v2, %v1380_v57 }
 0x340   : > { %v1348_v5 = vmul.f32 %v1948_v11, %v1347_v61  ;;  %v1321_v16 = vpop.xlane.xlu2 %1320 }
 0x341   : > { %v1327_v53 = vmul.f32 %v1321_v16, %v2687_v4 }
 0x342   : > { %v1352_v31 = vsel %vm1351_vm4, %v1948_v11, %v1348_v5 }
 0x343   : > { %v1374_v51 = vmul.f32 %v1352_v31, %v1306_v6  ;;  %v1331_v1 = vadd.f32 1e-05, %v1327_v53 }
 0x345   : > { %1949 = vrsqrt.f32 %v1331_v1  ;;  %v1381_v22 = vmul.f32 %v1909_v26, %v1374_v51  ;;  %vm1359_vm6 = vweird.f32 %v1331_v1 }
 0x347   : > { %v1388_v45 = vadd.f32 %v1910_v2, %v1381_v22 }
 0x348   : > { %v1324_v49 = vpop.xlane.xlu0 %1323 }
 0x349   : > { %v1328_v37 = vmul.f32 %v1324_v49, %v2687_v4  ;;  %v1391_v9 = vpack.c.bf16 %v1388_v45, %v1387_v63 }
 0x34b   : > { %v1950_v56 = vpop.eup %1949  ;;  %v1332_v21 = vadd.f32 1e-05, %v1328_v37  ;;  %1819 = vmatmul.msk.bf16.vlgmr.msrb.gmra.mxu1 %vm468_vm0, %v1391_v9 }
 0x34c   : > { %v1354_v25 = vmul.f32 %v1950_v56, %v1331_v1  ;;  %vm1360_vm5 = vweird.f32 %v1950_v56 }
 0x34d   : > { %1951 = vrsqrt.f32 %v1332_v21  ;;  %vm1361_vm7 = vmor %vm1359_vm6, %vm1360_vm5  ;;  %vm1369_vm9 = vweird.f32 %v1332_v21 }
 0x34e   : > { %v1355_v24 = vmul.f32 %v1950_v56, %v1354_v25 }
 0x350   : > { %v1356_v32 = vmul.f32 0.5, %v1355_v24 }
 0x352   : > { %v1357_v60 = vsub.f32 1.5, %v1356_v32 }
 0x353   : > { %v1952_v20 = vpop.eup %1951 }
 0x354   : > { %v1358_v42 = vmul.f32 %v1950_v56, %v1357_v60  ;;  %v1364_v17 = vmul.f32 %v1952_v20, %v1332_v21  ;;  %vm1370_vm8 = vweird.f32 %v1952_v20 }
 0x355   : > { %vm1371_vm10 = vmor %vm1369_vm9, %vm1370_vm8 }
 0x356   : > { %v1365_v0 = vmul.f32 %v1952_v20, %v1364_v17  ;;  %v1362_v6 = vsel %vm1361_vm7, %v1950_v56, %v1358_v42  ;;  %vm1652_vm7 = vcmask 523264  }
 0x357   : > { %v1375_v38 = vmul.f32 %v1362_v6, %v2697_v23 }
 0x358   : > { %v1366_v54 = vmul.f32 0.5, %v1365_v0 }
 0x359   : > { %v1382_v30 = vmul.f32 %v1909_v26, %v1375_v38 }
 0x35a   : > { %v1367_v4 = vsub.f32 1.5, %v1366_v54 }
 0x35b   : > { %v1389_v59 = vadd.f32 %v1910_v2, %v1382_v30 }
 0x35c   : > { %v1368_v15 = vmul.f32 %v1952_v20, %v1367_v4 }
 0x35e   : > { %v1372_v7 = vsel %vm1371_vm10, %v1952_v20, %v1368_v15 }
 0x35f   : > { %v1376_v47 = vmul.f32 %v1372_v7, %v2704_v3 }
 0x361   : > { %v1383_v39 = vmul.f32 %v1909_v26, %v1376_v47 }
 0x363   : > { %v1390_v62 = vadd.f32 %v1910_v2, %v1383_v39 }
 0x365   : > { %v1392_v29 = vpack.c.bf16 %v1390_v62, %v1389_v59 }
 0x367   : > { %1820 = vmatmul.msk.bf16.gmra.mxu1 %vm468_vm0, %v1392_v29 }
 0x3c8   : > { %v1428_v41 = vpop.f32.mrf.mxu1 }
 0x3c9   : > { %v2732_v18 = vadd.f32 %v1911_v36, %v1428_v41 }
 0x3cb   : > { %v2735_v23 = vmul.f32 0.70710677, %v2732_v18 }
 0x3cd   : > { %v1446_v3 = vmul.f32 %v2735_v23, %v2735_v23 }
 0x3cf   : > { %v1447_v46 = vmin.f32 %v1446_v3, 16.0 }
 0x3d0   : > { %v1430_v33 = vpop.f32.mrf.mxu1 }
 0x3d1   : > { %v1459_v52 = vmul.f32 3.8918573e-05, %v1447_v46  ;;  %v1448_v11 = vmul.f32 2.1237322e-06, %v1447_v46  ;;  %v2739_v35 = vadd.f32 %v1911_v36, %v1430_v33 }
 0x3d3   : > { %v1460_v58 = vadd.f32 0.001143296, %v1459_v52  ;;  %v2742_v40 = vmul.f32 0.70710677, %v2739_v35  ;;  %v1449_v28 = vadd.f32 0.00028619796, %v1448_v11 }
 0x3d5   : > { %v1461_v8 = vmul.f32 %v1460_v58, %v1447_v46  ;;  %v1486_v61 = vmul.f32 %v2742_v40, %v2742_v40  ;;  %v1450_v55 = vmul.f32 %v1449_v28, %v1447_v46 }
 0x3d7   : > { %v1462_v19 = vadd.f32 0.014752088, %v1461_v8  ;;  %v1487_v13 = vmin.f32 %v1486_v61, 16.0  ;;  %v1451_v31 = vadd.f32 0.0036580483, %v1450_v55 }
 0x3d9   : > { %v1463_v27 = vmul.f32 %v1462_v19, %v1447_v46  ;;  %v1488_v5 = vmul.f32 2.1237322e-06, %v1487_v13  ;;  %v1499_v16 = vmul.f32 3.8918573e-05, %v1487_v13  ;;  %v1452_v22 = vmul.f32 %v1451_v31, %v1447_v46 }
 0x3db   : > { %v1464_v10 = vadd.f32 0.112945676, %v1463_v27  ;;  %v1489_v53 = vadd.f32 0.00028619796, %v1488_v5  ;;  %v1500_v48 = vadd.f32 0.001143296, %v1499_v16 }
 0x3dc   : > { %v1453_v37 = vadd.f32 0.05243302, %v1452_v22 }
 0x3dd   : > { %v1465_v14 = vmul.f32 %v1464_v10, %v1447_v46  ;;  %v1501_v1 = vmul.f32 %v1500_v48, %v1487_v13  ;;  %v1490_v57 = vmul.f32 %v1489_v53, %v1487_v13 }
 0x3de   : > { %v1454_v60 = vmul.f32 %v1453_v37, %v1447_v46 }
 0x3df   : > { %v1466_v43 = vadd.f32 0.4994258, %v1465_v14  ;;  %v1502_v2 = vadd.f32 0.014752088, %v1501_v1  ;;  %v1491_v45 = vadd.f32 0.0036580483, %v1490_v57 }
 0x3e0   : > { %v1455_v4 = vadd.f32 0.18741608, %v1454_v60  ;;  %v1856_v57 = vld [vmem:[%s2882_s11] sm:$0xff] }
 0x3e1   : > { %v1467_v26 = vmul.f32 %v1466_v43, %v1447_v46  ;;  %v1503_v63 = vmul.f32 %v1502_v2, %v1487_v13  ;;  %v1492_v21 = vmul.f32 %v1491_v45, %v1487_v13 }
 0x3e2   : > { %v1456_v62 = vmul.f32 %v1455_v4, %v1447_v46 }
 0x3e3   : > { %v2746_v51 = vadd.f32 1.0, %v1467_v26  ;;  %v1504_v49 = vadd.f32 0.112945676, %v1503_v63  ;;  %v1493_v0 = vadd.f32 0.05243302, %v1492_v21 }
 0x3e4   : > { %v1433_v56 = vpop.f32.mrf.mxu1  ;;  %v1457_v10 = vadd.f32 1.1283791, %v1456_v62 }
 0x3e5   : > { %1953 = vrcp.f32 %v2746_v51  ;;  %v1505_v9 = vmul.f32 %v1504_v49, %v1487_v13  ;;  %v2749_v25 = vadd.f32 %v1911_v36, %v1433_v56  ;;  %v1494_v47 = vmul.f32 %v1493_v0, %v1487_v13 }
 0x3e6   : > { %vm1474_vm11 = vweird.f32 %v2746_v51  ;;  %v1478_v33 = vand.u32 2147483647, %v2746_v51  ;;  %v1480_v11 = vand.u32 2147483648, %v2746_v51  ;;  %v1458_v4 = vmul.f32 %v1457_v10, %v2735_v23 }
 0x3e7   : > { %v1506_v32 = vadd.f32 0.4994258, %v1505_v9  ;;  %v2754_v20 = vmul.f32 0.70710677, %v2749_v25  ;;  %v1495_v58 = vadd.f32 0.18741608, %v1494_v47 }
 0x3e8   : > { %vm1479_vm2 = vcmp.eq.f32.partialorder %v1478_v33, 8.507059e+37  ;;  %v1481_v21 = vor.u32 1.1754944e-38, %v1480_v11 }
 0x3e9   : > { %v1507_v42 = vmul.f32 %v1506_v32, %v1487_v13  ;;  %v1526_v6 = vmul.f32 %v2754_v20, %v2754_v20  ;;  %v1496_v61 = vmul.f32 %v1495_v58, %v1487_v13 }
 0x3eb   : > { %v2751_v24 = vpop.eup %1953  ;;  %v1508_v54 = vadd.f32 1.0, %v1507_v42  ;;  %v2760_v38 = vmin.f32 %v1526_v6, 16.0  ;;  %v1497_v45 = vadd.f32 1.1283791, %v1496_v61  ;;  %v1439_v61 = vmul.f32 0.5, %v2739_v35 }
 0x3ec   : > { %v1470_v17 = vmul.f32 %v2751_v24, %v2746_v51  ;;  %v1435_v15 = vpop.f32.mrf.mxu1  ;;  %vm1475_vm12 = vweird.f32 %v2751_v24 }
 0x3ed   : > { %1955 = vrcp.f32 %v1508_v54  ;;  %v1528_v30 = vmul.f32 2.1237322e-06, %v2760_v38  ;;  %v2763_v39 = vadd.f32 %v1911_v36, %v1435_v15  ;;  %v1539_v59 = vmul.f32 3.8918573e-05, %v2760_v38  ;;  %vm2786_vm14 = vmor %vm1474_vm11, %vm1475_vm12 }
 0x3ee   : > { %v1471_v7 = vsub.f32 1.0, %v1470_v17  ;;  %v1520_v26 = vand.u32 2147483648, %v1508_v54  ;;  %v1518_v31 = vand.u32 2147483647, %v1508_v54  ;;  %vm1514_vm15 = vweird.f32 %v1508_v54 }
 0x3ef   : > { %v1529_v29 = vadd.f32 0.00028619796, %v1528_v30  ;;  %v1540_v41 = vadd.f32 0.001143296, %v1539_v59  ;;  %v2767_v3 = vmul.f32 0.70710677, %v2763_v39  ;;  %v1498_v6 = vmul.f32 %v1497_v45, %v2742_v40 }
 0x3f0   : > { %v1472_v52 = vmul.f32 %v2751_v24, %v1471_v7  ;;  %v1521_v37 = vor.u32 1.1754944e-38, %v1520_v26  ;;  %vm1519_vm3 = vcmp.eq.f32.partialorder %v1518_v31, 8.507059e+37 }
 0x3f1   : > { %v1541_v19 = vmul.f32 %v1540_v41, %v2760_v38  ;;  %v1566_v27 = vmul.f32 %v2767_v3, %v2767_v3  ;;  %v1530_v46 = vmul.f32 %v1529_v29, %v2760_v38 }
 0x3f2   : > { %v1473_v43 = vadd.f32 %v2751_v24, %v1472_v52  ;;  %v1859_v52 = vld [vmem:[%s2882_s11 + $0x18] sm:$0xff] }
 0x3f3   : > { %v1956_v8 = vpop.eup %1955  ;;  %v1542_v14 = vadd.f32 0.014752088, %v1541_v19  ;;  %v2777_v28 = vmin.f32 %v1566_v27, 16.0  ;;  %v1531_v1 = vadd.f32 0.0036580483, %v1530_v46  ;;  %1663 = vmatpush.bf16.msrb.mxu3 %v1859_v52  ;;  %v1858_v19 = vld [vmem:[%s2882_s11 + $0x10] sm:$0xff] }
 0x3f4   : > { %v1510_v36 = vmul.f32 %v1956_v8, %v1508_v54  ;;  %vm1515_vm13 = vweird.f32 %v1956_v8  ;;  %v1477_v63 = vsel %vm2786_vm14, %v2751_v24, %v1473_v43  ;;  %v1857_v43 = vld [vmem:[%s2882_s11 + $0x8] sm:$0xff] }
 0x3f5   : > { %v1543_v5 = vmul.f32 %v1542_v14, %v2760_v38  ;;  %v1568_v16 = vmul.f32 2.1237322e-06, %v2777_v28  ;;  %v1579_v53 = vmul.f32 3.8918573e-05, %v2777_v28  ;;  %vm1516_vm1 = vmor %vm1514_vm15, %vm1515_vm13  ;;  %v1532_v42 = vmul.f32 %v1531_v1, %v2760_v38 }
 0x3f6   : > { %v1511_v55 = vsub.f32 1.0, %v1510_v36  ;;  %v1482_v0 = vsel %vm1479_vm2, %v1481_v21, %v1477_v63 }
 0x3f7   : > { %v1544_v2 = vadd.f32 0.112945676, %v1543_v5  ;;  %v1569_v13 = vadd.f32 0.00028619796, %v1568_v16  ;;  %v1580_v22 = vadd.f32 0.001143296, %v1579_v53  ;;  %v1483_v30 = vmul.f32 %v1482_v0, %v1458_v4  ;;  %1664 = vmatpush.bf16.msrb.mxu3 %v1858_v19 }
 0x3f8   : > { %v1512_v48 = vmul.f32 %v1956_v8, %v1511_v55  ;;  %v1533_v59 = vadd.f32 0.05243302, %v1532_v42  ;;  %v1438_v16 = vmul.f32 0.5, %v2732_v18 }
 0x3f9   : > { %v1545_v9 = vmul.f32 %v1544_v2, %v2760_v38  ;;  %v1570_v51 = vmul.f32 %v1569_v13, %v2777_v28  ;;  %v1581_v56 = vmul.f32 %v1580_v22, %v2777_v28  ;;  %v1821_v23 = vclamps-f32 %v1483_v30, 1.0 }
 0x3fa   : > { %v1513_v49 = vadd.f32 %v1956_v8, %v1512_v48 }
 0x3fb   : > { %v1546_v17 = vadd.f32 0.4994258, %v1545_v9  ;;  %v1582_v24 = vadd.f32 0.014752088, %v1581_v56  ;;  %v1571_v54 = vadd.f32 0.0036580483, %v1570_v51  ;;  %1665 = vmatpush.bf16.msrb.mxu3 %v1857_v43 }
 0x3fc   : > { %v1517_v32 = vsel %vm1516_vm1, %v1956_v8, %v1513_v49  ;;  %v1534_v8 = vmul.f32 %v1533_v59, %v2760_v38  ;;  %v1606_v11 = vadd.f32 1.0, %v1821_v23  ;;  %v1440_v59 = vmul.f32 0.5, %v2749_v25 }
 0x3fd   : > { %v1522_v60 = vsel %vm1519_vm3, %v1521_v37, %v1517_v32  ;;  %v1547_v15 = vmul.f32 %v1546_v17, %v2760_v38  ;;  %v1583_v7 = vmul.f32 %v1582_v24, %v2777_v28  ;;  %v1572_v41 = vmul.f32 %v1571_v54, %v2777_v28 }
 0x3fe   : > { %v1523_v47 = vmul.f32 %v1522_v60, %v1498_v6  ;;  %v1535_v14 = vadd.f32 0.18741608, %v1534_v8  ;;  %v1610_v31 = vmul.f32 %v1606_v11, %v1438_v16 }
 0x3ff   : > { %v1548_v62 = vadd.f32 1.0, %v1547_v15  ;;  %v1584_v29 = vadd.f32 0.112945676, %v1583_v7  ;;  %v1573_v27 = vadd.f32 0.05243302, %v1572_v41  ;;  %1666 = vmatpush.bf16.msrb.mxu3 %v1856_v57 }
 0x400   : > { %v1822_v40 = vclamps-f32 %v1523_v47, 1.0  ;;  %v1536_v1 = vmul.f32 %v1535_v14, %v2760_v38 }
 0x401   : > { %1957 = vrcp.f32 %v1548_v62  ;;  %v1585_v58 = vmul.f32 %v1584_v29, %v2777_v28  ;;  %v1574_v26 = vmul.f32 %v1573_v27, %v2777_v28  ;;  %v1560_v35 = vand.u32 2147483648, %v1548_v62 }
 0x402   : > { %v1607_v36 = vadd.f32 1.0, %v1822_v40  ;;  %v1558_v22 = vand.u32 2147483647, %v1548_v62  ;;  %vm1554_vm5 = vweird.f32 %v1548_v62  ;;  %v1537_v18 = vadd.f32 1.1283791, %v1536_v1 }
 0x403   : > { %v1586_v10 = vadd.f32 0.4994258, %v1585_v58  ;;  %v1575_v13 = vadd.f32 0.18741608, %v1574_v26  ;;  %v1561_v38 = vor.u32 1.1754944e-38, %v1560_v35 }
 0x404   : > { %v1611_v53 = vmul.f32 %v1607_v36, %v1439_v61  ;;  %vm1559_vm8 = vcmp.eq.f32.partialorder %v1558_v22, 8.507059e+37  ;;  %v1538_v21 = vmul.f32 %v1537_v18, %v2754_v20 }
 0x405   : > { %v1587_v46 = vmul.f32 %v1586_v10, %v2777_v28  ;;  %v1576_v9 = vmul.f32 %v1575_v13, %v2777_v28 }
 0x406   : > { %v1614_v63 = vpack.c.bf16 %v1611_v53, %v1610_v31 }
 0x407   : > { %v1958_v33 = vpop.eup %1957  ;;  %v1588_v5 = vadd.f32 1.0, %v1587_v46  ;;  %v1577_v60 = vadd.f32 1.1283791, %v1576_v9 }
 0x408   : > { %v1550_v55 = vmul.f32 %v1958_v33, %v1548_v62  ;;  %vm1555_vm4 = vweird.f32 %v1958_v33  ;;  %1841 = vmatmul.msk.bf16.vlgmr.msrb.gmra.mxu3 %vm1652_vm7, %v1614_v63  ;;  %v1441_v62 = vmul.f32 0.5, %v2763_v39 }
 0x409   : > { %1959 = vrcp.f32 %v1588_v5  ;;  %vm1556_vm6 = vmor %vm1554_vm5, %vm1555_vm4  ;;  %v1600_v42 = vand.u32 2147483648, %v1588_v5  ;;  %v1598_v0 = vand.u32 2147483647, %v1588_v5  ;;  %vm1594_vm10 = vweird.f32 %v1588_v5 }
 0x40a   : > { %v1551_v48 = vsub.f32 1.0, %v1550_v55  ;;  %v1578_v4 = vmul.f32 %v1577_v60, %v2767_v3  ;;  %v1912_v3 = vld [vmem:[%s2883_s12] ss:$0 sm:$0xff] }
 0x40b   : > { %v1601_v54 = vor.u32 1.1754944e-38, %v1600_v42  ;;  %vm1599_vm12 = vcmp.eq.f32.partialorder %v1598_v0, 8.507059e+37 }
 0x40c   : > { %v1552_v2 = vmul.f32 %v1958_v33, %v1551_v48 }
 0x40e   : > { %v1553_v45 = vadd.f32 %v1958_v33, %v1552_v2 }
 0x40f   : > { %v1960_v49 = vpop.eup %1959 }
 0x410   : > { %v1557_v37 = vsel %vm1556_vm6, %v1958_v33, %v1553_v45  ;;  %v1590_v51 = vmul.f32 %v1960_v49, %v1588_v5  ;;  %vm1595_vm9 = vweird.f32 %v1960_v49 }
 0x411   : > { %v1562_v56 = vsel %vm1559_vm8, %v1561_v38, %v1557_v37  ;;  %vm1596_vm11 = vmor %vm1594_vm10, %vm1595_vm9 }
 0x412   : > { %v1591_v32 = vsub.f32 1.0, %v1590_v51  ;;  %v1563_v17 = vmul.f32 %v1562_v56, %v1538_v21 }
 0x414   : > { %v1592_v24 = vmul.f32 %v1960_v49, %v1591_v32  ;;  %v1823_v28 = vclamps-f32 %v1563_v17, 1.0 }
 0x416   : > { %v1593_v6 = vadd.f32 %v1960_v49, %v1592_v24  ;;  %v1608_v20 = vadd.f32 1.0, %v1823_v28 }
 0x418   : > { %v1597_v15 = vsel %vm1596_vm11, %v1960_v49, %v1593_v6  ;;  %v1612_v41 = vmul.f32 %v1608_v20, %v1440_v59 }
 0x419   : > { %v1602_v7 = vsel %vm1599_vm12, %v1601_v54, %v1597_v15 }
 0x41a   : > { %v1603_v47 = vmul.f32 %v1602_v7, %v1578_v4 }
 0x41c   : > { %v1824_v30 = vclamps-f32 %v1603_v47, 1.0 }
 0x41e   : > { %v1609_v29 = vadd.f32 1.0, %v1824_v30 }
 0x420   : > { %v1613_v52 = vmul.f32 %v1609_v29, %v1441_v62 }
 0x422   : > { %v1615_v40 = vpack.c.bf16 %v1613_v52, %v1612_v41 }
 0x424   : > { %1842 = vmatmul.msk.bf16.gmra.mxu3 %vm1652_vm7, %v1615_v40 }
 0x48b   : > { %v1668_v58 = vpop.f32.mrf.mxu3 }
 0x48c   : > { %v1669_v23 = vadd.f32 %v1912_v3, %v1668_v58 }
 0x48e   : > { %v1678_v8 = vadd.f32 %v1669_v23, %v2666_v34 }
 0x490   : > { %1682 = vst.msk [vmem:[%s436_s15] sm:$0xff] %vm468_vm0, %v1678_v8 }
 0x493   : > { %v1670_v25 = vpop.f32.mrf.mxu3 }
 0x494   : > { %v1671_v39 = vadd.f32 %v1912_v3, %v1670_v25 }
 0x496   : > { %v1679_v19 = vadd.f32 %v1671_v39, %v2671_v12 }
 0x498   : > { %1683 = vst.msk [vmem:[%s436_s15 + $0x8] sm:$0xff] %vm468_vm0, %v1679_v19 }
 0x4a7   : > { %v1673_v27 = vpop.f32.mrf.mxu3 }
 0x4a8   : > { %v1674_v10 = vadd.f32 %v1912_v3, %v1673_v27 }
 0x4aa   : > { %v1680_v36 = vadd.f32 %v1674_v10, %v2678_v44 }
 0x4ac   : > { %1684 = vst.msk [vmem:[%s436_s15 + $0x10] sm:$0xff] %vm468_vm0, %v1680_v36 }
 0x4af   : > { %v1675_v34 = vpop.f32.mrf.mxu3 }
 0x4b0   : > { %v1676_v46 = vadd.f32 %v1912_v3, %v1675_v34 }
 0x4b2   : > { %v1681_v12 = vadd.f32 %v1676_v46, %v2683_v50 }
 0x4b4   : > { %1685 = vst.msk [vmem:[%s436_s15 + $0x18] sm:$0xff] %vm468_vm0, %v1681_v12 }
 0x4b5   : > { %1992 = shalt.err (!%p1989_p3)
}
 0x4b6   : > { %s2032_s17 = smov 128   ;;  %s2033_s15 = smov 8  }
 0x4b7   : > { %1862 = dma.vmem_to_hbm [thread:$0]  (%p2142_p5), %s1701_s1, 512, %s1703_s2, %s1687_s29, %s2032_s17, %s2032_s17, %s2033_s15  }
 0x4b8 PF: > { %p1868_p4 = scmp.ge.s32.totalorder %s2027_s28, 2  ;;  %s1717_s24 = sand.u32 1, %s2015_s25  }
 0x4b9   : > { %s1718_s30 = scalar_lea.sflag [#allocation4], %s1717_s24 }
 0x4ba   : > { %p1865_p7 = pnand %p1868_p4, %p2146_p6 }
 0x4bc   : > { %p1866_p8 = pneg %p1865_p7 }
 0x4be   : > { %2010 = dma.done.wait (%p1866_p8), %s1718_s30, 512  }
 0x4bf   : > { %2012 = vsyncadd (%p1866_p8), %s1718_s30, 4294966784  ;;  %s2908_s20 = sld [smem:[#allocation6_spill]]  ;;  %p23_p9 = scmp.ge.s32.totalorder %s2129_s14, 4  }
 0x4c0   : > { %s2909_s25 = smov %s2019_s26  ;;  %s2910_s26 = smov %s2023_s27 }
 0x4c1   : > { %s2912_s28 = smov %s2129_s14  ;;  %25 = sbr.rel (!%p23_p9) target bundleno = 6 (0x6), region = 109 }
 0x4c5   : > { %s2911_s27 = smov %s2908_s20 }
 0x4c6   :  { %1724 = vsyncpa [#allocation4], 1 }
 0x4c7   :  { %1726 = vsyncpa [#allocation4 + $0x1], 1 }

// kernel: tpu_custom_call.1
= control target key start
LH: loop header
LB: loop body
LE: loop exit
PB: predicated region body
PF: predicated region fallthrough
CT: control target
= control target key end

     0   :  { %s2871_s0 = inlined_call_operand.vmem [shape: f32[4,16,32], index: 0, kind: input, shape index: {}]   ;;  %s2872_s1 = inlined_call_operand.vmem [shape: f32[16,1], index: 1, kind: input, shape index: {}]   ;;  %s2873_s2 = inlined_call_operand.vmem [shape: f32[16,1], index: 2, kind: input, shape index: {}]   ;;  %s2874_s3 = inlined_call_operand.vmem [shape: bf16[48,16], index: 3, kind: input, shape index: {}]   ;;  %s2875_s4 = inlined_call_operand.vmem [shape: f32[48,1], index: 4, kind: input, shape index: {}]   ;;  %s2876_s5 = inlined_call_operand.vmem [shape: bf16[16,48], index: 5, kind: input, shape index: {}]   ;;  %s2877_s6 = inlined_call_operand.vmem [shape: f32[16,1], index: 6, kind: input, shape index: {}]   ;;  %s2878_s7 = inlined_call_operand.vmem [shape: f32[1,32], index: 7, kind: input, shape index: {}]   ;;  %s2879_s8 = inlined_call_operand.vmem [shape: f32[1,32], index: 8, kind: input, shape index: {}]   ;;  %s2880_s9 = inlined_call_operand.vmem [shape: bf16[32,64], index: 9, kind: input, shape index: {}]   ;;  %s2881_s10 = inlined_call_operand.vmem [shape: f32[1,64], index: 10, kind: input, shape index: {}]   ;;  %s2882_s11 = inlined_call_operand.vmem [shape: bf16[64,32], index: 11, kind: input, shape index: {}]   ;;  %s2883_s12 = inlined_call_operand.vmem [shape: f32[1,32], index: 12, kind: input, shape index: {}]   ;;  %s2884_s13 = inlined_call_operand.hbm [shape: f32[4,16,32], index: 13, kind: output, shape index: {}]  }
   0x1   :  { %2887 = sst [smem:[#allocation9_spill]] %s2872_s1 }
   0x2   :  { %2888 = sst [smem:[#allocation10_spill]] %s2873_s2 }
   0x3   :  { %18 = vsyncpa [#allocation4], 0 }
   0x4   :  { %20 = vsyncpa [#allocation4 + $0x1], 0  ;;  %s2104_s25 = smov 0   ;;  %s2106_s26 = smov 0  }
   0x5   :  { %s2108_s27 = smov 0   ;;  %s2110_s28 = smov 0  }
   0x6 LB: > { %s2125_s29 = sadd.s32 4294967295, %s2027_s28   ;;  %s1765_s30 = sadd.s32 4294967294, %s2027_s28   ;;  %s2027_s28 = sphi %s2110_s28, %s2912_s28   ;;  %s2023_s27 = sphi %s2108_s27, %s2911_s27   ;;  %s2019_s26 = sphi %s2106_s26, %s2910_s26   ;;  %s2015_s25 = sphi %s2104_s25, %s2909_s25  }
   0x7   : > { %s2129_s14 = sadd.s32 1, %s2027_s28   ;;  %s311_s15 = sadd.s32 1, %s2023_s27 }
   0x8   : > { %s308_s16 = ssub.s32 %s2027_s28, %s2129_s14  ;;  %p321_p0 = scmp.ne.s32.totalorder %s2023_s27, %s2019_s26 }
   0x9   : > { %p309_p1 = scmp.eq.s32.totalorder %s308_s16, 0  ;;  %p322_p2 = scmp.eq.s32.totalorder %s2125_s29, 1 }
   0xa   : > { %p327_p3 = scmp.ne.s32.totalorder %s2019_s26, %s2015_s25  ;;  %p328_p4 = scmp.eq.s32.totalorder %s1765_s30, 1 }
   0xb   : > { %s2140_s17 = scalar_select %p309_p1, %s2023_s27, %s311_s15  }
   0xc   : > { %p2142_p5 = por %p322_p2, %p321_p0  ;;  %p2146_p6 = por %p328_p4, %p327_p3 }
   0xd   : > { %2889 = sst [smem:[#allocation6_spill]] %s2140_s17  ;;  %p1768_p7 = scmp.ge.s32.totalorder %s2027_s28, 1 }
   0xe   : > { %p392_p8 = scmp.lt.s32.totalorder %s2027_s28, 3 }
  0x10   : > { %p393_p9 = pnand %p1768_p7, %p392_p8 }
  0x12   : > { %396 = sbr.rel (%p393_p9) target bundleno = 1208 (0x4b8), region = 72 }
  0x17   : > { %s2892_s2 = sld [smem:[#allocation10_spill]]  ;;  %v2029_v2 = vmov 0   ;;  %s1770_s20 = sshll.u32 %s2125_s29, 1  ;;  %v461_v5 = vld [vmem:[%s2875_s4 + $0x18] sm:$0xff]  ;;  %v460_v6 = vld [vmem:[%s2875_s4 + $0x10] sm:$0xff]  ;;  %v464_v7 = vld [vmem:[%s2877_s6] sm:$0xff] }
  0x18   : > { %s2893_s1 = sld [smem:[#allocation9_spill]]  ;;  %1907 = vset.pattern.permute.xlu1 %v2029_v2  ;;  %1906 = vset.pattern.permute.xlu0 %v2029_v2  ;;  %p438_p10 = scmp.lt.s32.totalorder %s1770_s20, 3  ;;  %v459_v8 = vld [vmem:[%s2875_s4 + $0x8] sm:$0xff]  ;;  %vm468_vm0 = vcmask 261120   ;;  %v2030_v9 = vmov 16.0   ;;  %vm583_vm8 = vcmask 130048  }
  0x19   : > { %1908 = vset.pattern.permute.xlu2 %v2029_v2  ;;  %1913 = vrcp.f32 %v2030_v9  ;;  %s434_s17 = sand.u32 1, %s2019_s26   ;;  %s1861_s30 = sshll.u32 %s2125_s29, 5 }
  0x1a   : > { %s2914_s20 = smov (!%p438_p10, %s1770_s20), 3  ;;  %s1699_s22 = scalar_lea.hbm %s2884_s13, %s1861_s30 }
  0x1b   : > { %s1849_s24 = sshll.u32 %s2914_s20, 4  ;;  %s1687_s29 = scalar_lea.sflag [#allocation4], %s434_s17 }
  0x1c   : > { %s2174_s15 = scalar_lea.vmem %s2871_s0, %s1849_s24  ;;  %s1769_s24 = sshll.u32 %s434_s17, 5 }
  0x1d   : > { %v456_v0 = vld [vmem:[%s2892_s2] sm:$0xff]  ;;  %v457_v3 = vld [vmem:[%s2892_s2 + $0x8] sm:$0xff]  ;;  %v1799_v12 = vld [vmem:[%s2174_s15 + $0x10] sm:$0xff]  ;;  %s1702_s2 = sshll.u32 %s1699_s22, 4  ;;  %s1985_s16 = scalar_lea.hbm %s2884_s13, 64  ;;  %s1703_s2 = int_to_ptr.hbm [resolvable:$true] %s1702_s2 }
  0x1e   : > { %v454_v1 = vld [vmem:[%s2893_s1] sm:$0xff]  ;;  %527 = vperm.xlu1 %1907, %v456_v0   ;;  %v455_v4 = vld [vmem:[%s2893_s1 + $0x8] sm:$0xff]  ;;  %v1800_v15 = vld [vmem:[%s2174_s15 + $0x18] sm:$0xff]  ;;  %v924_v16 = vsel %vm468_vm0, %v1799_v12, 0.0  ;;  %s1979_s20 = sshra.s32 %s1703_s2, 4  ;;  %s1980_s20 = int_to_ptr.hbm [resolvable:$true] %s1979_s20 }
  0x1f   : > { %515 = vperm.xlu0 %1906, %v454_v1   ;;  %v466_v10 = vld [vmem:[%s2174_s15] sm:$0xff]  ;;  %v467_v11 = vld [vmem:[%s2174_s15 + $0x8] sm:$0xff]  ;;  %v925_v18 = vsel %vm468_vm0, %v1800_v15, 0.0  ;;  %v1914_v22 = vpop.eup %1913  ;;  %s1981_s23 = scalar_lea.hbm %s1980_s20, 32  ;;  %p1986_p0 = scmp.lt.s32.totalorder %s1980_s20, %s2884_s13 }
  0x20   : > { %v469_v13 = vsel %vm468_vm0, %v466_v10, 0.0  ;;  %v470_v14 = vsel %vm468_vm0, %v467_v11, 0.0  ;;  %v926_v19 = vadd.f32 %v925_v18, %v924_v16  ;;  %v479_v24 = vmul.f32 16.0, %v1914_v22  ;;  %p1982_p11 = scmp.ne.s32.totalorder %s1980_s20, %s1981_s23  ;;  %p1987_p1 = scmp.lt.s32.totalorder %s1985_s16, %s1981_s23 }
  0x21   : > { %v471_v17 = vadd.f32 %v470_v14, %v469_v13  ;;  %vm483_vm1 = vweird.f32 %v1914_v22 }
  0x22   : > { %v927_v21 = vrot.slane %v926_v19, 4  ;;  %v480_v27 = vsub.f32 1.0, %v479_v24  ;;  %p1983_p12 = pnand %p1982_p11, %p2142_p5  ;;  %p1988_p2 = por %p1987_p1, %p1986_p0 }
  0x23   : > { %v472_v20 = vrot.slane %v471_v17, 4 }
  0x24   : > { %v928_v25 = vadd.f32 %v927_v21, %v926_v19  ;;  %v481_v30 = vmul.f32 %v1914_v22, %v480_v27  ;;  %p1984_p13 = pneg %p1983_p12 }
  0x25   : > { %v473_v23 = vadd.f32 %v472_v20, %v471_v17 }
  0x26   : > { %532 = vperm.xlu1 %1907, %v457_v3   ;;  %v929_v28 = vrot.slane %v928_v25, 2  ;;  %v482_v33 = vadd.f32 %v1914_v22, %v481_v30  ;;  %v463_v30 = vld [vmem:[%s2875_s4 + $0x28] sm:$0xff]  ;;  %p1989_p3 = pnand %p1988_p2, %p1984_p13 }
  0x27   : > { %520 = vperm.xlu0 %1906, %v455_v4   ;;  %v474_v26 = vrot.slane %v473_v23, 2 }
  0x28   : > { %v930_v31 = vadd.f32 %v929_v28, %v928_v25  ;;  %v484_v36 = vsel %vm483_vm1, %v1914_v22, %v482_v33  ;;  %v462_v22 = vld [vmem:[%s2875_s4 + $0x20] sm:$0xff] }
  0x29   : > { %v475_v29 = vadd.f32 %v474_v26, %v473_v23  ;;  %560 = vperm.xlu2 %1908, %v462_v22  }
  0x2a   : > { %v931_v34 = vrot.slane %v930_v31, 1 }
  0x2b   : > { %v476_v32 = vrot.slane %v475_v29, 1 }
  0x2c   : > { %v932_v37 = vadd.f32 %v931_v34, %v930_v31 }
  0x2d   : > { %v477_v35 = vadd.f32 %v476_v32, %v475_v29 }
  0x2e   : > { %555 = vperm.xlu1 %1907, %v461_v5   ;;  %v933_v39 = vmul.f32 %v932_v37, %v484_v36 }
  0x2f   : > { %550 = vperm.xlu0 %1906, %v460_v6   ;;  %v485_v38 = vmul.f32 %v484_v36, %v477_v35 }
  0x30   : > { %v934_v42 = vsub.f32 %v1799_v12, %v933_v39  ;;  %v935_v43 = vsub.f32 %v1800_v15, %v933_v39 }
  0x31   : > { %v486_v40 = vsub.f32 %v466_v10, %v485_v38  ;;  %v487_v41 = vsub.f32 %v467_v11, %v485_v38  ;;  %565 = vperm.xlu2 %1908, %v463_v30  }
  0x32   : > { %v936_v46 = vmul.f32 %v934_v42, %v934_v42  ;;  %v937_v47 = vmul.f32 %v935_v43, %v935_v43 }
  0x33   : > { %v488_v44 = vmul.f32 %v486_v40, %v486_v40  ;;  %v489_v45 = vmul.f32 %v487_v41, %v487_v41 }
  0x34   : > { %v938_v50 = vsel %vm468_vm0, %v936_v46, 0.0  ;;  %v939_v51 = vsel %vm468_vm0, %v937_v47, 0.0 }
  0x35   : > { %v490_v48 = vsel %vm468_vm0, %v488_v44, 0.0  ;;  %v491_v49 = vsel %vm468_vm0, %v489_v45, 0.0  ;;  %v940_v53 = vadd.f32 %v939_v51, %v938_v50  ;;  %v1852_v44 = vld [vmem:[%s2874_s3 + $0x10] sm:$0xff] }
  0x36   : > { %886 = vperm.xlu1 %1907, %v464_v7   ;;  %v492_v52 = vadd.f32 %v491_v49, %v490_v48 }
  0x37   : > { %545 = vperm.xlu0 %1906, %v459_v8   ;;  %v941_v55 = vrot.slane %v940_v53, 4 }
  0x38   : > { %v493_v54 = vrot.slane %v492_v52, 4 }
  0x39   : > { %v942_v57 = vadd.f32 %v941_v55, %v940_v53 }
  0x3a   : > { %v494_v56 = vadd.f32 %v493_v54, %v492_v52 }
  0x3b   : > { %v943_v59 = vrot.slane %v942_v57, 2 }
  0x3c   : > { %v495_v58 = vrot.slane %v494_v56, 2 }
  0x3d   : > { %v944_v61 = vadd.f32 %v943_v59, %v942_v57 }
  0x3e   : > { %v496_v60 = vadd.f32 %v495_v58, %v494_v56 }
  0x3f   : > { %v945_v63 = vrot.slane %v944_v61, 1 }
  0x40   : > { %v497_v62 = vrot.slane %v496_v60, 1 }
  0x41   : > { %v946_v1 = vadd.f32 %v945_v63, %v944_v61 }
  0x42   : > { %v498_v0 = vadd.f32 %v497_v62, %v496_v60 }
  0x43   : > { %v947_v3 = vmul.f32 %v946_v1, %v484_v36 }
  0x44   : > { %v499_v2 = vmul.f32 %v498_v0, %v484_v36 }
  0x45   : > { %v948_v5 = vadd.f32 1e-05, %v947_v3 }
  0x46   : > { %v500_v4 = vadd.f32 1e-05, %v499_v2 }
  0x47   : > { %vm955_vm4 = vweird.f32 %v948_v5 }
  0x48   : > { %1915 = vrsqrt.f32 %v500_v4  ;;  %vm507_vm2 = vweird.f32 %v500_v4 }
  0x49   : > { %1917 = vrsqrt.f32 %v948_v5 }
  0x4e   : > { %v1916_v6 = vpop.eup %1915 }
  0x4f   : > { %v1918_v7 = vpop.eup %1917  ;;  %v502_v8 = vmul.f32 %v1916_v6, %v500_v4  ;;  %vm508_vm3 = vweird.f32 %v1916_v6 }
  0x50   : > { %v950_v9 = vmul.f32 %v1918_v7, %v948_v5  ;;  %vm956_vm5 = vweird.f32 %v1918_v7  ;;  %vm509_vm6 = vmor %vm507_vm2, %vm508_vm3 }
  0x51   : > { %v503_v10 = vmul.f32 %v1916_v6, %v502_v8  ;;  %vm957_vm7 = vmor %vm955_vm4, %vm956_vm5 }
  0x52   : > { %v951_v11 = vmul.f32 %v1918_v7, %v950_v9 }
  0x53   : > { %v504_v12 = vmul.f32 0.5, %v503_v10 }
  0x54   : > { %v952_v13 = vmul.f32 0.5, %v951_v11 }
  0x55   : > { %v505_v14 = vsub.f32 1.5, %v504_v12 }
  0x56   : > { %v953_v15 = vsub.f32 1.5, %v952_v13 }
  0x57   : > { %v506_v16 = vmul.f32 %v1916_v6, %v505_v14 }
  0x58   : > { %v954_v17 = vmul.f32 %v1918_v7, %v953_v15 }
  0x59   : > { %v510_v20 = vsel %vm509_vm6, %v1916_v6, %v506_v16 }
  0x5a   : > { %v958_v21 = vsel %vm957_vm7, %v1918_v7, %v954_v17  ;;  %v511_v23 = vmul.f32 %v510_v20, %v486_v40  ;;  %v512_v25 = vmul.f32 %v510_v20, %v487_v41  ;;  %v1850_v40 = vld [vmem:[%s2874_s3] sm:$0xff] }
  0x5b   : > { %v959_v24 = vmul.f32 %v958_v21, %v934_v42  ;;  %v960_v26 = vmul.f32 %v958_v21, %v935_v43  ;;  %v458_v41 = vld [vmem:[%s2875_s4] sm:$0xff]  ;;  %v465_v42 = vld [vmem:[%s2877_s6 + $0x8] sm:$0xff] }
  0x5c   : > { %540 = vperm.xlu2 %1908, %v458_v41   ;;  %v1851_v43 = vld [vmem:[%s2874_s3 + $0x8] sm:$0xff] }
  0x64   : > { %891 = vperm.xlu2 %1908, %v465_v42  }
  0x83   : > { %v2215_v45 = vpop.permute.xlu2 %560 }
  0x8b   : > { %v2217_v46 = vpop.permute.xlu2 %565 }
  0x90   : > { %v528_v18 = vpop.permute.xlu1 %527 }
  0x91   : > { %v516_v19 = vpop.permute.xlu0 %515 }
  0x92   : > { %v523_v27 = vmul.f32 %v516_v19, %v511_v23  ;;  %v961_v28 = vmul.f32 %v959_v24, %v516_v19 }
  0x94   : > { %v535_v34 = vadd.f32 %v528_v18, %v523_v27  ;;  %v963_v36 = vadd.f32 %v961_v28, %v528_v18 }
  0x98   : > { %v533_v33 = vpop.permute.xlu1 %532 }
  0x99   : > { %v521_v29 = vpop.permute.xlu0 %520 }
  0x9a   : > { %v524_v31 = vmul.f32 %v521_v29, %v512_v25  ;;  %v962_v32 = vmul.f32 %v960_v26, %v521_v29 }
  0x9c   : > { %v536_v35 = vadd.f32 %v533_v33, %v524_v31  ;;  %v964_v37 = vadd.f32 %v962_v32, %v533_v33 }
  0x9e   : > { %v537_v38 = vpack.c.bf16 %v536_v35, %v535_v34  ;;  %v965_v39 = vpack.c.bf16 %v964_v37, %v963_v36 }
  0xa0   : > { %600 = vmatpush.bf16.msra.mxu0 %v537_v38  ;;  %973 = vmatpush.bf16.msra.mxu2 %v965_v39  ;;  %v556_v29 = vpop.permute.xlu1 %555 }
  0xa1   : > { %v551_v47 = vpop.permute.xlu0 %550 }
  0xa3   : > { %1785 = vmatmul.msk.bf16.vlgmr.msra.gmra.mxu0 %vm583_vm8, %v1850_v40  ;;  %1801 = vmatmul.msk.bf16.vlgmr.msra.gmra.mxu2 %vm583_vm8, %v1850_v40 }
  0xa9   : > { %v546_v56 = vpop.permute.xlu0 %545 }
  0xb3   : > { %1786 = vmatmul.msk.bf16.gmra.mxu0 %vm583_vm8, %v1851_v43  ;;  %1802 = vmatmul.msk.bf16.gmra.mxu2 %vm583_vm8, %v1851_v43 }
  0xb6   : > { %v541_v48 = vpop.permute.xlu2 %540 }
  0xc3   : > { %1787 = vmatmul.msk.bf16.gmra.mxu0 %vm583_vm8, %v1852_v44  ;;  %1803 = vmatmul.msk.bf16.gmra.mxu2 %vm583_vm8, %v1852_v44 }
 0x120   : > { %v602_v49 = vpop.f32.mrf.mxu0 }
 0x121   : > { %v2219_v50 = vadd.f32 %v602_v49, %v541_v48 }
 0x123   : > { %v2222_v51 = vmul.f32 0.70710677, %v2219_v50 }
 0x125   : > { %v629_v52 = vmul.f32 %v2222_v51, %v2222_v51 }
 0x126   : > { %v975_v53 = vpop.f32.mrf.mxu2 }
 0x127   : > { %v2226_v54 = vmin.f32 %v629_v52, 16.0  ;;  %v2228_v55 = vadd.f32 %v975_v53, %v541_v48 }
 0x128   : > { %v604_v57 = vpop.f32.mrf.mxu0 }
 0x129   : > { %2894 = vst [vmem:[#allocation7_spill] sm:$0xff] %v2228_v55  ;;  %v631_v58 = vmul.f32 2.1237322e-06, %v2226_v54  ;;  %v2232_v59 = vmul.f32 0.70710677, %v2228_v55  ;;  %v2234_v60 = vadd.f32 %v604_v57, %v546_v56 }
 0x12a   : > { %v642_v2 = vmul.f32 3.8918573e-05, %v2226_v54 }
 0x12b   : > { %v1002_v61 = vmul.f32 %v2232_v59, %v2232_v59  ;;  %v2239_v62 = vmul.f32 0.70710677, %v2234_v60  ;;  %v632_v63 = vadd.f32 0.00028619796, %v631_v58 }
 0x12c   : > { %v643_v10 = vadd.f32 0.001143296, %v642_v2  ;;  %v2302_v2 = vmul.f32 0.5, %v2219_v50 }
 0x12d   : > { %v2241_v0 = vmin.f32 %v1002_v61, 16.0  ;;  %v669_v1 = vmul.f32 %v2239_v62, %v2239_v62  ;;  %v633_v6 = vmul.f32 %v632_v63, %v2226_v54 }
 0x12e   : > { %v977_v3 = vpop.f32.mrf.mxu2  ;;  %v644_v19 = vmul.f32 %v643_v10, %v2226_v54 }
 0x12f   : > { %v2246_v4 = vmin.f32 %v669_v1, 16.0  ;;  %v2248_v5 = vadd.f32 %v977_v3, %v546_v56  ;;  %v1004_v7 = vmul.f32 2.1237322e-06, %v2241_v0  ;;  %v634_v14 = vadd.f32 0.0036580483, %v633_v6 }
 0x130   : > { %v607_v8 = vpop.f32.mrf.mxu0  ;;  %v645_v30 = vadd.f32 0.014752088, %v644_v19 }
 0x131   : > { %2895 = vst [vmem:[#allocation8_spill] sm:$0xff] %v2248_v5  ;;  %v671_v9 = vmul.f32 2.1237322e-06, %v2246_v4  ;;  %v2254_v11 = vmul.f32 0.70710677, %v2248_v5  ;;  %v2256_v12 = vadd.f32 %v607_v8, %v551_v47  ;;  %v635_v24 = vmul.f32 %v634_v14, %v2226_v54 }
 0x132   : > { %v1005_v15 = vadd.f32 0.00028619796, %v1004_v7  ;;  %v646_v43 = vmul.f32 %v645_v30, %v2226_v54 }
 0x133   : > { %v672_v13 = vadd.f32 0.00028619796, %v671_v9  ;;  %v1042_v16 = vmul.f32 %v2254_v11, %v2254_v11  ;;  %v2261_v17 = vmul.f32 0.70710677, %v2256_v12  ;;  %v636_v35 = vadd.f32 0.05243302, %v635_v24 }
 0x134   : > { %v1006_v25 = vmul.f32 %v1005_v15, %v2241_v0  ;;  %v647_v1 = vadd.f32 0.112945676, %v646_v43  ;;  %v2328_v30 = vmul.f32 0.5, %v2256_v12 }
 0x135   : > { %v673_v18 = vmul.f32 %v672_v13, %v2246_v4  ;;  %v2265_v20 = vmin.f32 %v1042_v16, 16.0  ;;  %v709_v21 = vmul.f32 %v2261_v17, %v2261_v17  ;;  %v637_v48 = vmul.f32 %v636_v35, %v2226_v54 }
 0x136   : > { %v980_v22 = vpop.f32.mrf.mxu2  ;;  %v1007_v36 = vadd.f32 0.0036580483, %v1006_v25 }
 0x137   : > { %v2269_v23 = vadd.f32 %v980_v22, %v551_v47  ;;  %v674_v26 = vadd.f32 0.0036580483, %v673_v18  ;;  %v2273_v27 = vmin.f32 %v709_v21, 16.0  ;;  %v1044_v31 = vmul.f32 2.1237322e-06, %v2265_v20 }
 0x138   : > { %v609_v28 = vpop.f32.mrf.mxu0  ;;  %v1008_v49 = vmul.f32 %v1007_v36, %v2241_v0  ;;  %v638_v7 = vadd.f32 0.18741608, %v637_v48  ;;  %v648_v21 = vmul.f32 %v647_v1, %v2226_v54  ;;  %v2318_v22 = vmul.f32 0.5, %v2234_v60 }
 0x139   : > { %v711_v32 = vmul.f32 2.1237322e-06, %v2273_v27  ;;  %v2278_v33 = vmul.f32 0.70710677, %v2269_v23  ;;  %v610_v34 = vadd.f32 %v609_v28, %v556_v29  ;;  %v675_v37 = vmul.f32 %v674_v26, %v2246_v4 }
 0x13a   : > { %v1045_v41 = vadd.f32 0.00028619796, %v1044_v31  ;;  %v1009_v8 = vadd.f32 0.05243302, %v1008_v49  ;;  %v722_v19 = vmul.f32 3.8918573e-05, %v2273_v27  ;;  %v639_v28 = vmul.f32 %v638_v7, %v2226_v54 }
 0x13b   : > { %v712_v38 = vadd.f32 0.00028619796, %v711_v32  ;;  %v1082_v39 = vmul.f32 %v2278_v33, %v2278_v33  ;;  %v2283_v40 = vmul.f32 0.70710677, %v610_v34  ;;  %v676_v52 = vadd.f32 0.05243302, %v675_v37 }
 0x13c   : > { %v1046_v61 = vmul.f32 %v1045_v41, %v2265_v20  ;;  %v1010_v60 = vmul.f32 %v1009_v8, %v2241_v0  ;;  %v2340_v41 = vadd.f32 0.4994258, %v648_v21  ;;  %v640_v48 = vadd.f32 1.1283791, %v639_v28 }
 0x13d   : > { %v749_v44 = vmul.f32 %v2283_v40, %v2283_v40  ;;  %v713_v53 = vmul.f32 %v712_v38, %v2273_v27  ;;  %v2293_v57 = vmin.f32 %v1082_v39, 16.0  ;;  %v677_v9 = vmul.f32 %v676_v52, %v2246_v4 }
 0x13e   : > { %v982_v42 = vpop.f32.mrf.mxu2  ;;  %v1047_v16 = vadd.f32 0.0036580483, %v1046_v61  ;;  %v723_v39 = vadd.f32 0.001143296, %v722_v19 }
 0x13f   : > { %v2288_v47 = vadd.f32 %v982_v42, %v556_v29  ;;  %v2295_v58 = vmin.f32 %v749_v44, 16.0  ;;  %v714_v10 = vadd.f32 0.0036580483, %v713_v53  ;;  %v1084_v13 = vmul.f32 2.1237322e-06, %v2293_v57 }
 0x140   : > { %v612_v56 = vpop.f32.mrf.mxu0  ;;  %v678_v29 = vadd.f32 0.18741608, %v677_v9  ;;  %v2349_v53 = vmul.f32 0.5, %v610_v34 }
 0x141   : > { %v2299_v63 = vmul.f32 0.70710677, %v2288_v47  ;;  %v751_v3 = vmul.f32 2.1237322e-06, %v2295_v58  ;;  %v2306_v6 = vadd.f32 %v612_v56, %v2215_v45  ;;  %v715_v31 = vmul.f32 %v714_v10, %v2273_v27 }
 0x142   : > { %v1085_v35 = vadd.f32 0.00028619796, %v1084_v13  ;;  %v679_v49 = vmul.f32 %v678_v29, %v2246_v4  ;;  %v1011_v56 = vadd.f32 0.18741608, %v1010_v60  ;;  %v724_v13 = vmul.f32 %v723_v39, %v2273_v27 }
 0x143   : > { %v752_v14 = vadd.f32 0.00028619796, %v751_v3  ;;  %v2311_v15 = vmul.f32 0.70710677, %v2306_v6  ;;  %v1122_v50 = vmul.f32 %v2299_v63, %v2299_v63  ;;  %v716_v52 = vadd.f32 0.05243302, %v715_v31 }
 0x144   : > { %v1086_v61 = vmul.f32 %v1085_v35, %v2293_v57  ;;  %v725_v35 = vadd.f32 0.014752088, %v724_v13 }
 0x145   : > { %v753_v24 = vmul.f32 %v752_v14, %v2295_v58  ;;  %v789_v25 = vmul.f32 %v2311_v15, %v2311_v15  ;;  %v2338_v38 = vmin.f32 %v1122_v50, 16.0  ;;  %v717_v19 = vmul.f32 %v716_v52, %v2273_v27 }
 0x146   : > { %v985_v18 = vpop.f32.mrf.mxu2  ;;  %v1087_v28 = vadd.f32 0.0036580483, %v1086_v61 }
 0x147   : > { %v2324_v26 = vadd.f32 %v985_v18, %v2215_v45  ;;  %v2332_v36 = vmin.f32 %v789_v25, 16.0  ;;  %v1048_v45 = vmul.f32 %v1047_v16, %v2265_v20  ;;  %v754_v12 = vadd.f32 0.0036580483, %v753_v24 }
 0x148   : > { %v614_v32 = vpop.f32.mrf.mxu0  ;;  %v1124_v8 = vmul.f32 2.1237322e-06, %v2338_v38  ;;  %v2365_v18 = vadd.f32 1.1283791, %v679_v49  ;;  %v2372_v25 = vmul.f32 %v640_v48, %v2222_v51  ;;  %v1088_v52 = vmul.f32 %v1087_v28, %v2293_v57 }
 0x149   : > { %v2335_v37 = vmul.f32 0.70710677, %v2324_v26  ;;  %v791_v42 = vmul.f32 2.1237322e-06, %v2332_v36  ;;  %v2346_v44 = vadd.f32 %v614_v32, %v2217_v46  ;;  %v1049_v7 = vadd.f32 0.05243302, %v1048_v45 }
 0x14a   : > { %v755_v14 = vmul.f32 %v754_v12, %v2295_v58  ;;  %v802_v24 = vmul.f32 3.8918573e-05, %v2332_v36  ;;  %v2375_v32 = vmul.f32 %v1011_v56, %v2241_v0 }
 0x14b   : > { %v1162_v43 = vmul.f32 %v2335_v37, %v2335_v37  ;;  %v792_v1 = vadd.f32 0.00028619796, %v791_v42  ;;  %v2356_v9 = vmul.f32 0.70710677, %v2346_v44  ;;  %v2385_v51 = vmul.f32 %v1049_v7, %v2265_v20 }
 0x14c   : > { %v756_v45 = vadd.f32 0.05243302, %v755_v14  ;;  %v803_v49 = vadd.f32 0.001143296, %v802_v24 }
 0x14d   : > { %v2352_v3 = vmin.f32 %v1162_v43, 16.0  ;;  %v793_v34 = vmul.f32 %v792_v1, %v2332_v36  ;;  %v829_v21 = vmul.f32 %v2356_v9, %v2356_v9  ;;  %v718_v43 = vadd.f32 0.18741608, %v717_v19 }
 0x14e   : > { %v987_v10 = vpop.f32.mrf.mxu2  ;;  %v804_v13 = vmul.f32 %v803_v49, %v2332_v36  ;;  %v757_v7 = vmul.f32 %v756_v45, %v2295_v58  ;;  %v726_v19 = vmul.f32 %v725_v35, %v2273_v27 }
 0x14f   : > { %v1164_v16 = vmul.f32 2.1237322e-06, %v2352_v3  ;;  %v2363_v50 = vadd.f32 %v987_v10, %v2217_v46  ;;  %v794_v29 = vadd.f32 0.0036580483, %v793_v34  ;;  %v1125_v46 = vadd.f32 0.00028619796, %v1124_v8 }
 0x150   : > { %v2377_v60 = vmin.f32 %v829_v21, 16.0  ;;  %v719_v21 = vmul.f32 %v718_v43, %v2273_v27  ;;  %v805_v28 = vadd.f32 0.014752088, %v804_v13  ;;  %v727_v5 = vadd.f32 0.112945676, %v726_v19 }
 0x151   : > { %v1165_v31 = vadd.f32 0.00028619796, %v1164_v16  ;;  %v795_v39 = vmul.f32 %v794_v29, %v2332_v36  ;;  %v2382_v42 = vmul.f32 0.70710677, %v2363_v50  ;;  %v1126_v8 = vmul.f32 %v1125_v46, %v2338_v38 }
 0x152   : > { %v831_v48 = vmul.f32 2.1237322e-06, %v2377_v60  ;;  %v842_v14 = vmul.f32 3.8918573e-05, %v2377_v60  ;;  %v806_v49 = vmul.f32 %v805_v28, %v2332_v36 }
 0x153   : > { %v1166_v12 = vmul.f32 %v1165_v31, %v2352_v3  ;;  %v796_v56 = vadd.f32 0.05243302, %v795_v39  ;;  %v1202_v1 = vmul.f32 %v2382_v42, %v2382_v42  ;;  %v1089_v31 = vadd.f32 0.05243302, %v1088_v52 }
 0x154   : > { %v832_v10 = vadd.f32 0.00028619796, %v831_v48  ;;  %v843_v29 = vadd.f32 0.001143296, %v842_v14  ;;  %v1127_v48 = vadd.f32 0.0036580483, %v1126_v8  ;;  %v728_v8 = vmul.f32 %v727_v5, %v2273_v27 }
 0x155   : > { %v1167_v61 = vadd.f32 0.0036580483, %v1166_v12  ;;  %v2396_v16 = vmin.f32 %v1202_v1, 16.0  ;;  %v797_v46 = vmul.f32 %v796_v56, %v2332_v36  ;;  %v758_v1 = vadd.f32 0.18741608, %v757_v7 }
 0x156   : > { %v833_v24 = vmul.f32 %v832_v10, %v2377_v60  ;;  %v720_v10 = vadd.f32 1.1283791, %v719_v21  ;;  %v807_v52 = vadd.f32 0.112945676, %v806_v49  ;;  %v1128_v21 = vmul.f32 %v1127_v48, %v2338_v38 }
 0x157   : > { %v1168_v34 = vmul.f32 %v1167_v61, %v2352_v3  ;;  %v1204_v12 = vmul.f32 2.1237322e-06, %v2396_v16  ;;  %v844_v61 = vmul.f32 %v843_v29, %v2377_v60  ;;  %v798_v56 = vadd.f32 0.18741608, %v797_v46 }
 0x158   : > { %v834_v45 = vadd.f32 0.0036580483, %v833_v24  ;;  %v808_v28 = vmul.f32 %v807_v52, %v2332_v36  ;;  %v762_v29 = vmul.f32 3.8918573e-05, %v2295_v58  ;;  %v759_v19 = vmul.f32 %v758_v1, %v2295_v58 }
 0x159   : > { %v1169_v39 = vadd.f32 0.05243302, %v1168_v34  ;;  %v1205_v43 = vadd.f32 0.00028619796, %v1204_v12  ;;  %v845_v14 = vadd.f32 0.014752088, %v844_v61  ;;  %v799_v5 = vmul.f32 %v798_v56, %v2332_v36 }
 0x15a   : > { %v835_v13 = vmul.f32 %v834_v45, %v2377_v60  ;;  %v729_v12 = vadd.f32 0.4994258, %v728_v8  ;;  %v809_v45 = vadd.f32 0.4994258, %v808_v28  ;;  %v763_v61 = vadd.f32 0.001143296, %v762_v29 }
 0x15b   : > { %v1170_v35 = vmul.f32 %v1169_v39, %v2352_v3  ;;  %v1206_v55 = vmul.f32 %v1205_v43, %v2396_v16  ;;  %v846_v7 = vmul.f32 %v845_v14, %v2377_v60  ;;  %v1175_v48 = vmul.f32 3.8918573e-05, %v2352_v3 }
 0x15c   : > { %v836_v24 = vadd.f32 0.05243302, %v835_v13  ;;  %v730_v13 = vmul.f32 %v729_v12, %v2273_v27  ;;  %v810_v52 = vmul.f32 %v809_v45, %v2332_v36  ;;  %v2425_v14 = vmul.f32 %v2365_v18, %v2239_v62 }
 0x15d   : > { %v1171_v34 = vadd.f32 0.18741608, %v1170_v35  ;;  %v1207_v39 = vadd.f32 0.0036580483, %v1206_v55  ;;  %v847_v49 = vadd.f32 0.112945676, %v846_v7  ;;  %v764_v55 = vmul.f32 %v763_v61, %v2295_v58 }
 0x15e   : > { %v837_v46 = vmul.f32 %v836_v24, %v2377_v60  ;;  %v1129_v8 = vadd.f32 0.05243302, %v1128_v21  ;;  %v2427_v24 = vadd.f32 1.0, %v730_v13  ;;  %v2430_v28 = vadd.f32 1.0, %v810_v52 }
 0x15f   : > { %v1172_v35 = vmul.f32 %v1171_v34, %v2352_v3  ;;  %v1208_v43 = vmul.f32 %v1207_v39, %v2396_v16  ;;  %v848_v1 = vmul.f32 %v847_v49, %v2377_v60  ;;  %v1090_v34 = vmul.f32 %v1089_v31, %v2293_v57 }
 0x160   : > { %v838_v56 = vadd.f32 0.18741608, %v837_v46  ;;  %v765_v36 = vadd.f32 0.014752088, %v764_v55  ;;  %v760_v7 = vadd.f32 1.1283791, %v759_v19  ;;  %1919 = vrcp.f32 %v2427_v24 }
 0x161   : > { %v849_v27 = vadd.f32 0.4994258, %v848_v1  ;;  %v800_v29 = vadd.f32 1.1283791, %v799_v5  ;;  %v1209_v39 = vadd.f32 0.05243302, %v1208_v43  ;;  %1921 = vrcp.f32 %v2430_v28 }
 0x162   : > { %v2434_v12 = vmul.f32 0.5, %v2306_v6  ;;  %v1173_v62 = vadd.f32 1.1283791, %v1172_v35  ;;  %v1176_v18 = vadd.f32 0.001143296, %v1175_v48  ;;  %v2438_v21 = vmul.f32 %v720_v10, %v2261_v17 }
 0x163   : > { %v2441_v31 = vmul.f32 0.5, %v2346_v44  ;;  %v839_v46 = vmul.f32 %v838_v56, %v2377_v60  ;;  %v850_v19 = vmul.f32 %v849_v27, %v2377_v60  ;;  %v2445_v45 = vadd.f32 0.18741608, %v1090_v34 }
 0x164   : > { %v2448_v49 = vmul.f32 %v1129_v8, %v2338_v38  ;;  %v766_v6 = vmul.f32 %v765_v36, %v2295_v58  ;;  %v650_v61 = vmul.f32 %v2340_v41, %v2226_v54  ;;  %v2454_v17 = vmul.f32 %v760_v7, %v2283_v40 }
 0x165   : > { %v801_v44 = vmul.f32 %v800_v29, %v2311_v15  ;;  %v1210_v10 = vmul.f32 %v1209_v39, %v2396_v16  ;;  %v2458_v5 = vadd.f32 1.0, %v850_v19  ;;  %v2461_v60 = vmul.f32 %v1173_v62, %v2335_v37 }
 0x166   : > { %v741_v35 = vand.u32 2147483647, %v2427_v24  ;;  %v767_v43 = vadd.f32 0.112945676, %v766_v6  ;;  %v1177_v13 = vmul.f32 %v1176_v18, %v2352_v3  ;;  %v1920_v52 = vpop.eup %1919  ;;  %v840_v1 = vadd.f32 1.1283791, %v839_v46 }
 0x167   : > { %1923 = vrcp.f32 %v2458_v5  ;;  %vm737_vm9 = vweird.f32 %v2427_v24  ;;  %v1215_v54 = vmul.f32 3.8918573e-05, %v2396_v16  ;;  %v1922_v40 = vpop.eup %1921  ;;  %vm817_vm10 = vweird.f32 %v2430_v28 }
 0x168   : > { %v733_v15 = vmul.f32 %v1920_v52, %v2427_v24  ;;  %v768_v37 = vmul.f32 %v767_v43, %v2295_v58  ;;  %v2471_v41 = vadd.f32 1.0, %v650_v61  ;;  %v1211_v55 = vadd.f32 0.18741608, %v1210_v10 }
 0x169   : > { %v813_v48 = vmul.f32 %v1922_v40, %v2430_v28  ;;  %v821_v8 = vand.u32 2147483647, %v2430_v28  ;;  %v823_v56 = vand.u32 2147483648, %v2430_v28  ;;  %vm2476_vm11 = vcmp.eq.f32.partialorder %v741_v35, 8.507059e+37 }
 0x16a   : > { %v734_v34 = vsub.f32 1.0, %v733_v15  ;;  %v769_v36 = vadd.f32 0.4994258, %v768_v37  ;;  %v1178_v7 = vadd.f32 0.014752088, %v1177_v13  ;;  %vm738_vm12 = vweird.f32 %v1920_v52 }
 0x16b   : > { %v814_v29 = vsub.f32 1.0, %v813_v48  ;;  %v743_v39 = vand.u32 2147483648, %v2427_v24  ;;  %v1216_v62 = vadd.f32 0.001143296, %v1215_v54  ;;  %1925 = vrcp.f32 %v2471_v41  ;;  %vm739_vm14 = vmor %vm737_vm9, %vm738_vm12 }
 0x16c   : > { %v735_v18 = vmul.f32 %v1920_v52, %v734_v34  ;;  %v770_v46 = vmul.f32 %v769_v36, %v2295_v58  ;;  %v1179_v19 = vmul.f32 %v1178_v7, %v2352_v3  ;;  %v841_v61 = vmul.f32 %v840_v1, %v2356_v9 }
 0x16d   : > { %v1924_v6 = vpop.eup %1923  ;;  %v815_v10 = vmul.f32 %v1922_v40, %v814_v29  ;;  %vm818_vm13 = vweird.f32 %v1922_v40  ;;  %v1217_v35 = vmul.f32 %v1216_v62, %v2396_v16  ;;  %v824_v43 = vor.u32 1.1754944e-38, %v823_v56 }
 0x16e   : > { %v853_v13 = vmul.f32 %v1924_v6, %v2458_v5  ;;  %v736_v15 = vadd.f32 %v1920_v52, %v735_v18  ;;  %v2487_v37 = vadd.f32 1.0, %v770_v46  ;;  %v744_v58 = vor.u32 1.1754944e-38, %v743_v39  ;;  %vm819_vm15 = vmor %vm817_vm10, %vm818_vm13 }
 0x16f   : > { %v816_v54 = vadd.f32 %v1922_v40, %v815_v10  ;;  %v1180_v48 = vadd.f32 0.112945676, %v1179_v19  ;;  %v1218_v34 = vadd.f32 0.014752088, %v1217_v35  ;;  %v863_v1 = vand.u32 2147483648, %v2458_v5 }
 0x170   : > { %v854_v9 = vsub.f32 1.0, %v853_v13  ;;  %v740_v56 = vsel %vm739_vm14, %v1920_v52, %v736_v15  ;;  %1927 = vrcp.f32 %v2487_v37  ;;  %vm822_vm1 = vcmp.eq.f32.partialorder %v821_v8, 8.507059e+37 }
 0x171   : > { %v820_v36 = vsel %vm819_vm15, %v1922_v40, %v816_v54  ;;  %v861_v7 = vand.u32 2147483647, %v2458_v5  ;;  %v745_v24 = vsel %vm2476_vm11, %v744_v58, %v740_v56  ;;  %v2499_v29 = vpop.eup %1925  ;;  %vm858_vm2 = vweird.f32 %v1924_v6 }
 0x172   : > { %v825_v39 = vsel %vm822_vm1, %v824_v43, %v820_v36  ;;  %v855_v62 = vmul.f32 %v1924_v6, %v854_v9  ;;  %v1181_v28 = vmul.f32 %v1180_v48, %v2352_v3  ;;  %v1212_v18 = vmul.f32 %v1211_v55, %v2396_v16 }
 0x173   : > { %v826_v46 = vmul.f32 %v825_v39, %v801_v44  ;;  %vm857_vm3 = vweird.f32 %v2458_v5  ;;  %v1219_v52 = vmul.f32 %v1218_v34, %v2396_v16  ;;  %v864_v8 = vor.u32 1.1754944e-38, %v863_v1 }
 0x174   : > { %v856_v40 = vadd.f32 %v1924_v6, %v855_v62  ;;  %v746_v19 = vmul.f32 %v745_v24, %v2438_v21  ;;  %v1182_v27 = vadd.f32 0.4994258, %v1181_v28  ;;  %vm859_vm4 = vmor %vm857_vm3, %vm858_vm2  ;;  %v653_v43 = vmul.f32 %v2499_v29, %v2471_v41 }
 0x175   : > { %v1792_v10 = vclamps-f32 %v826_v46, 1.0  ;;  %v1220_v35 = vadd.f32 0.112945676, %v1219_v52  ;;  %v682_v13 = vmul.f32 3.8918573e-05, %v2246_v4  ;;  %vm862_vm5 = vcmp.eq.f32.partialorder %v861_v7, 8.507059e+37 }
 0x176   : > { %v1928_v15 = vpop.eup %1927  ;;  %v860_v55 = vsel %vm859_vm4, %v1924_v6, %v856_v40  ;;  %v781_v44 = vand.u32 2147483647, %v2487_v37  ;;  %v1183_v5 = vmul.f32 %v1182_v27, %v2352_v3  ;;  %v1213_v54 = vadd.f32 1.1283791, %v1212_v18 }
 0x177   : > { %v865_v58 = vsel %vm862_vm5, %v864_v8, %v860_v55  ;;  %v773_v21 = vmul.f32 %v1928_v15, %v2487_v37  ;;  %v783_v48 = vand.u32 2147483648, %v2487_v37  ;;  %v1790_v9 = vclamps-f32 %v746_v19, 1.0 }
 0x178   : > { %v866_v34 = vmul.f32 %v865_v58, %v841_v61  ;;  %v2513_v1 = vadd.f32 1.0, %v1183_v5  ;;  %v1221_v56 = vmul.f32 %v1220_v35, %v2396_v16  ;;  %v873_v36 = vadd.f32 1.0, %v1792_v10 }
 0x179   : > { %v774_v24 = vsub.f32 1.0, %v773_v21  ;;  %v654_v6 = vsub.f32 1.0, %v653_v43  ;;  %v683_v7 = vadd.f32 0.001143296, %v682_v13  ;;  %vm777_vm6 = vweird.f32 %v2487_v37 }
 0x17a   : > { %v1793_v39 = vclamps-f32 %v866_v34, 1.0  ;;  %vm2517_vm7 = vcmp.eq.f32.partialorder %v781_v44, 8.507059e+37  ;;  %1929 = vrcp.f32 %v2513_v1  ;;  %vm778_vm8 = vweird.f32 %v1928_v15 }
 0x17b   : > { %v775_v62 = vmul.f32 %v1928_v15, %v774_v24  ;;  %v784_v61 = vor.u32 1.1754944e-38, %v783_v48  ;;  %v1222_v28 = vadd.f32 0.4994258, %v1221_v56  ;;  %v871_v46 = vadd.f32 1.0, %v1790_v9  ;;  %vm779_vm9 = vmor %vm777_vm6, %vm778_vm8 }
 0x17c   : > { %v874_v18 = vadd.f32 1.0, %v1793_v39  ;;  %v684_v52 = vmul.f32 %v683_v7, %v2246_v4  ;;  %v1095_v40 = vmul.f32 3.8918573e-05, %v2293_v57  ;;  %v879_v8 = vmul.f32 %v873_v36, %v2434_v12 }
 0x17d   : > { %v776_v19 = vadd.f32 %v1928_v15, %v775_v62  ;;  %v1223_v27 = vmul.f32 %v1222_v28, %v2396_v16  ;;  %v655_v10 = vmul.f32 %v2499_v29, %v654_v6  ;;  %v1194_v43 = vand.u32 2147483647, %v2513_v1 }
 0x17e   : > { %v880_v35 = vmul.f32 %v874_v18, %v2441_v31  ;;  %v685_v13 = vadd.f32 0.014752088, %v684_v52  ;;  %v1096_v55 = vadd.f32 0.001143296, %v1095_v40  ;;  %v1196_v5 = vand.u32 2147483648, %v2513_v1 }
 0x17f   : > { %v780_v44 = vsel %vm779_vm9, %v1928_v15, %v776_v19  ;;  %v2532_v58 = vadd.f32 1.0, %v1223_v27  ;;  %v1135_v12 = vmul.f32 3.8918573e-05, %v2338_v38  ;;  %v2540_v34 = vmul.f32 %v1213_v54, %v2382_v42 }
 0x180   : > { %v1930_v21 = vpop.eup %1929  ;;  %v883_v16 = vpack.c.bf16 %v880_v35, %v879_v8  ;;  %v785_v48 = vsel %vm2517_vm7, %v784_v61, %v780_v44  ;;  %v686_v31 = vmul.f32 %v685_v13, %v2246_v4  ;;  %v1097_v37 = vmul.f32 %v1096_v55, %v2293_v57 }
 0x181   : > { %v786_v15 = vmul.f32 %v785_v48, %v2454_v17  ;;  %v1186_v9 = vmul.f32 %v1930_v21, %v2513_v1  ;;  %1931 = vrcp.f32 %v2532_v58  ;;  %v877_v56 = vmul.f32 %v871_v46, %v2328_v30 }
 0x182   : > { %908 = vmatpush.bf16.msra.mxu1 %v883_v16  ;;  %vm1190_vm10 = vweird.f32 %v2513_v1  ;;  %v2548_v36 = vadd.f32 %v2499_v29, %v655_v10  ;;  %vm658_vm11 = vweird.f32 %v2499_v29  ;;  %vm657_vm12 = vweird.f32 %v2471_v41 }
 0x183   : > { %v1791_v24 = vclamps-f32 %v786_v15, 1.0  ;;  %v1187_v6 = vsub.f32 1.0, %v1186_v9  ;;  %v687_v42 = vadd.f32 0.112945676, %v686_v31  ;;  %v1098_v17 = vadd.f32 0.014752088, %v1097_v37  ;;  %vm2581_vm2 = vmor %vm657_vm12, %vm658_vm11 }
 0x184   : > { %vm1191_vm13 = vweird.f32 %v1930_v21  ;;  %vm2552_vm14 = vcmp.eq.f32.partialorder %v1194_v43, 8.507059e+37  ;;  %v1197_v7 = vor.u32 1.1754944e-38, %v1196_v5  ;;  %v1136_v30 = vadd.f32 0.001143296, %v1135_v12 }
 0x185   : > { %v872_v39 = vadd.f32 1.0, %v1791_v24  ;;  %v1188_v3 = vmul.f32 %v1930_v21, %v1187_v6  ;;  %v688_v62 = vmul.f32 %v687_v42, %v2246_v4  ;;  %v1099_v61 = vmul.f32 %v1098_v17, %v2293_v57  ;;  %vm1192_vm15 = vmor %vm1190_vm10, %vm1191_vm13 }
 0x186   : > { %v1234_v28 = vand.u32 2147483647, %v2532_v58  ;;  %v1137_v18 = vmul.f32 %v1136_v30, %v2338_v38  ;;  %v1015_v46 = vmul.f32 3.8918573e-05, %v2241_v0  ;;  %v1055_v52 = vmul.f32 3.8918573e-05, %v2265_v20 }
 0x187   : > { %v1932_v40 = vpop.eup %1931  ;;  %v878_v8 = vmul.f32 %v872_v39, %v2349_v53  ;;  %v1189_v19 = vadd.f32 %v1930_v21, %v1188_v3  ;;  %v689_v27 = vadd.f32 0.4994258, %v688_v62  ;;  %v1100_v10 = vadd.f32 0.112945676, %v1099_v61 }
 0x188   : > { %v1226_v35 = vmul.f32 %v1932_v40, %v2532_v58  ;;  %v1236_v43 = vand.u32 2147483648, %v2532_v58  ;;  %v1138_v13 = vadd.f32 0.014752088, %v1137_v18  ;;  %v1016_v55 = vadd.f32 0.001143296, %v1015_v46 }
 0x189   : > { %v882_v44 = vpack.c.bf16 %v878_v8, %v877_v56  ;;  %v1193_v5 = vsel %vm1192_vm15, %v1930_v21, %v1189_v19  ;;  %v690_v12 = vmul.f32 %v689_v27, %v2246_v4  ;;  %v1101_v16 = vmul.f32 %v1100_v10, %v2293_v57 }
 0x18a   : > { %v1198_v53 = vsel %vm2552_vm14, %v1197_v7, %v1193_v5  ;;  %v1227_v48 = vsub.f32 1.0, %v1226_v35  ;;  %v1139_v31 = vmul.f32 %v1138_v13, %v2338_v38  ;;  %v1017_v1 = vmul.f32 %v1016_v55, %v2241_v0 }
 0x18b   : > { %909 = vmatpush.bf16.msra.mxu1 %v882_v44  ;;  %v1199_v37 = vmul.f32 %v1198_v53, %v2461_v60  ;;  %v2575_v15 = vadd.f32 1.0, %v690_v12  ;;  %v1102_v9 = vadd.f32 0.4994258, %v1101_v16  ;;  %v1056_v56 = vadd.f32 0.001143296, %v1055_v52 }
 0x18c   : > { %v1228_v21 = vmul.f32 %v1932_v40, %v1227_v48  ;;  %vm1231_vm1 = vweird.f32 %v1932_v40  ;;  %v1140_v24 = vadd.f32 0.112945676, %v1139_v31  ;;  %v1018_v6 = vadd.f32 0.014752088, %v1017_v1 }
 0x18d   : > { %v660_v60 = vsel %vm2581_vm2, %v2499_v29, %v2548_v36  ;;  %v661_v42 = vand.u32 2147483647, %v2471_v41  ;;  %v663_v17 = vand.u32 2147483648, %v2471_v41  ;;  %1933 = vrcp.f32 %v2575_v15 }
 0x18e   : > { %v1229_v54 = vadd.f32 %v1932_v40, %v1228_v21  ;;  %vm1230_vm3 = vweird.f32 %v2532_v58  ;;  %v1103_v7 = vmul.f32 %v1102_v9, %v2293_v57  ;;  %v1141_v30 = vmul.f32 %v1140_v24, %v2338_v38 }
 0x18f   : > { %v1808_v39 = vclamps-f32 %v1199_v37, 1.0  ;;  %vm1232_vm4 = vmor %vm1230_vm3, %vm1231_vm1  ;;  %v1237_v3 = vor.u32 1.1754944e-38, %v1236_v43  ;;  %v1019_v62 = vmul.f32 %v1018_v6, %v2241_v0  ;;  %v1057_v29 = vmul.f32 %v1056_v56, %v2265_v20 }
 0x190   : > { %v1233_v36 = vsel %vm1232_vm4, %v1932_v40, %v1229_v54  ;;  %vm1235_vm5 = vcmp.eq.f32.partialorder %v1234_v28, 8.507059e+37  ;;  %v2597_v61 = vadd.f32 1.0, %v1103_v7  ;;  %v1142_v41 = vadd.f32 0.4994258, %v1141_v30 }
 0x191   : > { %v1238_v18 = vsel %vm1235_vm5, %v1237_v3, %v1233_v36  ;;  %v664_v46 = vor.u32 1.1754944e-38, %v663_v17  ;;  %v1020_v52 = vadd.f32 0.112945676, %v1019_v62  ;;  %v1058_v58 = vadd.f32 0.014752088, %v1057_v29 }
 0x192   : > { %v994_v8 = vmul.f32 0.5, %v2324_v26  ;;  %v1239_v19 = vmul.f32 %v1238_v18, %v2540_v34  ;;  %vm662_vm6 = vcmp.eq.f32.partialorder %v661_v42, 8.507059e+37  ;;  %1935 = vrcp.f32 %v2597_v61 }
 0x193   : > { %v1934_v27 = vpop.eup %1933  ;;  %v1246_v10 = vadd.f32 1.0, %v1808_v39  ;;  %v665_v35 = vsel %vm662_vm6, %v664_v46, %v660_v60  ;;  %v1143_v40 = vmul.f32 %v1142_v41, %v2338_v38  ;;  %v1021_v28 = vmul.f32 %v1020_v52, %v2241_v0 }
 0x194   : > { %v1092_v43 = vmul.f32 %v2445_v45, %v2293_v57  ;;  %v995_v13 = vmul.f32 0.5, %v2363_v50  ;;  %v1809_v55 = vclamps-f32 %v1239_v19, 1.0  ;;  %v693_v26 = vmul.f32 %v1934_v27, %v2575_v15 }
 0x195   : > { %v1131_v34 = vadd.f32 0.18741608, %v2448_v49  ;;  %v2609_v44 = vadd.f32 1.0, %v1143_v40  ;;  %v1022_v5 = vadd.f32 0.4994258, %v1021_v28  ;;  %v1059_v12 = vmul.f32 %v1058_v58, %v2265_v20 }
 0x196   : > { %v1247_v16 = vadd.f32 1.0, %v1809_v55  ;;  %v666_v53 = vmul.f32 %v665_v35, %v2372_v25  ;;  %v694_v48 = vsub.f32 1.0, %v693_v26  ;;  %v701_v31 = vand.u32 2147483647, %v2575_v15 }
 0x197   : > { %v1252_v1 = vmul.f32 %v1246_v10, %v994_v8  ;;  %vm698_vm7 = vweird.f32 %v1934_v27  ;;  %v703_v57 = vand.u32 2147483648, %v2575_v15  ;;  %1937 = vrcp.f32 %v2609_v44 }
 0x198   : > { %v1936_v50 = vpop.eup %1935  ;;  %v1253_v45 = vmul.f32 %v1247_v16, %v995_v13  ;;  %v695_v49 = vmul.f32 %v1934_v27, %v694_v48  ;;  %v1023_v37 = vmul.f32 %v1022_v5, %v2241_v0  ;;  %v1060_v9 = vadd.f32 0.112945676, %v1059_v12 }
 0x199   : > { %v1093_v56 = vadd.f32 1.1283791, %v1092_v43  ;;  %v1132_v21 = vmul.f32 %v1131_v34, %v2338_v38  ;;  %vm697_vm8 = vweird.f32 %v2575_v15  ;;  %v1106_v25 = vmul.f32 %v1936_v50, %v2597_v61 }
 0x19a   : > { %v1256_v4 = vpack.c.bf16 %v1253_v45, %v1252_v1  ;;  %v696_v24 = vadd.f32 %v1934_v27, %v695_v49  ;;  %v2620_v6 = vadd.f32 1.0, %v1023_v37  ;;  %v1061_v60 = vmul.f32 %v1060_v9, %v2265_v20  ;;  %vm699_vm9 = vmor %vm697_vm8, %vm698_vm7 }
 0x19b   : > { %v1788_v42 = vclamps-f32 %v666_v53, 1.0  ;;  %vm702_vm10 = vcmp.eq.f32.partialorder %v701_v31, 8.507059e+37  ;;  %v704_v17 = vor.u32 1.1754944e-38, %v703_v57  ;;  %v1107_v0 = vsub.f32 1.0, %v1106_v25 }
 0x19c   : > { %1262 = vmatpush.bf16.msra.mxu3 %v1256_v4  ;;  %v700_v54 = vsel %vm699_vm9, %v1934_v27, %v696_v24  ;;  %v1114_v38 = vand.u32 2147483647, %v2597_v61  ;;  %v1116_v15 = vand.u32 2147483648, %v2597_v61  ;;  %1939 = vrcp.f32 %v2620_v6 }
 0x19d   : > { %v1938_v7 = vpop.eup %1937  ;;  %v705_v30 = vsel %vm702_vm10, %v704_v17, %v700_v54  ;;  %v1108_v39 = vmul.f32 %v1936_v50, %v1107_v0  ;;  %vm1111_vm11 = vweird.f32 %v1936_v50  ;;  %v1062_v3 = vadd.f32 0.4994258, %v1061_v60 }
 0x19e   : > { %v1094_v62 = vmul.f32 %v1093_v56, %v2278_v33  ;;  %v1133_v29 = vadd.f32 1.1283791, %v1132_v21  ;;  %v706_v36 = vmul.f32 %v705_v30, %v2425_v14  ;;  %v1146_v41 = vmul.f32 %v1938_v7, %v2609_v44 }
 0x19f   : > { %v869_v18 = vadd.f32 1.0, %v1788_v42  ;;  %v1109_v46 = vadd.f32 %v1936_v50, %v1108_v39  ;;  %vm1110_vm12 = vweird.f32 %v2597_v61  ;;  %v1063_v52 = vmul.f32 %v1062_v3, %v2265_v20 }
 0x1a0   : > { %v1789_v58 = vclamps-f32 %v706_v36, 1.0  ;;  %vm1112_vm13 = vmor %vm1110_vm12, %vm1111_vm11  ;;  %vm1115_vm14 = vcmp.eq.f32.partialorder %v1114_v38, 8.507059e+37  ;;  %v1117_v8 = vor.u32 1.1754944e-38, %v1116_v15  ;;  %v1147_v19 = vsub.f32 1.0, %v1146_v41 }
 0x1a1   : > { %v1113_v27 = vsel %vm1112_vm13, %v1936_v50, %v1109_v46  ;;  %v1154_v10 = vand.u32 2147483647, %v2609_v44  ;;  %v1156_v33 = vand.u32 2147483648, %v2609_v44  ;;  %v2634_v35 = vadd.f32 1.0, %v1063_v52  ;;  %v2904_v46 = vld [vmem:[#allocation7_spill] sm:$0xff] }
 0x1a2   : > { %v1940_v14 = vpop.eup %1939  ;;  %v870_v40 = vadd.f32 1.0, %v1789_v58  ;;  %v1118_v28 = vsel %vm1115_vm14, %v1117_v8, %v1113_v27  ;;  %v1148_v43 = vmul.f32 %v1938_v7, %v1147_v19  ;;  %vm1151_vm15 = vweird.f32 %v1938_v7  ;;  %v2905_v58 = vld [vmem:[#allocation8_spill] sm:$0xff] }
 0x1a3   : > { %v1051_v61 = vadd.f32 0.18741608, %v2385_v51  ;;  %v1119_v13 = vmul.f32 %v1118_v28, %v1094_v62  ;;  %v1026_v55 = vmul.f32 %v1940_v14, %v2620_v6  ;;  %1941 = vrcp.f32 %v2634_v35 }
 0x1a4   : > { %v875_v26 = vmul.f32 %v869_v18, %v2302_v2  ;;  %v876_v34 = vmul.f32 %v870_v40, %v2318_v22  ;;  %v1149_v5 = vadd.f32 %v1938_v7, %v1148_v43  ;;  %vm1150_vm1 = vweird.f32 %v2609_v44  ;;  %v1853_v2 = vld [vmem:[%s2876_s5] sm:$0xff]  ;;  %v892_v43 = vpop.permute.xlu2 %891 }
 0x1a5   : > { %v1134_v12 = vmul.f32 %v1133_v29, %v2299_v63  ;;  %v1806_v16 = vclamps-f32 %v1119_v13, 1.0  ;;  %vm1152_vm2 = vmor %vm1150_vm1, %vm1151_vm15  ;;  %v1157_v53 = vor.u32 1.1754944e-38, %v1156_v33  ;;  %v1027_v48 = vsub.f32 1.0, %v1026_v55  ;;  %v1961_v40 = vld [vmem:[%s2174_s15] sm:$0xff]  ;;  %v1962_v55 = vld [vmem:[%s2174_s15 + $0x8] sm:$0xff] }
 0x1a6   : > { %v881_v31 = vpack.c.bf16 %v876_v34, %v875_v26  ;;  %v1153_v51 = vsel %vm1152_vm2, %v1938_v7, %v1149_v5  ;;  %vm1155_vm3 = vcmp.eq.f32.partialorder %v1154_v10, 8.507059e+37  ;;  %v1036_v1 = vand.u32 2147483648, %v2620_v6 }
 0x1a7   : > { %v1158_v57 = vsel %vm1155_vm3, %v1157_v53, %v1153_v51  ;;  %v1028_v22 = vmul.f32 %v1940_v14, %v1027_v48  ;;  %vm1031_vm4 = vweird.f32 %v1940_v14  ;;  %v1034_v44 = vand.u32 2147483647, %v2620_v6 }
 0x1a8   : > { %v1013_v63 = vadd.f32 1.1283791, %v2375_v32  ;;  %910 = vmatpush.bf16.msra.mxu1 %v881_v31  ;;  %v1159_v50 = vmul.f32 %v1158_v57, %v1134_v12  ;;  %vm899_vm5 = vcmask 392192   ;;  %v1052_v49 = vmul.f32 %v1051_v61, %v2265_v20  ;;  %v1963_v31 = vld [vmem:[%s2174_s15 + $0x10] sm:$0xff] }
 0x1a9   : > { %v1942_v45 = vpop.eup %1941  ;;  %v1244_v37 = vadd.f32 1.0, %v1806_v16  ;;  %v1029_v9 = vadd.f32 %v1940_v14, %v1028_v22  ;;  %vm1030_vm6 = vweird.f32 %v2620_v6  ;;  %v1037_v21 = vor.u32 1.1754944e-38, %v1036_v1 }
 0x1aa   : > { %v1807_v56 = vclamps-f32 %v1159_v50, 1.0  ;;  %vm1032_vm7 = vmor %vm1030_vm6, %vm1031_vm4  ;;  %v1066_v25 = vmul.f32 %v1942_v45, %v2634_v35  ;;  %v992_v4 = vmul.f32 0.5, %v2269_v23  ;;  %v993_v24 = vmul.f32 0.5, %v2288_v47 }
 0x1ab   : > { %1798 = vmatmul.msk.bf16.vlgmr.msra.gmra.mxu1 %vm899_vm5, %v1853_v2  ;;  %v1033_v32 = vsel %vm1032_vm7, %v1940_v14, %v1029_v9  ;;  %vm1035_vm8 = vcmp.eq.f32.partialorder %v1034_v44, 8.507059e+37  ;;  %v1014_v60 = vmul.f32 %v1013_v63, %v2232_v59  ;;  %v1053_v0 = vadd.f32 1.1283791, %v1052_v49 }
 0x1ac   : > { %v1245_v20 = vadd.f32 1.0, %v1807_v56  ;;  %v1038_v42 = vsel %vm1035_vm8, %v1037_v21, %v1033_v32  ;;  %v1067_v17 = vsub.f32 1.0, %v1066_v25  ;;  %v1250_v6 = vmul.f32 %v1244_v37, %v992_v4 }
 0x1ad   : > { %v1074_v54 = vand.u32 2147483647, %v2634_v35  ;;  %v1076_v38 = vand.u32 2147483648, %v2634_v35  ;;  %v1039_v7 = vmul.f32 %v1038_v42, %v1014_v60  ;;  %vm1071_vm9 = vweird.f32 %v1942_v45 }
 0x1ae   : > { %v1251_v15 = vmul.f32 %v1245_v20, %v993_v24  ;;  %v1068_v23 = vmul.f32 %v1942_v45, %v1067_v17  ;;  %vm1070_vm10 = vweird.f32 %v2634_v35  ;;  %v1054_v59 = vmul.f32 %v1053_v0, %v2254_v11  ;;  %v887_v11 = vpop.permute.xlu1 %886 }
 0x1af   : > { %vm1072_vm11 = vmor %vm1070_vm10, %vm1071_vm9  ;;  %v1077_v39 = vor.u32 1.1754944e-38, %v1076_v38  ;;  %v1804_v3 = vclamps-f32 %v1039_v7, 1.0  ;;  %vm1075_vm12 = vcmp.eq.f32.partialorder %v1074_v54, 8.507059e+37  ;;  %v990_v52 = vmul.f32 0.5, %v2904_v46 }
 0x1b0   : > { %v1255_v47 = vpack.c.bf16 %v1251_v15, %v1250_v6  ;;  %v1069_v30 = vadd.f32 %v1942_v45, %v1068_v23  ;;  %v991_v8 = vmul.f32 0.5, %v2905_v58  ;;  %v2031_v49 = vmov 32.0  }
 0x1b1   : > { %v1242_v18 = vadd.f32 1.0, %v1804_v3  ;;  %1943 = vrcp.f32 %v2031_v49 }
 0x1b2   : > { %1263 = vmatpush.bf16.msra.mxu3 %v1255_v47  ;;  %v1073_v62 = vsel %vm1072_vm11, %v1942_v45, %v1069_v30 }
 0x1b3   : > { %v1078_v29 = vsel %vm1075_vm12, %v1077_v39, %v1073_v62  ;;  %v1248_v27 = vmul.f32 %v1242_v18, %v990_v52 }
 0x1b4   : > { %v1079_v36 = vmul.f32 %v1078_v29, %v1054_v59 }
 0x1b6   : > { %v1805_v41 = vclamps-f32 %v1079_v36, 1.0 }
 0x1b7   : > { %v1944_v37 = vpop.eup %1943 }
 0x1b8   : > { %v1243_v19 = vadd.f32 1.0, %v1805_v41  ;;  %v1295_v9 = vmul.f32 32.0, %v1944_v37  ;;  %vm1299_vm13 = vweird.f32 %v1944_v37 }
 0x1ba   : > { %v1249_v10 = vmul.f32 %v1243_v19, %v991_v8  ;;  %v1296_v56 = vsub.f32 1.0, %v1295_v9 }
 0x1bc   : > { %v1254_v33 = vpack.c.bf16 %v1249_v10, %v1248_v27  ;;  %v1297_v21 = vmul.f32 %v1944_v37, %v1296_v56 }
 0x1be   : > { %1264 = vmatpush.bf16.msra.mxu3 %v1254_v33  ;;  %v1298_v25 = vadd.f32 %v1944_v37, %v1297_v21 }
 0x1c0   : > { %v2687_v4 = vsel %vm1299_vm13, %v1944_v37, %v1298_v25 }
 0x1c1   : > { %1810 = vmatmul.msk.bf16.vlgmr.msra.gmra.mxu3 %vm899_vm5, %v1853_v2  ;;  %v1964_v2 = vld [vmem:[%s2174_s15 + $0x18] sm:$0xff]  ;;  %s436_s15 = scalar_lea.vmem [#allocation3], %s1769_s24 }
 0x1c2   : > { %s1700_s1 = sshll.u32 %s436_s15, 4  ;;  %s1701_s1 = int_to_ptr.vmem [resolvable:$true] %s1700_s1 }
 0x228   : > { %v912_v35 = vpop.f32.mrf.mxu1 }
 0x229   : > { %v913_v14 = vadd.f32 %v912_v35, %v887_v11 }
 0x22b   : > { %v917_v28 = vadd.f32 %v1961_v40, %v913_v14 }
 0x22d   : > { %919 = vst.msk [vmem:[#allocation2] sm:$0xff] %vm468_vm0, %v917_v28 }
 0x230   : > { %v914_v61 = vpop.f32.mrf.mxu1 }
 0x231   : > { %v915_v13 = vadd.f32 %v914_v61, %v892_v43 }
 0x233   : > { %v918_v26 = vadd.f32 %v1962_v55, %v915_v13  ;;  %v1855_v55 = vld [vmem:[%s2880_s9 + $0x8] sm:$0xff] }
 0x234   : > { %v2666_v34 = vld [vmem:[#allocation2] sm:$0xff]  ;;  %1425 = vmatpush.bf16.msrb.mxu1 %v1855_v55 }
 0x235   : > { %920 = vst.msk [vmem:[#allocation2 + $0x8] sm:$0xff] %vm468_vm0, %v918_v26  ;;  %v1282_v5 = vsel %vm468_vm0, %v2666_v34, 0.0  ;;  %v1909_v26 = vld [vmem:[%s2878_s7] ss:$0 sm:$0xff] }
 0x236   : > { %1283 = vadd.xlane.f32.xlu0 %v1282_v5 }
 0x23c   : > { %v2671_v12 = vld [vmem:[#allocation2 + $0x8] sm:$0xff] }
 0x23d   : > { %v1285_v16 = vsel %vm468_vm0, %v2671_v12, 0.0 }
 0x23e   : > { %1286 = vadd.xlane.f32.xlu1 %v1285_v16 }
 0x244   : > { %v1266_v53 = vpop.f32.mrf.mxu3 }
 0x245   : > { %v1267_v48 = vadd.f32 %v1266_v53, %v887_v11 }
 0x247   : > { %v1271_v51 = vadd.f32 %v1963_v31, %v1267_v48  ;;  %v1854_v48 = vld [vmem:[%s2880_s9] sm:$0xff] }
 0x248   : > { %1426 = vmatpush.bf16.msrb.mxu1 %v1854_v48 }
 0x249   : > { %1274 = vst.msk [vmem:[#allocation2 + $0x10] sm:$0xff] %vm468_vm0, %v1271_v51 }
 0x24c   : > { %v1268_v1 = vpop.f32.mrf.mxu3 }
 0x24d   : > { %v1269_v57 = vadd.f32 %v1268_v1, %v892_v43 }
 0x24f   : > { %v1272_v22 = vadd.f32 %v1964_v2, %v1269_v57  ;;  %v1910_v2 = vld [vmem:[%s2879_s8] ss:$0 sm:$0xff] }
 0x250   : > { %v2678_v44 = vld [vmem:[#allocation2 + $0x10] sm:$0xff] }
 0x251   : > { %1275 = vst.msk [vmem:[#allocation2 + $0x18] sm:$0xff] %vm468_vm0, %v1272_v22  ;;  %v1288_v63 = vsel %vm468_vm0, %v2678_v44, 0.0 }
 0x252   : > { %1289 = vadd.xlane.f32.xlu2 %v1288_v63 }
 0x258   : > { %v2683_v50 = vld [vmem:[#allocation2 + $0x18] sm:$0xff] }
 0x259   : > { %v1291_v45 = vsel %vm468_vm0, %v2683_v50, 0.0 }
 0x25a   : > { %1292 = vadd.xlane.f32.xlu2 %v1291_v45 }
 0x2a9   : > { %v1284_v24 = vpop.xlane.xlu0 %1283 }
 0x2aa   : > { %v1301_v32 = vmul.f32 %v2687_v4, %v1284_v24 }
 0x2ac   : > { %v1305_v60 = vsub.f32 %v2666_v34, %v1301_v32 }
 0x2ae   : > { %v1309_v20 = vmul.f32 %v1305_v60, %v1305_v60 }
 0x2b0   : > { %v1313_v42 = vsel %vm468_vm0, %v1309_v20, 0.0 }
 0x2b1   : > { %v1287_v17 = vpop.xlane.xlu1 %1286  ;;  %1314 = vadd.xlane.f32.xlu0 %v1313_v42 }
 0x2b2   : > { %v1302_v0 = vmul.f32 %v2687_v4, %v1287_v17 }
 0x2b4   : > { %v1306_v6 = vsub.f32 %v2671_v12, %v1302_v0 }
 0x2b6   : > { %v1310_v54 = vmul.f32 %v1306_v6, %v1306_v6 }
 0x2b8   : > { %v1316_v38 = vsel %vm468_vm0, %v1310_v54, 0.0 }
 0x2b9   : > { %1317 = vadd.xlane.f32.xlu1 %v1316_v38 }
 0x2c5   : > { %v1290_v15 = vpop.xlane.xlu2 %1289 }
 0x2c6   : > { %v1303_v7 = vmul.f32 %v2687_v4, %v1290_v15 }
 0x2c8   : > { %v2697_v23 = vsub.f32 %v2678_v44, %v1303_v7 }
 0x2ca   : > { %v1311_v47 = vmul.f32 %v2697_v23, %v2697_v23 }
 0x2cc   : > { %v1319_v30 = vsel %vm468_vm0, %v1311_v47, 0.0 }
 0x2cd   : > { %1320 = vadd.xlane.f32.xlu2 %v1319_v30  ;;  %v1293_v39 = vpop.xlane.xlu2 %1292 }
 0x2ce   : > { %v1304_v59 = vmul.f32 %v2687_v4, %v1293_v39 }
 0x2d0   : > { %v2704_v3 = vsub.f32 %v2683_v50, %v1304_v59 }
 0x2d2   : > { %v1312_v62 = vmul.f32 %v2704_v3, %v2704_v3 }
 0x2d4   : > { %v1322_v29 = vsel %vm468_vm0, %v1312_v62, 0.0 }
 0x2d5   : > { %1323 = vadd.xlane.f32.xlu0 %v1322_v29 }
 0x324   : > { %v1315_v36 = vpop.xlane.xlu0 %1314 }
 0x325   : > { %v1325_v41 = vmul.f32 %v1315_v36, %v2687_v4  ;;  %v1911_v36 = vld [vmem:[%s2881_s10] ss:$0 sm:$0xff] }
 0x327   : > { %v1329_v18 = vadd.f32 1e-05, %v1325_v41 }
 0x329   : > { %1945 = vrsqrt.f32 %v1329_v18  ;;  %vm1339_vm15 = vweird.f32 %v1329_v18 }
 0x32c   : > { %v1318_v46 = vpop.xlane.xlu1 %1317 }
 0x32d   : > { %v1326_v52 = vmul.f32 %v1318_v46, %v2687_v4 }
 0x32f   : > { %v1946_v58 = vpop.eup %1945  ;;  %v1330_v8 = vadd.f32 1e-05, %v1326_v52 }
 0x330   : > { %v1334_v19 = vmul.f32 %v1946_v58, %v1329_v18  ;;  %vm1340_vm14 = vweird.f32 %v1946_v58 }
 0x331   : > { %1947 = vrsqrt.f32 %v1330_v8  ;;  %vm1341_vm1 = vmor %vm1339_vm15, %vm1340_vm14  ;;  %vm1349_vm3 = vweird.f32 %v1330_v8 }
 0x332   : > { %v1335_v27 = vmul.f32 %v1946_v58, %v1334_v19 }
 0x334   : > { %v1336_v10 = vmul.f32 0.5, %v1335_v27 }
 0x336   : > { %v1337_v33 = vsub.f32 1.5, %v1336_v10 }
 0x337   : > { %v1948_v11 = vpop.eup %1947 }
 0x338   : > { %v1338_v35 = vmul.f32 %v1946_v58, %v1337_v33  ;;  %v1344_v14 = vmul.f32 %v1948_v11, %v1330_v8  ;;  %vm1350_vm2 = vweird.f32 %v1948_v11 }
 0x339   : > { %vm1351_vm4 = vmor %vm1349_vm3, %vm1350_vm2 }
 0x33a   : > { %v1345_v40 = vmul.f32 %v1948_v11, %v1344_v14  ;;  %v1342_v28 = vsel %vm1341_vm1, %v1946_v58, %v1338_v35 }
 0x33b   : > { %v1373_v13 = vmul.f32 %v1342_v28, %v1305_v60 }
 0x33c   : > { %v1346_v43 = vmul.f32 0.5, %v1345_v40 }
 0x33d   : > { %v1380_v57 = vmul.f32 %v1909_v26, %v1373_v13 }
 0x33e   : > { %v1347_v61 = vsub.f32 1.5, %v1346_v43 }
 0x33f   : > { %v1387_v63 = vadd.f32 %v1910_v2, %v1380_v57 }
 0x340   : > { %v1348_v5 = vmul.f32 %v1948_v11, %v1347_v61  ;;  %v1321_v16 = vpop.xlane.xlu2 %1320 }
 0x341   : > { %v1327_v53 = vmul.f32 %v1321_v16, %v2687_v4 }
 0x342   : > { %v1352_v31 = vsel %vm1351_vm4, %v1948_v11, %v1348_v5 }
 0x343   : > { %v1374_v51 = vmul.f32 %v1352_v31, %v1306_v6  ;;  %v1331_v1 = vadd.f32 1e-05, %v1327_v53 }
 0x345   : > { %1949 = vrsqrt.f32 %v1331_v1  ;;  %v1381_v22 = vmul.f32 %v1909_v26, %v1374_v51  ;;  %vm1359_vm6 = vweird.f32 %v1331_v1 }
 0x347   : > { %v1388_v45 = vadd.f32 %v1910_v2, %v1381_v22 }
 0x348   : > { %v1324_v49 = vpop.xlane.xlu0 %1323 }
 0x349   : > { %v1328_v37 = vmul.f32 %v1324_v49, %v2687_v4  ;;  %v1391_v9 = vpack.c.bf16 %v1388_v45, %v1387_v63 }
 0x34b   : > { %v1950_v56 = vpop.eup %1949  ;;  %v1332_v21 = vadd.f32 1e-05, %v1328_v37  ;;  %1819 = vmatmul.msk.bf16.vlgmr.msrb.gmra.mxu1 %vm468_vm0, %v1391_v9 }
 0x34c   : > { %v1354_v25 = vmul.f32 %v1950_v56, %v1331_v1  ;;  %vm1360_vm5 = vweird.f32 %v1950_v56 }
 0x34d   : > { %1951 = vrsqrt.f32 %v1332_v21  ;;  %vm1361_vm7 = vmor %vm1359_vm6, %vm1360_vm5  ;;  %vm1369_vm9 = vweird.f32 %v1332_v21 }
 0x34e   : > { %v1355_v24 = vmul.f32 %v1950_v56, %v1354_v25 }
 0x350   : > { %v1356_v32 = vmul.f32 0.5, %v1355_v24 }
 0x352   : > { %v1357_v60 = vsub.f32 1.5, %v1356_v32 }
 0x353   : > { %v1952_v20 = vpop.eup %1951 }
 0x354   : > { %v1358_v42 = vmul.f32 %v1950_v56, %v1357_v60  ;;  %v1364_v17 = vmul.f32 %v1952_v20, %v1332_v21  ;;  %vm1370_vm8 = vweird.f32 %v1952_v20 }
 0x355   : > { %vm1371_vm10 = vmor %vm1369_vm9, %vm1370_vm8 }
 0x356   : > { %v1365_v0 = vmul.f32 %v1952_v20, %v1364_v17  ;;  %v1362_v6 = vsel %vm1361_vm7, %v1950_v56, %v1358_v42  ;;  %vm1652_vm7 = vcmask 523264  }
 0x357   : > { %v1375_v38 = vmul.f32 %v1362_v6, %v2697_v23 }
 0x358   : > { %v1366_v54 = vmul.f32 0.5, %v1365_v0 }
 0x359   : > { %v1382_v30 = vmul.f32 %v1909_v26, %v1375_v38 }
 0x35a   : > { %v1367_v4 = vsub.f32 1.5, %v1366_v54 }
 0x35b   : > { %v1389_v59 = vadd.f32 %v1910_v2, %v1382_v30 }
 0x35c   : > { %v1368_v15 = vmul.f32 %v1952_v20, %v1367_v4 }
 0x35e   : > { %v1372_v7 = vsel %vm1371_vm10, %v1952_v20, %v1368_v15 }
 0x35f   : > { %v1376_v47 = vmul.f32 %v1372_v7, %v2704_v3 }
 0x361   : > { %v1383_v39 = vmul.f32 %v1909_v26, %v1376_v47 }
 0x363   : > { %v1390_v62 = vadd.f32 %v1910_v2, %v1383_v39 }
 0x365   : > { %v1392_v29 = vpack.c.bf16 %v1390_v62, %v1389_v59 }
 0x367   : > { %1820 = vmatmul.msk.bf16.gmra.mxu1 %vm468_vm0, %v1392_v29 }
 0x3c8   : > { %v1428_v41 = vpop.f32.mrf.mxu1 }
 0x3c9   : > { %v2732_v18 = vadd.f32 %v1911_v36, %v1428_v41 }
 0x3cb   : > { %v2735_v23 = vmul.f32 0.70710677, %v2732_v18 }
 0x3cd   : > { %v1446_v3 = vmul.f32 %v2735_v23, %v2735_v23 }
 0x3cf   : > { %v1447_v46 = vmin.f32 %v1446_v3, 16.0 }
 0x3d0   : > { %v1430_v33 = vpop.f32.mrf.mxu1 }
 0x3d1   : > { %v1459_v52 = vmul.f32 3.8918573e-05, %v1447_v46  ;;  %v1448_v11 = vmul.f32 2.1237322e-06, %v1447_v46  ;;  %v2739_v35 = vadd.f32 %v1911_v36, %v1430_v33 }
 0x3d3   : > { %v1460_v58 = vadd.f32 0.001143296, %v1459_v52  ;;  %v2742_v40 = vmul.f32 0.70710677, %v2739_v35  ;;  %v1449_v28 = vadd.f32 0.00028619796, %v1448_v11 }
 0x3d5   : > { %v1461_v8 = vmul.f32 %v1460_v58, %v1447_v46  ;;  %v1486_v61 = vmul.f32 %v2742_v40, %v2742_v40  ;;  %v1450_v55 = vmul.f32 %v1449_v28, %v1447_v46 }
 0x3d7   : > { %v1462_v19 = vadd.f32 0.014752088, %v1461_v8  ;;  %v1487_v13 = vmin.f32 %v1486_v61, 16.0  ;;  %v1451_v31 = vadd.f32 0.0036580483, %v1450_v55 }
 0x3d9   : > { %v1463_v27 = vmul.f32 %v1462_v19, %v1447_v46  ;;  %v1488_v5 = vmul.f32 2.1237322e-06, %v1487_v13  ;;  %v1499_v16 = vmul.f32 3.8918573e-05, %v1487_v13  ;;  %v1452_v22 = vmul.f32 %v1451_v31, %v1447_v46 }
 0x3db   : > { %v1464_v10 = vadd.f32 0.112945676, %v1463_v27  ;;  %v1489_v53 = vadd.f32 0.00028619796, %v1488_v5  ;;  %v1500_v48 = vadd.f32 0.001143296, %v1499_v16 }
 0x3dc   : > { %v1453_v37 = vadd.f32 0.05243302, %v1452_v22 }
 0x3dd   : > { %v1465_v14 = vmul.f32 %v1464_v10, %v1447_v46  ;;  %v1501_v1 = vmul.f32 %v1500_v48, %v1487_v13  ;;  %v1490_v57 = vmul.f32 %v1489_v53, %v1487_v13 }
 0x3de   : > { %v1454_v60 = vmul.f32 %v1453_v37, %v1447_v46 }
 0x3df   : > { %v1466_v43 = vadd.f32 0.4994258, %v1465_v14  ;;  %v1502_v2 = vadd.f32 0.014752088, %v1501_v1  ;;  %v1491_v45 = vadd.f32 0.0036580483, %v1490_v57 }
 0x3e0   : > { %v1455_v4 = vadd.f32 0.18741608, %v1454_v60  ;;  %v1856_v57 = vld [vmem:[%s2882_s11] sm:$0xff] }
 0x3e1   : > { %v1467_v26 = vmul.f32 %v1466_v43, %v1447_v46  ;;  %v1503_v63 = vmul.f32 %v1502_v2, %v1487_v13  ;;  %v1492_v21 = vmul.f32 %v1491_v45, %v1487_v13 }
 0x3e2   : > { %v1456_v62 = vmul.f32 %v1455_v4, %v1447_v46 }
 0x3e3   : > { %v2746_v51 = vadd.f32 1.0, %v1467_v26  ;;  %v1504_v49 = vadd.f32 0.112945676, %v1503_v63  ;;  %v1493_v0 = vadd.f32 0.05243302, %v1492_v21 }
 0x3e4   : > { %v1433_v56 = vpop.f32.mrf.mxu1  ;;  %v1457_v10 = vadd.f32 1.1283791, %v1456_v62 }
 0x3e5   : > { %1953 = vrcp.f32 %v2746_v51  ;;  %v1505_v9 = vmul.f32 %v1504_v49, %v1487_v13  ;;  %v2749_v25 = vadd.f32 %v1911_v36, %v1433_v56  ;;  %v1494_v47 = vmul.f32 %v1493_v0, %v1487_v13 }
 0x3e6   : > { %vm1474_vm11 = vweird.f32 %v2746_v51  ;;  %v1478_v33 = vand.u32 2147483647, %v2746_v51  ;;  %v1480_v11 = vand.u32 2147483648, %v2746_v51  ;;  %v1458_v4 = vmul.f32 %v1457_v10, %v2735_v23 }
 0x3e7   : > { %v1506_v32 = vadd.f32 0.4994258, %v1505_v9  ;;  %v2754_v20 = vmul.f32 0.70710677, %v2749_v25  ;;  %v1495_v58 = vadd.f32 0.18741608, %v1494_v47 }
 0x3e8   : > { %vm1479_vm2 = vcmp.eq.f32.partialorder %v1478_v33, 8.507059e+37  ;;  %v1481_v21 = vor.u32 1.1754944e-38, %v1480_v11 }
 0x3e9   : > { %v1507_v42 = vmul.f32 %v1506_v32, %v1487_v13  ;;  %v1526_v6 = vmul.f32 %v2754_v20, %v2754_v20  ;;  %v1496_v61 = vmul.f32 %v1495_v58, %v1487_v13 }
 0x3eb   : > { %v2751_v24 = vpop.eup %1953  ;;  %v1508_v54 = vadd.f32 1.0, %v1507_v42  ;;  %v2760_v38 = vmin.f32 %v1526_v6, 16.0  ;;  %v1497_v45 = vadd.f32 1.1283791, %v1496_v61  ;;  %v1439_v61 = vmul.f32 0.5, %v2739_v35 }
 0x3ec   : > { %v1470_v17 = vmul.f32 %v2751_v24, %v2746_v51  ;;  %v1435_v15 = vpop.f32.mrf.mxu1  ;;  %vm1475_vm12 = vweird.f32 %v2751_v24 }
 0x3ed   : > { %1955 = vrcp.f32 %v1508_v54  ;;  %v1528_v30 = vmul.f32 2.1237322e-06, %v2760_v38  ;;  %v2763_v39 = vadd.f32 %v1911_v36, %v1435_v15  ;;  %v1539_v59 = vmul.f32 3.8918573e-05, %v2760_v38  ;;  %vm2786_vm14 = vmor %vm1474_vm11, %vm1475_vm12 }
 0x3ee   : > { %v1471_v7 = vsub.f32 1.0, %v1470_v17  ;;  %v1520_v26 = vand.u32 2147483648, %v1508_v54  ;;  %v1518_v31 = vand.u32 2147483647, %v1508_v54  ;;  %vm1514_vm15 = vweird.f32 %v1508_v54 }
 0x3ef   : > { %v1529_v29 = vadd.f32 0.00028619796, %v1528_v30  ;;  %v1540_v41 = vadd.f32 0.001143296, %v1539_v59  ;;  %v2767_v3 = vmul.f32 0.70710677, %v2763_v39  ;;  %v1498_v6 = vmul.f32 %v1497_v45, %v2742_v40 }
 0x3f0   : > { %v1472_v52 = vmul.f32 %v2751_v24, %v1471_v7  ;;  %v1521_v37 = vor.u32 1.1754944e-38, %v1520_v26  ;;  %vm1519_vm3 = vcmp.eq.f32.partialorder %v1518_v31, 8.507059e+37 }
 0x3f1   : > { %v1541_v19 = vmul.f32 %v1540_v41, %v2760_v38  ;;  %v1566_v27 = vmul.f32 %v2767_v3, %v2767_v3  ;;  %v1530_v46 = vmul.f32 %v1529_v29, %v2760_v38 }
 0x3f2   : > { %v1473_v43 = vadd.f32 %v2751_v24, %v1472_v52  ;;  %v1859_v52 = vld [vmem:[%s2882_s11 + $0x18] sm:$0xff] }
 0x3f3   : > { %v1956_v8 = vpop.eup %1955  ;;  %v1542_v14 = vadd.f32 0.014752088, %v1541_v19  ;;  %v2777_v28 = vmin.f32 %v1566_v27, 16.0  ;;  %v1531_v1 = vadd.f32 0.0036580483, %v1530_v46  ;;  %1663 = vmatpush.bf16.msrb.mxu3 %v1859_v52  ;;  %v1858_v19 = vld [vmem:[%s2882_s11 + $0x10] sm:$0xff] }
 0x3f4   : > { %v1510_v36 = vmul.f32 %v1956_v8, %v1508_v54  ;;  %vm1515_vm13 = vweird.f32 %v1956_v8  ;;  %v1477_v63 = vsel %vm2786_vm14, %v2751_v24, %v1473_v43  ;;  %v1857_v43 = vld [vmem:[%s2882_s11 + $0x8] sm:$0xff] }
 0x3f5   : > { %v1543_v5 = vmul.f32 %v1542_v14, %v2760_v38  ;;  %v1568_v16 = vmul.f32 2.1237322e-06, %v2777_v28  ;;  %v1579_v53 = vmul.f32 3.8918573e-05, %v2777_v28  ;;  %vm1516_vm1 = vmor %vm1514_vm15, %vm1515_vm13  ;;  %v1532_v42 = vmul.f32 %v1531_v1, %v2760_v38 }
 0x3f6   : > { %v1511_v55 = vsub.f32 1.0, %v1510_v36  ;;  %v1482_v0 = vsel %vm1479_vm2, %v1481_v21, %v1477_v63 }
 0x3f7   : > { %v1544_v2 = vadd.f32 0.112945676, %v1543_v5  ;;  %v1569_v13 = vadd.f32 0.00028619796, %v1568_v16  ;;  %v1580_v22 = vadd.f32 0.001143296, %v1579_v53  ;;  %v1483_v30 = vmul.f32 %v1482_v0, %v1458_v4  ;;  %1664 = vmatpush.bf16.msrb.mxu3 %v1858_v19 }
 0x3f8   : > { %v1512_v48 = vmul.f32 %v1956_v8, %v1511_v55  ;;  %v1533_v59 = vadd.f32 0.05243302, %v1532_v42  ;;  %v1438_v16 = vmul.f32 0.5, %v2732_v18 }
 0x3f9   : > { %v1545_v9 = vmul.f32 %v1544_v2, %v2760_v38  ;;  %v1570_v51 = vmul.f32 %v1569_v13, %v2777_v28  ;;  %v1581_v56 = vmul.f32 %v1580_v22, %v2777_v28  ;;  %v1821_v23 = vclamps-f32 %v1483_v30, 1.0 }
 0x3fa   : > { %v1513_v49 = vadd.f32 %v1956_v8, %v1512_v48 }
 0x3fb   : > { %v1546_v17 = vadd.f32 0.4994258, %v1545_v9  ;;  %v1582_v24 = vadd.f32 0.014752088, %v1581_v56  ;;  %v1571_v54 = vadd.f32 0.0036580483, %v1570_v51  ;;  %1665 = vmatpush.bf16.msrb.mxu3 %v1857_v43 }
 0x3fc   : > { %v1517_v32 = vsel %vm1516_vm1, %v1956_v8, %v1513_v49  ;;  %v1534_v8 = vmul.f32 %v1533_v59, %v2760_v38  ;;  %v1606_v11 = vadd.f32 1.0, %v1821_v23  ;;  %v1440_v59 = vmul.f32 0.5, %v2749_v25 }
 0x3fd   : > { %v1522_v60 = vsel %vm1519_vm3, %v1521_v37, %v1517_v32  ;;  %v1547_v15 = vmul.f32 %v1546_v17, %v2760_v38  ;;  %v1583_v7 = vmul.f32 %v1582_v24, %v2777_v28  ;;  %v1572_v41 = vmul.f32 %v1571_v54, %v2777_v28 }
 0x3fe   : > { %v1523_v47 = vmul.f32 %v1522_v60, %v1498_v6  ;;  %v1535_v14 = vadd.f32 0.18741608, %v1534_v8  ;;  %v1610_v31 = vmul.f32 %v1606_v11, %v1438_v16 }
 0x3ff   : > { %v1548_v62 = vadd.f32 1.0, %v1547_v15  ;;  %v1584_v29 = vadd.f32 0.112945676, %v1583_v7  ;;  %v1573_v27 = vadd.f32 0.05243302, %v1572_v41  ;;  %1666 = vmatpush.bf16.msrb.mxu3 %v1856_v57 }
 0x400   : > { %v1822_v40 = vclamps-f32 %v1523_v47, 1.0  ;;  %v1536_v1 = vmul.f32 %v1535_v14, %v2760_v38 }
 0x401   : > { %1957 = vrcp.f32 %v1548_v62  ;;  %v1585_v58 = vmul.f32 %v1584_v29, %v2777_v28  ;;  %v1574_v26 = vmul.f32 %v1573_v27, %v2777_v28  ;;  %v1560_v35 = vand.u32 2147483648, %v1548_v62 }
 0x402   : > { %v1607_v36 = vadd.f32 1.0, %v1822_v40  ;;  %v1558_v22 = vand.u32 2147483647, %v1548_v62  ;;  %vm1554_vm5 = vweird.f32 %v1548_v62  ;;  %v1537_v18 = vadd.f32 1.1283791, %v1536_v1 }
 0x403   : > { %v1586_v10 = vadd.f32 0.4994258, %v1585_v58  ;;  %v1575_v13 = vadd.f32 0.18741608, %v1574_v26  ;;  %v1561_v38 = vor.u32 1.1754944e-38, %v1560_v35 }
 0x404   : > { %v1611_v53 = vmul.f32 %v1607_v36, %v1439_v61  ;;  %vm1559_vm8 = vcmp.eq.f32.partialorder %v1558_v22, 8.507059e+37  ;;  %v1538_v21 = vmul.f32 %v1537_v18, %v2754_v20 }
 0x405   : > { %v1587_v46 = vmul.f32 %v1586_v10, %v2777_v28  ;;  %v1576_v9 = vmul.f32 %v1575_v13, %v2777_v28 }
 0x406   : > { %v1614_v63 = vpack.c.bf16 %v1611_v53, %v1610_v31 }
 0x407   : > { %v1958_v33 = vpop.eup %1957  ;;  %v1588_v5 = vadd.f32 1.0, %v1587_v46  ;;  %v1577_v60 = vadd.f32 1.1283791, %v1576_v9 }
 0x408   : > { %v1550_v55 = vmul.f32 %v1958_v33, %v1548_v62  ;;  %vm1555_vm4 = vweird.f32 %v1958_v33  ;;  %1841 = vmatmul.msk.bf16.vlgmr.msrb.gmra.mxu3 %vm1652_vm7, %v1614_v63  ;;  %v1441_v62 = vmul.f32 0.5, %v2763_v39 }
 0x409   : > { %1959 = vrcp.f32 %v1588_v5  ;;  %vm1556_vm6 = vmor %vm1554_vm5, %vm1555_vm4  ;;  %v1600_v42 = vand.u32 2147483648, %v1588_v5  ;;  %v1598_v0 = vand.u32 2147483647, %v1588_v5  ;;  %vm1594_vm10 = vweird.f32 %v1588_v5 }
 0x40a   : > { %v1551_v48 = vsub.f32 1.0, %v1550_v55  ;;  %v1578_v4 = vmul.f32 %v1577_v60, %v2767_v3  ;;  %v1912_v3 = vld [vmem:[%s2883_s12] ss:$0 sm:$0xff] }
 0x40b   : > { %v1601_v54 = vor.u32 1.1754944e-38, %v1600_v42  ;;  %vm1599_vm12 = vcmp.eq.f32.partialorder %v1598_v0, 8.507059e+37 }
 0x40c   : > { %v1552_v2 = vmul.f32 %v1958_v33, %v1551_v48 }
 0x40e   : > { %v1553_v45 = vadd.f32 %v1958_v33, %v1552_v2 }
 0x40f   : > { %v1960_v49 = vpop.eup %1959 }
 0x410   : > { %v1557_v37 = vsel %vm1556_vm6, %v1958_v33, %v1553_v45  ;;  %v1590_v51 = vmul.f32 %v1960_v49, %v1588_v5  ;;  %vm1595_vm9 = vweird.f32 %v1960_v49 }
 0x411   : > { %v1562_v56 = vsel %vm1559_vm8, %v1561_v38, %v1557_v37  ;;  %vm1596_vm11 = vmor %vm1594_vm10, %vm1595_vm9 }
 0x412   : > { %v1591_v32 = vsub.f32 1.0, %v1590_v51  ;;  %v1563_v17 = vmul.f32 %v1562_v56, %v1538_v21 }
 0x414   : > { %v1592_v24 = vmul.f32 %v1960_v49, %v1591_v32  ;;  %v1823_v28 = vclamps-f32 %v1563_v17, 1.0 }
 0x416   : > { %v1593_v6 = vadd.f32 %v1960_v49, %v1592_v24  ;;  %v1608_v20 = vadd.f32 1.0, %v1823_v28 }
 0x418   : > { %v1597_v15 = vsel %vm1596_vm11, %v1960_v49, %v1593_v6  ;;  %v1612_v41 = vmul.f32 %v1608_v20, %v1440_v59 }
 0x419   : > { %v1602_v7 = vsel %vm1599_vm12, %v1601_v54, %v1597_v15 }
 0x41a   : > { %v1603_v47 = vmul.f32 %v1602_v7, %v1578_v4 }
 0x41c   : > { %v1824_v30 = vclamps-f32 %v1603_v47, 1.0 }
 0x41e   : > { %v1609_v29 = vadd.f32 1.0, %v1824_v30 }
 0x420   : > { %v1613_v52 = vmul.f32 %v1609_v29, %v1441_v62 }
 0x422   : > { %v1615_v40 = vpack.c.bf16 %v1613_v52, %v1612_v41 }
 0x424   : > { %1842 = vmatmul.msk.bf16.gmra.mxu3 %vm1652_vm7, %v1615_v40 }
 0x48b   : > { %v1668_v58 = vpop.f32.mrf.mxu3 }
 0x48c   : > { %v1669_v23 = vadd.f32 %v1912_v3, %v1668_v58 }
 0x48e   : > { %v1678_v8 = vadd.f32 %v1669_v23, %v2666_v34 }
 0x490   : > { %1682 = vst.msk [vmem:[%s436_s15] sm:$0xff] %vm468_vm0, %v1678_v8 }
 0x493   : > { %v1670_v25 = vpop.f32.mrf.mxu3 }
 0x494   : > { %v1671_v39 = vadd.f32 %v1912_v3, %v1670_v25 }
 0x496   : > { %v1679_v19 = vadd.f32 %v1671_v39, %v2671_v12 }
 0x498   : > { %1683 = vst.msk [vmem:[%s436_s15 + $0x8] sm:$0xff] %vm468_vm0, %v1679_v19 }
 0x4a7   : > { %v1673_v27 = vpop.f32.mrf.mxu3 }
 0x4a8   : > { %v1674_v10 = vadd.f32 %v1912_v3, %v1673_v27 }
 0x4aa   : > { %v1680_v36 = vadd.f32 %v1674_v10, %v2678_v44 }
 0x4ac   : > { %1684 = vst.msk [vmem:[%s436_s15 + $0x10] sm:$0xff] %vm468_vm0, %v1680_v36 }
 0x4af   : > { %v1675_v34 = vpop.f32.mrf.mxu3 }
 0x4b0   : > { %v1676_v46 = vadd.f32 %v1912_v3, %v1675_v34 }
 0x4b2   : > { %v1681_v12 = vadd.f32 %v1676_v46, %v2683_v50 }
 0x4b4   : > { %1685 = vst.msk [vmem:[%s436_s15 + $0x18] sm:$0xff] %vm468_vm0, %v1681_v12 }
 0x4b5   : > { %1992 = shalt.err (!%p1989_p3)
}
 0x4b6   : > { %s2032_s17 = smov 128   ;;  %s2033_s15 = smov 8  }
 0x4b7   : > { %1862 = dma.vmem_to_hbm [thread:$0]  (%p2142_p5), %s1701_s1, 512, %s1703_s2, %s1687_s29, %s2032_s17, %s2032_s17, %s2033_s15  }
 0x4b8 PF: > { %p1868_p4 = scmp.ge.s32.totalorder %s2027_s28, 2  ;;  %s1717_s24 = sand.u32 1, %s2015_s25  }
 0x4b9   : > { %s1718_s30 = scalar_lea.sflag [#allocation4], %s1717_s24 }
 0x4ba   : > { %p1865_p7 = pnand %p1868_p4, %p2146_p6 }
 0x4bc   : > { %p1866_p8 = pneg %p1865_p7 }
 0x4be   : > { %2010 = dma.done.wait (%p1866_p8), %s1718_s30, 512  }
 0x4bf   : > { %2012 = vsyncadd (%p1866_p8), %s1718_s30, 4294966784  ;;  %s2908_s20 = sld [smem:[#allocation6_spill]]  ;;  %p23_p9 = scmp.ge.s32.totalorder %s2129_s14, 4  }
 0x4c0   : > { %s2909_s25 = smov %s2019_s26  ;;  %s2910_s26 = smov %s2023_s27 }
 0x4c1   : > { %s2912_s28 = smov %s2129_s14  ;;  %25 = sbr.rel (!%p23_p9) target bundleno = 6 (0x6), region = 109 }
 0x4c5   : > { %s2911_s27 = smov %s2908_s20 }
 0x4c6   :  { %1724 = vsyncpa [#allocation4], 1 }
 0x4c7   :  { %1726 = vsyncpa [#allocation4 + $0x1], 1 }

</bundles_post_ra>
